<compile_context>
chip_gen: v7x
topology: tpu7x:2x2x1
jax: 0.10.0
libtpu: 0.0.40
codegen_flags: <defaults>
</compile_context>

<pallas_src>
import functools

import numpy as np
import jax
import jax.numpy as jnp
from jax.experimental import pallas as pl
from jax.experimental.pallas import tpu as pltpu


def _upconv_kernel(x_ref, w_ref, b_ref, o_ref, xs_ref, *, K, st, th, Wo, Wp,
                   Cin, LP):
    """One (image, output-row-block).

    x_ref : (Cin, Lsrc)        flattened padded/upsampled row window (lanes)
    w_ref : (Cout, K*K*Cin)    conv weights, taps folded into the contraction
    b_ref : (Cout, 1)          f32 bias
    o_ref : (Cout, th, Wo)     NCHW output block
    xs_ref: (K*K*Cin, th*Wp)   VMEM scratch holding all tap-shifted windows
    """
    # 1) Pack every (ky, kx) tap into the contraction axis of one matmul:
    #    xs[(ky*K+kx)*Cin + ci, t*Wp + ow] = x[ci, (t*st+ky)*Wp + ow*st + kx].
    for ky in range(K):
        for kx in range(K):
            off = ky * Wp + kx
            r = (ky * K + kx) * Cin
            if st == 1:
                xs_ref[r:r + Cin, :] = x_ref[:, off:off + LP]
            else:
                xs_ref[r:r + Cin, :] = x_ref[:, pl.ds(off, LP, st)]

    # 2) Single MXU matmul, f32 accumulation: (Cout, KKC) @ (KKC, th*Wp).
    acc = jnp.dot(w_ref[...], xs_ref[...], preferred_element_type=jnp.float32)
    acc = acc + b_ref[...]              # (Cout, 1) f32 bias broadcast over lanes

    # 3) Compact once: keep the first Wo lanes of every Wp-strided row group
    #    and store the NCHW output rows (Cout leading, no transpose).
    for t in range(th):
        o_ref[:, t, :] = acc[:, t * Wp:t * Wp + Wo].astype(o_ref.dtype)


def _src_index(padded_len, pad, up_len, scale):
    """Padded+upsampled coordinate -> original coordinate.

    Composes ReflectionPad2d(pad) (in upsampled space) with nearest-neighbour
    upsample by `scale` (torch Upsample default: out[i] = in[i // scale]).
    """
    j = np.arange(padded_len, dtype=np.int64) - pad
    j = np.where(j < 0, -j, j)
    j = np.where(j > up_len - 1, 2 * (up_len - 1) - j, j)
    return (j // max(scale, 1)).astype(np.int32)


def _round_up(a, b):
    return -(-a // b) * b


def _vmem_block_bytes(th, Wp, Wo, K, st, Cin, Cout, esize):
    """Padded per-block VMEM footprint (double-buffered in/out, scratch, acc)."""
    LP = th * Wp
    Lsrc = _round_up(st * (LP - 1) + (K - 1) * (Wp + 1) + 1, 128)
    kkc = K * K * Cin
    in_blk = _round_up(Cin, 8) * Lsrc * esize
    out_blk = _round_up(Cout, 8) * th * _round_up(Wo, 128) * 4
    w_blk = _round_up(Cout, 8) * _round_up(kkc, 128) * esize
    b_blk = 8 * 128 * 4
    xs_blk = _round_up(kkc, 8) * _round_up(LP, 128) * esize
    acc_blk = _round_up(Cout, 8) * _round_up(LP, 128) * 4
    return 2 * (in_blk + out_blk + w_blk + b_blk) + xs_blk + acc_blk


def _pick_rows(Ho, Wo, Wp, K, st, Cin, Cout, esize, budget, max_th=64):
    """Output rows per block: th | Ho, (th % 8 == 0 or th == Ho), fits VMEM."""
    cands = [d for d in range(1, min(Ho, max_th) + 1)
             if Ho % d == 0 and (d % 8 == 0 or d == Ho)]
    if not cands:
        cands = [Ho]
    for th in sorted(cands, reverse=True):
        if _vmem_block_bytes(th, Wp, Wo, K, st, Cin, Cout, esize) <= budget:
            return th
    return min(cands)


def upsample_conv_forward(x, weight, bias, *, stride, upsample,
                          compute_dtype=jnp.bfloat16):
    N, Cin, H, W = x.shape
    Cout, Cin_w, K, K2 = weight.shape
    assert Cin == Cin_w and K == K2
    st = int(stride)
    s = int(upsample) if upsample else 1
    assert st >= 1 and s >= 1
    p = K // 2

    Hup, Wup = H * s, W * s
    if p > 0 and (p > Hup - 1 or p > Wup - 1):
        raise ValueError("ReflectionPad2d padding must be < upsampled spatial dim")
    Hp, Wp = Hup + 2 * p, Wup + 2 * p
    if Hp < K or Wp < K:
        raise ValueError("conv window larger than padded input")
    Ho = (Hp - K) // st + 1
    Wo = (Wp - K) // st + 1

    esize = jnp.dtype(compute_dtype).itemsize
    try:
        vmem_cap = int(getattr(pltpu.get_tpu_info(), "vmem_capacity_bytes",
                               64 << 20))
    except Exception:
        vmem_cap = 64 << 20
    budget = min(36 << 20, (vmem_cap * 5) // 8)     # v7x (64 MiB) safe

    th = _pick_rows(Ho, Wo, Wp, K, st, Cin, Cout, esize, budget)
    nHb = Ho // th
    LP = th * Wp
    KKC = K * K * Cin
    Lsrc = _round_up(st * (LP - 1) + (K - 1) * (Wp + 1) + 1, 128)

    # ---- fold nearest-upsample + reflection pad + row windowing into one
    # ---- host gather, channels-first, flattened (row, col) window on lanes.
    hsrc = _src_index(Hp, p, Hup, s)                 # (Hp,)
    wsrc = _src_index(Wp, p, Wup, s)                 # (Wp,)
    f = np.arange(Lsrc, dtype=np.int64)
    rp = np.arange(nHb, dtype=np.int64)[:, None] * (th * st) + f[None, :] // Wp
    rp = np.minimum(rp, Hp - 1)        # trailing slack (never read) kept in range
    hidx = jnp.asarray(hsrc[rp])                     # (nHb, Lsrc)
    widx = jnp.asarray(wsrc[f % Wp])[None, :]        # (1, Lsrc)

    x_c = x.astype(compute_dtype)
    xwin = x_c[:, :, hidx, widx]                     # (N, Cin, nHb, Lsrc)
    xwin = xwin.reshape(N, Cin, nHb * Lsrc)          # metadata-only reshape

    # Weights: columns ordered (ky, kx, ci) to match the scratch packing.
    w2 = jnp.transpose(weight, (0, 2, 3, 1)).reshape(Cout, KKC)
    w2 = w2.astype(compute_dtype)
    b2 = bias.reshape(Cout, 1).astype(jnp.float32)

    # Larger grid extent first -> better megacore sharding (both axes parallel).
    if nHb >= N:
        grid = (nHb, N)
        x_map = lambda hb, n: (n, 0, hb)
        wb_map = lambda hb, n: (0, 0)
        o_map = lambda hb, n: (n, 0, hb, 0)
    else:
        grid = (N, nHb)
        x_map = lambda n, hb: (n, 0, hb)
        wb_map = lambda n, hb: (0, 0)
        o_map = lambda n, hb: (n, 0, hb, 0)

    need = _vmem_block_bytes(th, Wp, Wo, K, st, Cin, Cout, esize)
    vmem_limit = max(16 << 20, need + (2 << 20))
    vmem_limit = min(vmem_limit, max(vmem_cap - (4 << 20), 16 << 20))

    kernel = functools.partial(_upconv_kernel, K=K, st=st, th=th, Wo=Wo, Wp=Wp,
                               Cin=Cin, LP=LP)

    out = pl.pallas_call(
        kernel,
        out_shape=jax.ShapeDtypeStruct((N, Cout, Ho, Wo), jnp.float32),
        grid_spec=pltpu.PrefetchScalarGridSpec(
            num_scalar_prefetch=0,
            grid=grid,
            in_specs=[
                pl.BlockSpec((None, Cin, Lsrc), x_map),
                pl.BlockSpec((Cout, KKC), wb_map),
                pl.BlockSpec((Cout, 1), wb_map),
            ],
            out_specs=pl.BlockSpec((None, Cout, th, Wo), o_map),
            scratch_shapes=[pltpu.VMEM((KKC, LP), compute_dtype)],
        ),
        compiler_params=pltpu.CompilerParams(
            dimension_semantics=("parallel", "parallel"),
            vmem_limit_bytes=int(vmem_limit)),
        cost_estimate=pl.CostEstimate(
            flops=2 * N * Ho * Wo * Cout * KKC,
            transcendentals=0,
            bytes_accessed=int(xwin.size * esize + w2.size * esize
                               + b2.size * 4 + N * Cout * Ho * Wo * 4)),
    )(xwin, w2, b2)

    return out                                       # (N, Cout, Ho, Wo) NCHW f32


class UpsampleConvLayer:
    """JAX/Pallas port of the PyTorch UpsampleConvLayer forward pass."""

    def __init__(self, in_channels, out_channels, kernel_size, stride,
                 upsample=None, *, key):
        self.upsample = upsample
        self.kernel_size = int(kernel_size)
        self.stride = int(stride)
        self.reflection_padding = int(kernel_size // 2)
        kw, kb = jax.random.split(key)
        # nn.Conv2d params: weight (Cout, Cin, K, K), bias (Cout,)
        fan_in = in_channels * kernel_size * kernel_size
        bound = 1.0 / (fan_in ** 0.5)
        self.weight = jax.random.uniform(
            kw, (out_channels, in_channels, kernel_size, kernel_size),
            jnp.float32, -bound, bound)
        self.bias = jax.random.uniform(
            kb, (out_channels,), jnp.float32, -bound, bound)

    def __call__(self, x, compute_dtype=jnp.bfloat16):
        # bf16 operands (f32 accumulation, f32 output) by default; pass
        # compute_dtype=jnp.float32 for a bit-faithful f32 path.
        return upsample_conv_forward(
            x, self.weight, self.bias,
            stride=self.stride, upsample=self.upsample,
            compute_dtype=compute_dtype)


def _reference(layer, x):
    """Pure-JAX reference of the same forward pass (correctness check)."""
    if layer.upsample:
        s = int(layer.upsample)
        x = jnp.repeat(jnp.repeat(x, s, axis=2), s, axis=3)
    p = layer.reflection_padding
    if p != 0:
        x = jnp.pad(x, ((0, 0), (0, 0), (p, p), (p, p)), mode="reflect")
    y = jax.lax.conv_general_dilated(
        x, layer.weight, (layer.stride, layer.stride), "VALID",
        dimension_numbers=("NCHW", "OIHW", "NCHW"))
    return y + layer.bias.reshape(1, -1, 1, 1)


if __name__ == "__main__":
    key = jax.random.PRNGKey(0)
    kx, kp = jax.random.split(key)

    # UpsampleConvLayer(in_channels=4, out_channels=8, kernel_size=3, stride=1,
    #                   upsample=2)
    layer = UpsampleConvLayer(4, 8, 3, 1, upsample=2, key=kp)
    x = jax.random.normal(kx, (2, 4, 16, 16), jnp.float32)

    ref = jax.block_until_ready(_reference(layer, x))

    # f32 operands: exact check against the pure-JAX reference.
    out_f32 = jax.block_until_ready(layer(x, compute_dtype=jnp.float32))
    assert out_f32.shape == (2, 8, 32, 32), out_f32.shape
    assert jnp.allclose(out_f32, ref, atol=1e-4, rtol=1e-4), \
        float(jnp.max(jnp.abs(out_f32 - ref)))

    # Default bf16 operands (f32 accumulation): loose-tolerance check.
    out_bf16 = jax.block_until_ready(layer(x))
    assert out_bf16.shape == (2, 8, 32, 32), out_bf16.shape
    assert jnp.allclose(out_bf16, ref, atol=1e-1, rtol=1e-1), \
        float(jnp.max(jnp.abs(out_bf16 - ref)))

    print("KERNEL_OK")
</pallas_src>

<mosaic_0001>
module attributes {stable_mosaic.version = 11 : i64} {
  func.func @_upconv_kernel(%arg0: i32, %arg1: i32, %arg2: memref<1x4x1280xf32, #tpu.memory_space<vmem>>, %arg3: memref<8x36xf32, #tpu.memory_space<vmem>>, %arg4: memref<8x1xf32, #tpu.memory_space<vmem>>, %arg5: memref<1x8x32x32xf32, #tpu.memory_space<vmem>>, %arg6: memref<36x1088xf32, #tpu.memory_space<vmem>>) attributes {dimension_semantics = [#tpu.dimension_semantics<parallel>, #tpu.dimension_semantics<parallel>], iteration_bounds = array<i64: 2, 1>, scalar_prefetch = 0 : i64, scratch_operands = 1 : i64, tpu.core_type = #tpu.core_type<tc>, window_params = [{transform_indices = @transform_0, window_bounds = array<i64: 1, 4, 1280>}, {pipeline_mode = #tpu.pipeline_mode<synchronous>, transform_indices = @transform_1, window_bounds = array<i64: 8, 36>}, {pipeline_mode = #tpu.pipeline_mode<synchronous>, transform_indices = @transform_2, window_bounds = array<i64: 8, 1>}, {transform_indices = @transform_3, window_bounds = array<i64: 1, 8, 32, 32>}]} {
    %c0 = arith.constant 0 : index
    %c0_0 = arith.constant 0 : index
    %c0_1 = arith.constant 0 : index
    %0 = vector.load %arg2[%c0, %c0_0, %c0_1] : memref<1x4x1280xf32, #tpu.memory_space<vmem>>, vector<1x4x1088xf32>
    %1 = vector.shape_cast %0 : vector<1x4x1088xf32> to vector<4x1088xf32>
    %c0_2 = arith.constant 0 : index
    %c0_3 = arith.constant 0 : index
    %2 = vector.load %arg6[%c0_2, %c0_3] : memref<36x1088xf32, #tpu.memory_space<vmem>>, vector<4x1088xf32>
    tpu.vector_store %arg6[%c0_2, %c0_3], %1 {strides = array<i32>} : memref<36x1088xf32, #tpu.memory_space<vmem>>, vector<4x1088xf32>,
    %c0_4 = arith.constant 0 : index
    %c0_5 = arith.constant 0 : index
    %c1 = arith.constant 1 : index
    %3 = vector.load %arg2[%c0_4, %c0_5, %c1] : memref<1x4x1280xf32, #tpu.memory_space<vmem>>, vector<1x4x1088xf32>
    %4 = vector.shape_cast %3 : vector<1x4x1088xf32> to vector<4x1088xf32>
    %c4 = arith.constant 4 : index
    %c0_6 = arith.constant 0 : index
    %5 = vector.load %arg6[%c4, %c0_6] : memref<36x1088xf32, #tpu.memory_space<vmem>>, vector<4x1088xf32>
    tpu.vector_store %arg6[%c4, %c0_6], %4 {strides = array<i32>} : memref<36x1088xf32, #tpu.memory_space<vmem>>, vector<4x1088xf32>,
    %c0_7 = arith.constant 0 : index
    %c0_8 = arith.constant 0 : index
    %c2 = arith.constant 2 : index
    %6 = vector.load %arg2[%c0_7, %c0_8, %c2] : memref<1x4x1280xf32, #tpu.memory_space<vmem>>, vector<1x4x1088xf32>
    %7 = vector.shape_cast %6 : vector<1x4x1088xf32> to vector<4x1088xf32>
    %c8 = arith.constant 8 : index
    %c0_9 = arith.constant 0 : index
    %8 = vector.load %arg6[%c8, %c0_9] : memref<36x1088xf32, #tpu.memory_space<vmem>>, vector<4x1088xf32>
    tpu.vector_store %arg6[%c8, %c0_9], %7 {strides = array<i32>} : memref<36x1088xf32, #tpu.memory_space<vmem>>, vector<4x1088xf32>,
    %c0_10 = arith.constant 0 : index
    %c0_11 = arith.constant 0 : index
    %c34 = arith.constant 34 : index
    %9 = vector.load %arg2[%c0_10, %c0_11, %c34] : memref<1x4x1280xf32, #tpu.memory_space<vmem>>, vector<1x4x1088xf32>
    %10 = vector.shape_cast %9 : vector<1x4x1088xf32> to vector<4x1088xf32>
    %c12 = arith.constant 12 : index
    %c0_12 = arith.constant 0 : index
    %11 = vector.load %arg6[%c12, %c0_12] : memref<36x1088xf32, #tpu.memory_space<vmem>>, vector<4x1088xf32>
    tpu.vector_store %arg6[%c12, %c0_12], %10 {strides = array<i32>} : memref<36x1088xf32, #tpu.memory_space<vmem>>, vector<4x1088xf32>,
    %c0_13 = arith.constant 0 : index
    %c0_14 = arith.constant 0 : index
    %c35 = arith.constant 35 : index
    %12 = vector.load %arg2[%c0_13, %c0_14, %c35] : memref<1x4x1280xf32, #tpu.memory_space<vmem>>, vector<1x4x1088xf32>
    %13 = vector.shape_cast %12 : vector<1x4x1088xf32> to vector<4x1088xf32>
    %c16 = arith.constant 16 : index
    %c0_15 = arith.constant 0 : index
    %14 = vector.load %arg6[%c16, %c0_15] : memref<36x1088xf32, #tpu.memory_space<vmem>>, vector<4x1088xf32>
    tpu.vector_store %arg6[%c16, %c0_15], %13 {strides = array<i32>} : memref<36x1088xf32, #tpu.memory_space<vmem>>, vector<4x1088xf32>,
    %c0_16 = arith.constant 0 : index
    %c0_17 = arith.constant 0 : index
    %c36 = arith.constant 36 : index
    %15 = vector.load %arg2[%c0_16, %c0_17, %c36] : memref<1x4x1280xf32, #tpu.memory_space<vmem>>, vector<1x4x1088xf32>
    %16 = vector.shape_cast %15 : vector<1x4x1088xf32> to vector<4x1088xf32>
    %c20 = arith.constant 20 : index
    %c0_18 = arith.constant 0 : index
    %17 = vector.load %arg6[%c20, %c0_18] : memref<36x1088xf32, #tpu.memory_space<vmem>>, vector<4x1088xf32>
    tpu.vector_store %arg6[%c20, %c0_18], %16 {strides = array<i32>} : memref<36x1088xf32, #tpu.memory_space<vmem>>, vector<4x1088xf32>,
    %c0_19 = arith.constant 0 : index
    %c0_20 = arith.constant 0 : index
    %c68 = arith.constant 68 : index
    %18 = vector.load %arg2[%c0_19, %c0_20, %c68] : memref<1x4x1280xf32, #tpu.memory_space<vmem>>, vector<1x4x1088xf32>
    %19 = vector.shape_cast %18 : vector<1x4x1088xf32> to vector<4x1088xf32>
    %c24 = arith.constant 24 : index
    %c0_21 = arith.constant 0 : index
    %20 = vector.load %arg6[%c24, %c0_21] : memref<36x1088xf32, #tpu.memory_space<vmem>>, vector<4x1088xf32>
    tpu.vector_store %arg6[%c24, %c0_21], %19 {strides = array<i32>} : memref<36x1088xf32, #tpu.memory_space<vmem>>, vector<4x1088xf32>,
    %c0_22 = arith.constant 0 : index
    %c0_23 = arith.constant 0 : index
    %c69 = arith.constant 69 : index
    %21 = vector.load %arg2[%c0_22, %c0_23, %c69] : memref<1x4x1280xf32, #tpu.memory_space<vmem>>, vector<1x4x1088xf32>
    %22 = vector.shape_cast %21 : vector<1x4x1088xf32> to vector<4x1088xf32>
    %c28 = arith.constant 28 : index
    %c0_24 = arith.constant 0 : index
    %23 = vector.load %arg6[%c28, %c0_24] : memref<36x1088xf32, #tpu.memory_space<vmem>>, vector<4x1088xf32>
    tpu.vector_store %arg6[%c28, %c0_24], %22 {strides = array<i32>} : memref<36x1088xf32, #tpu.memory_space<vmem>>, vector<4x1088xf32>,
    %c0_25 = arith.constant 0 : index
    %c0_26 = arith.constant 0 : index
    %c70 = arith.constant 70 : index
    %24 = vector.load %arg2[%c0_25, %c0_26, %c70] : memref<1x4x1280xf32, #tpu.memory_space<vmem>>, vector<1x4x1088xf32>
    %25 = vector.shape_cast %24 : vector<1x4x1088xf32> to vector<4x1088xf32>
    %c32 = arith.constant 32 : index
    %c0_27 = arith.constant 0 : index
    %26 = vector.load %arg6[%c32, %c0_27] : memref<36x1088xf32, #tpu.memory_space<vmem>>, vector<4x1088xf32>
    tpu.vector_store %arg6[%c32, %c0_27], %25 {strides = array<i32>} : memref<36x1088xf32, #tpu.memory_space<vmem>>, vector<4x1088xf32>,
    %c0_28 = arith.constant 0 : index
    %c0_29 = arith.constant 0 : index
    %27 = vector.load %arg3[%c0_28, %c0_29] : memref<8x36xf32, #tpu.memory_space<vmem>>, vector<8x36xf32>
    %c0_30 = arith.constant 0 : index
    %c0_31 = arith.constant 0 : index
    %28 = vector.load %arg6[%c0_30, %c0_31] : memref<36x1088xf32, #tpu.memory_space<vmem>>, vector<36x1088xf32>
    %cst = arith.constant dense<0.000000e+00> : vector<8x1088xf32>
    %29 = tpu.matmul %27, %28, %cst {dimension_numbers = #tpu.dot_dimension_numbers<[1], [0], [0], [1], [0, 0, 1, 1], [], []>} : vector<8x36xf32>, vector<36x1088xf32>, vector<8x1088xf32> -> vector<8x1088xf32>
    %c0_32 = arith.constant 0 : index
    %c0_33 = arith.constant 0 : index
    %30 = vector.load %arg4[%c0_32, %c0_33] : memref<8x1xf32, #tpu.memory_space<vmem>>, vector<8x1xf32>
    %31 = vector.broadcast %30 : vector<8x1xf32> to vector<8x1088xf32>
    %32 = arith.addf %29, %31 : vector<8x1088xf32>
    %33 = vector.extract_strided_slice %32 {offsets = [0, 0], sizes = [8, 32], strides = [1, 1]} : vector<8x1088xf32> to vector<8x32xf32>
    %c0_34 = arith.constant 0 : index
    %c0_35 = arith.constant 0 : index
    %c0_36 = arith.constant 0 : index
    %c0_37 = arith.constant 0 : index
    %34 = vector.load %arg5[%c0_34, %c0_35, %c0_36, %c0_37] : memref<1x8x32x32xf32, #tpu.memory_space<vmem>>, vector<1x8x1x32xf32>
    %35 = vector.shape_cast %34 : vector<1x8x1x32xf32> to vector<8x32xf32>
    %36 = vector.shape_cast %33 : vector<8x32xf32> to vector<1x8x1x32xf32>
    tpu.vector_store %arg5[%c0_34, %c0_35, %c0_36, %c0_37], %36 {strides = array<i32>} : memref<1x8x32x32xf32, #tpu.memory_space<vmem>>, vector<1x8x1x32xf32>,
    %37 = vector.extract_strided_slice %32 {offsets = [0, 34], sizes = [8, 32], strides = [1, 1]} : vector<8x1088xf32> to vector<8x32xf32>
    %c0_38 = arith.constant 0 : index
    %c0_39 = arith.constant 0 : index
    %c1_40 = arith.constant 1 : index
    %c0_41 = arith.constant 0 : index
    %38 = vector.load %arg5[%c0_38, %c0_39, %c1_40, %c0_41] : memref<1x8x32x32xf32, #tpu.memory_space<vmem>>, vector<1x8x1x32xf32>
    %39 = vector.shape_cast %38 : vector<1x8x1x32xf32> to vector<8x32xf32>
    %40 = vector.shape_cast %37 : vector<8x32xf32> to vector<1x8x1x32xf32>
    tpu.vector_store %arg5[%c0_38, %c0_39, %c1_40, %c0_41], %40 {strides = array<i32>} : memref<1x8x32x32xf32, #tpu.memory_space<vmem>>, vector<1x8x1x32xf32>,
    %41 = vector.extract_strided_slice %32 {offsets = [0, 68], sizes = [8, 32], strides = [1, 1]} : vector<8x1088xf32> to vector<8x32xf32>
    %c0_42 = arith.constant 0 : index
    %c0_43 = arith.constant 0 : index
    %c2_44 = arith.constant 2 : index
    %c0_45 = arith.constant 0 : index
    %42 = vector.load %arg5[%c0_42, %c0_43, %c2_44, %c0_45] : memref<1x8x32x32xf32, #tpu.memory_space<vmem>>, vector<1x8x1x32xf32>
    %43 = vector.shape_cast %42 : vector<1x8x1x32xf32> to vector<8x32xf32>
    %44 = vector.shape_cast %41 : vector<8x32xf32> to vector<1x8x1x32xf32>
    tpu.vector_store %arg5[%c0_42, %c0_43, %c2_44, %c0_45], %44 {strides = array<i32>} : memref<1x8x32x32xf32, #tpu.memory_space<vmem>>, vector<1x8x1x32xf32>,
    %45 = vector.extract_strided_slice %32 {offsets = [0, 102], sizes = [8, 32], strides = [1, 1]} : vector<8x1088xf32> to vector<8x32xf32>
    %c0_46 = arith.constant 0 : index
    %c0_47 = arith.constant 0 : index
    %c3 = arith.constant 3 : index
    %c0_48 = arith.constant 0 : index
    %46 = vector.load %arg5[%c0_46, %c0_47, %c3, %c0_48] : memref<1x8x32x32xf32, #tpu.memory_space<vmem>>, vector<1x8x1x32xf32>
    %47 = vector.shape_cast %46 : vector<1x8x1x32xf32> to vector<8x32xf32>
    %48 = vector.shape_cast %45 : vector<8x32xf32> to vector<1x8x1x32xf32>
    tpu.vector_store %arg5[%c0_46, %c0_47, %c3, %c0_48], %48 {strides = array<i32>} : memref<1x8x32x32xf32, #tpu.memory_space<vmem>>, vector<1x8x1x32xf32>,
    %49 = vector.extract_strided_slice %32 {offsets = [0, 136], sizes = [8, 32], strides = [1, 1]} : vector<8x1088xf32> to vector<8x32xf32>
    %c0_49 = arith.constant 0 : index
    %c0_50 = arith.constant 0 : index
    %c4_51 = arith.constant 4 : index
    %c0_52 = arith.constant 0 : index
    %50 = vector.load %arg5[%c0_49, %c0_50, %c4_51, %c0_52] : memref<1x8x32x32xf32, #tpu.memory_space<vmem>>, vector<1x8x1x32xf32>
    %51 = vector.shape_cast %50 : vector<1x8x1x32xf32> to vector<8x32xf32>
    %52 = vector.shape_cast %49 : vector<8x32xf32> to vector<1x8x1x32xf32>
    tpu.vector_store %arg5[%c0_49, %c0_50, %c4_51, %c0_52], %52 {strides = array<i32>} : memref<1x8x32x32xf32, #tpu.memory_space<vmem>>, vector<1x8x1x32xf32>,
    %53 = vector.extract_strided_slice %32 {offsets = [0, 170], sizes = [8, 32], strides = [1, 1]} : vector<8x1088xf32> to vector<8x32xf32>
    %c0_53 = arith.constant 0 : index
    %c0_54 = arith.constant 0 : index
    %c5 = arith.constant 5 : index
    %c0_55 = arith.constant 0 : index
    %54 = vector.load %arg5[%c0_53, %c0_54, %c5, %c0_55] : memref<1x8x32x32xf32, #tpu.memory_space<vmem>>, vector<1x8x1x32xf32>
    %55 = vector.shape_cast %54 : vector<1x8x1x32xf32> to vector<8x32xf32>
    %56 = vector.shape_cast %53 : vector<8x32xf32> to vector<1x8x1x32xf32>
    tpu.vector_store %arg5[%c0_53, %c0_54, %c5, %c0_55], %56 {strides = array<i32>} : memref<1x8x32x32xf32, #tpu.memory_space<vmem>>, vector<1x8x1x32xf32>,
    %57 = vector.extract_strided_slice %32 {offsets = [0, 204], sizes = [8, 32], strides = [1, 1]} : vector<8x1088xf32> to vector<8x32xf32>
    %c0_56 = arith.constant 0 : index
    %c0_57 = arith.constant 0 : index
    %c6 = arith.constant 6 : index
    %c0_58 = arith.constant 0 : index
    %58 = vector.load %arg5[%c0_56, %c0_57, %c6, %c0_58] : memref<1x8x32x32xf32, #tpu.memory_space<vmem>>, vector<1x8x1x32xf32>
    %59 = vector.shape_cast %58 : vector<1x8x1x32xf32> to vector<8x32xf32>
    %60 = vector.shape_cast %57 : vector<8x32xf32> to vector<1x8x1x32xf32>
    tpu.vector_store %arg5[%c0_56, %c0_57, %c6, %c0_58], %60 {strides = array<i32>} : memref<1x8x32x32xf32, #tpu.memory_space<vmem>>, vector<1x8x1x32xf32>,
    %61 = vector.extract_strided_slice %32 {offsets = [0, 238], sizes = [8, 32], strides = [1, 1]} : vector<8x1088xf32> to vector<8x32xf32>
    %c0_59 = arith.constant 0 : index
    %c0_60 = arith.constant 0 : index
    %c7 = arith.constant 7 : index
    %c0_61 = arith.constant 0 : index
    %62 = vector.load %arg5[%c0_59, %c0_60, %c7, %c0_61] : memref<1x8x32x32xf32, #tpu.memory_space<vmem>>, vector<1x8x1x32xf32>
    %63 = vector.shape_cast %62 : vector<1x8x1x32xf32> to vector<8x32xf32>
    %64 = vector.shape_cast %61 : vector<8x32xf32> to vector<1x8x1x32xf32>
    tpu.vector_store %arg5[%c0_59, %c0_60, %c7, %c0_61], %64 {strides = array<i32>} : memref<1x8x32x32xf32, #tpu.memory_space<vmem>>, vector<1x8x1x32xf32>,
    %65 = vector.extract_strided_slice %32 {offsets = [0, 272], sizes = [8, 32], strides = [1, 1]} : vector<8x1088xf32> to vector<8x32xf32>
    %c0_62 = arith.constant 0 : index
    %c0_63 = arith.constant 0 : index
    %c8_64 = arith.constant 8 : index
    %c0_65 = arith.constant 0 : index
    %66 = vector.load %arg5[%c0_62, %c0_63, %c8_64, %c0_65] : memref<1x8x32x32xf32, #tpu.memory_space<vmem>>, vector<1x8x1x32xf32>
    %67 = vector.shape_cast %66 : vector<1x8x1x32xf32> to vector<8x32xf32>
    %68 = vector.shape_cast %65 : vector<8x32xf32> to vector<1x8x1x32xf32>
    tpu.vector_store %arg5[%c0_62, %c0_63, %c8_64, %c0_65], %68 {strides = array<i32>} : memref<1x8x32x32xf32, #tpu.memory_space<vmem>>, vector<1x8x1x32xf32>,
    %69 = vector.extract_strided_slice %32 {offsets = [0, 306], sizes = [8, 32], strides = [1, 1]} : vector<8x1088xf32> to vector<8x32xf32>
    %c0_66 = arith.constant 0 : index
    %c0_67 = arith.constant 0 : index
    %c9 = arith.constant 9 : index
    %c0_68 = arith.constant 0 : index
    %70 = vector.load %arg5[%c0_66, %c0_67, %c9, %c0_68] : memref<1x8x32x32xf32, #tpu.memory_space<vmem>>, vector<1x8x1x32xf32>
    %71 = vector.shape_cast %70 : vector<1x8x1x32xf32> to vector<8x32xf32>
    %72 = vector.shape_cast %69 : vector<8x32xf32> to vector<1x8x1x32xf32>
    tpu.vector_store %arg5[%c0_66, %c0_67, %c9, %c0_68], %72 {strides = array<i32>} : memref<1x8x32x32xf32, #tpu.memory_space<vmem>>, vector<1x8x1x32xf32>,
    %73 = vector.extract_strided_slice %32 {offsets = [0, 340], sizes = [8, 32], strides = [1, 1]} : vector<8x1088xf32> to vector<8x32xf32>
    %c0_69 = arith.constant 0 : index
    %c0_70 = arith.constant 0 : index
    %c10 = arith.constant 10 : index
    %c0_71 = arith.constant 0 : index
    %74 = vector.load %arg5[%c0_69, %c0_70, %c10, %c0_71] : memref<1x8x32x32xf32, #tpu.memory_space<vmem>>, vector<1x8x1x32xf32>
    %75 = vector.shape_cast %74 : vector<1x8x1x32xf32> to vector<8x32xf32>
    %76 = vector.shape_cast %73 : vector<8x32xf32> to vector<1x8x1x32xf32>
    tpu.vector_store %arg5[%c0_69, %c0_70, %c10, %c0_71], %76 {strides = array<i32>} : memref<1x8x32x32xf32, #tpu.memory_space<vmem>>, vector<1x8x1x32xf32>,
    %77 = vector.extract_strided_slice %32 {offsets = [0, 374], sizes = [8, 32], strides = [1, 1]} : vector<8x1088xf32> to vector<8x32xf32>
    %c0_72 = arith.constant 0 : index
    %c0_73 = arith.constant 0 : index
    %c11 = arith.constant 11 : index
    %c0_74 = arith.constant 0 : index
    %78 = vector.load %arg5[%c0_72, %c0_73, %c11, %c0_74] : memref<1x8x32x32xf32, #tpu.memory_space<vmem>>, vector<1x8x1x32xf32>
    %79 = vector.shape_cast %78 : vector<1x8x1x32xf32> to vector<8x32xf32>
    %80 = vector.shape_cast %77 : vector<8x32xf32> to vector<1x8x1x32xf32>
    tpu.vector_store %arg5[%c0_72, %c0_73, %c11, %c0_74], %80 {strides = array<i32>} : memref<1x8x32x32xf32, #tpu.memory_space<vmem>>, vector<1x8x1x32xf32>,
    %81 = vector.extract_strided_slice %32 {offsets = [0, 408], sizes = [8, 32], strides = [1, 1]} : vector<8x1088xf32> to vector<8x32xf32>
    %c0_75 = arith.constant 0 : index
    %c0_76 = arith.constant 0 : index
    %c12_77 = arith.constant 12 : index
    %c0_78 = arith.constant 0 : index
    %82 = vector.load %arg5[%c0_75, %c0_76, %c12_77, %c0_78] : memref<1x8x32x32xf32, #tpu.memory_space<vmem>>, vector<1x8x1x32xf32>
    %83 = vector.shape_cast %82 : vector<1x8x1x32xf32> to vector<8x32xf32>
    %84 = vector.shape_cast %81 : vector<8x32xf32> to vector<1x8x1x32xf32>
    tpu.vector_store %arg5[%c0_75, %c0_76, %c12_77, %c0_78], %84 {strides = array<i32>} : memref<1x8x32x32xf32, #tpu.memory_space<vmem>>, vector<1x8x1x32xf32>,
    %85 = vector.extract_strided_slice %32 {offsets = [0, 442], sizes = [8, 32], strides = [1, 1]} : vector<8x1088xf32> to vector<8x32xf32>
    %c0_79 = arith.constant 0 : index
    %c0_80 = arith.constant 0 : index
    %c13 = arith.constant 13 : index
    %c0_81 = arith.constant 0 : index
    %86 = vector.load %arg5[%c0_79, %c0_80, %c13, %c0_81] : memref<1x8x32x32xf32, #tpu.memory_space<vmem>>, vector<1x8x1x32xf32>
    %87 = vector.shape_cast %86 : vector<1x8x1x32xf32> to vector<8x32xf32>
    %88 = vector.shape_cast %85 : vector<8x32xf32> to vector<1x8x1x32xf32>
    tpu.vector_store %arg5[%c0_79, %c0_80, %c13, %c0_81], %88 {strides = array<i32>} : memref<1x8x32x32xf32, #tpu.memory_space<vmem>>, vector<1x8x1x32xf32>,
    %89 = vector.extract_strided_slice %32 {offsets = [0, 476], sizes = [8, 32], strides = [1, 1]} : vector<8x1088xf32> to vector<8x32xf32>
    %c0_82 = arith.constant 0 : index
    %c0_83 = arith.constant 0 : index
    %c14 = arith.constant 14 : index
    %c0_84 = arith.constant 0 : index
    %90 = vector.load %arg5[%c0_82, %c0_83, %c14, %c0_84] : memref<1x8x32x32xf32, #tpu.memory_space<vmem>>, vector<1x8x1x32xf32>
    %91 = vector.shape_cast %90 : vector<1x8x1x32xf32> to vector<8x32xf32>
    %92 = vector.shape_cast %89 : vector<8x32xf32> to vector<1x8x1x32xf32>
    tpu.vector_store %arg5[%c0_82, %c0_83, %c14, %c0_84], %92 {strides = array<i32>} : memref<1x8x32x32xf32, #tpu.memory_space<vmem>>, vector<1x8x1x32xf32>,
    %93 = vector.extract_strided_slice %32 {offsets = [0, 510], sizes = [8, 32], strides = [1, 1]} : vector<8x1088xf32> to vector<8x32xf32>
    %c0_85 = arith.constant 0 : index
    %c0_86 = arith.constant 0 : index
    %c15 = arith.constant 15 : index
    %c0_87 = arith.constant 0 : index
    %94 = vector.load %arg5[%c0_85, %c0_86, %c15, %c0_87] : memref<1x8x32x32xf32, #tpu.memory_space<vmem>>, vector<1x8x1x32xf32>
    %95 = vector.shape_cast %94 : vector<1x8x1x32xf32> to vector<8x32xf32>
    %96 = vector.shape_cast %93 : vector<8x32xf32> to vector<1x8x1x32xf32>
    tpu.vector_store %arg5[%c0_85, %c0_86, %c15, %c0_87], %96 {strides = array<i32>} : memref<1x8x32x32xf32, #tpu.memory_space<vmem>>, vector<1x8x1x32xf32>,
    %97 = vector.extract_strided_slice %32 {offsets = [0, 544], sizes = [8, 32], strides = [1, 1]} : vector<8x1088xf32> to vector<8x32xf32>
    %c0_88 = arith.constant 0 : index
    %c0_89 = arith.constant 0 : index
    %c16_90 = arith.constant 16 : index
    %c0_91 = arith.constant 0 : index
    %98 = vector.load %arg5[%c0_88, %c0_89, %c16_90, %c0_91] : memref<1x8x32x32xf32, #tpu.memory_space<vmem>>, vector<1x8x1x32xf32>
    %99 = vector.shape_cast %98 : vector<1x8x1x32xf32> to vector<8x32xf32>
    %100 = vector.shape_cast %97 : vector<8x32xf32> to vector<1x8x1x32xf32>
    tpu.vector_store %arg5[%c0_88, %c0_89, %c16_90, %c0_91], %100 {strides = array<i32>} : memref<1x8x32x32xf32, #tpu.memory_space<vmem>>, vector<1x8x1x32xf32>,
    %101 = vector.extract_strided_slice %32 {offsets = [0, 578], sizes = [8, 32], strides = [1, 1]} : vector<8x1088xf32> to vector<8x32xf32>
    %c0_92 = arith.constant 0 : index
    %c0_93 = arith.constant 0 : index
    %c17 = arith.constant 17 : index
    %c0_94 = arith.constant 0 : index
    %102 = vector.load %arg5[%c0_92, %c0_93, %c17, %c0_94] : memref<1x8x32x32xf32, #tpu.memory_space<vmem>>, vector<1x8x1x32xf32>
    %103 = vector.shape_cast %102 : vector<1x8x1x32xf32> to vector<8x32xf32>
    %104 = vector.shape_cast %101 : vector<8x32xf32> to vector<1x8x1x32xf32>
    tpu.vector_store %arg5[%c0_92, %c0_93, %c17, %c0_94], %104 {strides = array<i32>} : memref<1x8x32x32xf32, #tpu.memory_space<vmem>>, vector<1x8x1x32xf32>,
    %105 = vector.extract_strided_slice %32 {offsets = [0, 612], sizes = [8, 32], strides = [1, 1]} : vector<8x1088xf32> to vector<8x32xf32>
    %c0_95 = arith.constant 0 : index
    %c0_96 = arith.constant 0 : index
    %c18 = arith.constant 18 : index
    %c0_97 = arith.constant 0 : index
    %106 = vector.load %arg5[%c0_95, %c0_96, %c18, %c0_97] : memref<1x8x32x32xf32, #tpu.memory_space<vmem>>, vector<1x8x1x32xf32>
    %107 = vector.shape_cast %106 : vector<1x8x1x32xf32> to vector<8x32xf32>
    %108 = vector.shape_cast %105 : vector<8x32xf32> to vector<1x8x1x32xf32>
    tpu.vector_store %arg5[%c0_95, %c0_96, %c18, %c0_97], %108 {strides = array<i32>} : memref<1x8x32x32xf32, #tpu.memory_space<vmem>>, vector<1x8x1x32xf32>,
    %109 = vector.extract_strided_slice %32 {offsets = [0, 646], sizes = [8, 32], strides = [1, 1]} : vector<8x1088xf32> to vector<8x32xf32>
    %c0_98 = arith.constant 0 : index
    %c0_99 = arith.constant 0 : index
    %c19 = arith.constant 19 : index
    %c0_100 = arith.constant 0 : index
    %110 = vector.load %arg5[%c0_98, %c0_99, %c19, %c0_100] : memref<1x8x32x32xf32, #tpu.memory_space<vmem>>, vector<1x8x1x32xf32>
    %111 = vector.shape_cast %110 : vector<1x8x1x32xf32> to vector<8x32xf32>
    %112 = vector.shape_cast %109 : vector<8x32xf32> to vector<1x8x1x32xf32>
    tpu.vector_store %arg5[%c0_98, %c0_99, %c19, %c0_100], %112 {strides = array<i32>} : memref<1x8x32x32xf32, #tpu.memory_space<vmem>>, vector<1x8x1x32xf32>,
    %113 = vector.extract_strided_slice %32 {offsets = [0, 680], sizes = [8, 32], strides = [1, 1]} : vector<8x1088xf32> to vector<8x32xf32>
    %c0_101 = arith.constant 0 : index
    %c0_102 = arith.constant 0 : index
    %c20_103 = arith.constant 20 : index
    %c0_104 = arith.constant 0 : index
    %114 = vector.load %arg5[%c0_101, %c0_102, %c20_103, %c0_104] : memref<1x8x32x32xf32, #tpu.memory_space<vmem>>, vector<1x8x1x32xf32>
    %115 = vector.shape_cast %114 : vector<1x8x1x32xf32> to vector<8x32xf32>
    %116 = vector.shape_cast %113 : vector<8x32xf32> to vector<1x8x1x32xf32>
    tpu.vector_store %arg5[%c0_101, %c0_102, %c20_103, %c0_104], %116 {strides = array<i32>} : memref<1x8x32x32xf32, #tpu.memory_space<vmem>>, vector<1x8x1x32xf32>,
    %117 = vector.extract_strided_slice %32 {offsets = [0, 714], sizes = [8, 32], strides = [1, 1]} : vector<8x1088xf32> to vector<8x32xf32>
    %c0_105 = arith.constant 0 : index
    %c0_106 = arith.constant 0 : index
    %c21 = arith.constant 21 : index
    %c0_107 = arith.constant 0 : index
    %118 = vector.load %arg5[%c0_105, %c0_106, %c21, %c0_107] : memref<1x8x32x32xf32, #tpu.memory_space<vmem>>, vector<1x8x1x32xf32>
    %119 = vector.shape_cast %118 : vector<1x8x1x32xf32> to vector<8x32xf32>
    %120 = vector.shape_cast %117 : vector<8x32xf32> to vector<1x8x1x32xf32>
    tpu.vector_store %arg5[%c0_105, %c0_106, %c21, %c0_107], %120 {strides = array<i32>} : memref<1x8x32x32xf32, #tpu.memory_space<vmem>>, vector<1x8x1x32xf32>,
    %121 = vector.extract_strided_slice %32 {offsets = [0, 748], sizes = [8, 32], strides = [1, 1]} : vector<8x1088xf32> to vector<8x32xf32>
    %c0_108 = arith.constant 0 : index
    %c0_109 = arith.constant 0 : index
    %c22 = arith.constant 22 : index
    %c0_110 = arith.constant 0 : index
    %122 = vector.load %arg5[%c0_108, %c0_109, %c22, %c0_110] : memref<1x8x32x32xf32, #tpu.memory_space<vmem>>, vector<1x8x1x32xf32>
    %123 = vector.shape_cast %122 : vector<1x8x1x32xf32> to vector<8x32xf32>
    %124 = vector.shape_cast %121 : vector<8x32xf32> to vector<1x8x1x32xf32>
    tpu.vector_store %arg5[%c0_108, %c0_109, %c22, %c0_110], %124 {strides = array<i32>} : memref<1x8x32x32xf32, #tpu.memory_space<vmem>>, vector<1x8x1x32xf32>,
    %125 = vector.extract_strided_slice %32 {offsets = [0, 782], sizes = [8, 32], strides = [1, 1]} : vector<8x1088xf32> to vector<8x32xf32>
    %c0_111 = arith.constant 0 : index
    %c0_112 = arith.constant 0 : index
    %c23 = arith.constant 23 : index
    %c0_113 = arith.constant 0 : index
    %126 = vector.load %arg5[%c0_111, %c0_112, %c23, %c0_113] : memref<1x8x32x32xf32, #tpu.memory_space<vmem>>, vector<1x8x1x32xf32>
    %127 = vector.shape_cast %126 : vector<1x8x1x32xf32> to vector<8x32xf32>
    %128 = vector.shape_cast %125 : vector<8x32xf32> to vector<1x8x1x32xf32>
    tpu.vector_store %arg5[%c0_111, %c0_112, %c23, %c0_113], %128 {strides = array<i32>} : memref<1x8x32x32xf32, #tpu.memory_space<vmem>>, vector<1x8x1x32xf32>,
    %129 = vector.extract_strided_slice %32 {offsets = [0, 816], sizes = [8, 32], strides = [1, 1]} : vector<8x1088xf32> to vector<8x32xf32>
    %c0_114 = arith.constant 0 : index
    %c0_115 = arith.constant 0 : index
    %c24_116 = arith.constant 24 : index
    %c0_117 = arith.constant 0 : index
    %130 = vector.load %arg5[%c0_114, %c0_115, %c24_116, %c0_117] : memref<1x8x32x32xf32, #tpu.memory_space<vmem>>, vector<1x8x1x32xf32>
    %131 = vector.shape_cast %130 : vector<1x8x1x32xf32> to vector<8x32xf32>
    %132 = vector.shape_cast %129 : vector<8x32xf32> to vector<1x8x1x32xf32>
    tpu.vector_store %arg5[%c0_114, %c0_115, %c24_116, %c0_117], %132 {strides = array<i32>} : memref<1x8x32x32xf32, #tpu.memory_space<vmem>>, vector<1x8x1x32xf32>,
    %133 = vector.extract_strided_slice %32 {offsets = [0, 850], sizes = [8, 32], strides = [1, 1]} : vector<8x1088xf32> to vector<8x32xf32>
    %c0_118 = arith.constant 0 : index
    %c0_119 = arith.constant 0 : index
    %c25 = arith.constant 25 : index
    %c0_120 = arith.constant 0 : index
    %134 = vector.load %arg5[%c0_118, %c0_119, %c25, %c0_120] : memref<1x8x32x32xf32, #tpu.memory_space<vmem>>, vector<1x8x1x32xf32>
    %135 = vector.shape_cast %134 : vector<1x8x1x32xf32> to vector<8x32xf32>
    %136 = vector.shape_cast %133 : vector<8x32xf32> to vector<1x8x1x32xf32>
    tpu.vector_store %arg5[%c0_118, %c0_119, %c25, %c0_120], %136 {strides = array<i32>} : memref<1x8x32x32xf32, #tpu.memory_space<vmem>>, vector<1x8x1x32xf32>,
    %137 = vector.extract_strided_slice %32 {offsets = [0, 884], sizes = [8, 32], strides = [1, 1]} : vector<8x1088xf32> to vector<8x32xf32>
    %c0_121 = arith.constant 0 : index
    %c0_122 = arith.constant 0 : index
    %c26 = arith.constant 26 : index
    %c0_123 = arith.constant 0 : index
    %138 = vector.load %arg5[%c0_121, %c0_122, %c26, %c0_123] : memref<1x8x32x32xf32, #tpu.memory_space<vmem>>, vector<1x8x1x32xf32>
    %139 = vector.shape_cast %138 : vector<1x8x1x32xf32> to vector<8x32xf32>
    %140 = vector.shape_cast %137 : vector<8x32xf32> to vector<1x8x1x32xf32>
    tpu.vector_store %arg5[%c0_121, %c0_122, %c26, %c0_123], %140 {strides = array<i32>} : memref<1x8x32x32xf32, #tpu.memory_space<vmem>>, vector<1x8x1x32xf32>,
    %141 = vector.extract_strided_slice %32 {offsets = [0, 918], sizes = [8, 32], strides = [1, 1]} : vector<8x1088xf32> to vector<8x32xf32>
    %c0_124 = arith.constant 0 : index
    %c0_125 = arith.constant 0 : index
    %c27 = arith.constant 27 : index
    %c0_126 = arith.constant 0 : index
    %142 = vector.load %arg5[%c0_124, %c0_125, %c27, %c0_126] : memref<1x8x32x32xf32, #tpu.memory_space<vmem>>, vector<1x8x1x32xf32>
    %143 = vector.shape_cast %142 : vector<1x8x1x32xf32> to vector<8x32xf32>
    %144 = vector.shape_cast %141 : vector<8x32xf32> to vector<1x8x1x32xf32>
    tpu.vector_store %arg5[%c0_124, %c0_125, %c27, %c0_126], %144 {strides = array<i32>} : memref<1x8x32x32xf32, #tpu.memory_space<vmem>>, vector<1x8x1x32xf32>,
    %145 = vector.extract_strided_slice %32 {offsets = [0, 952], sizes = [8, 32], strides = [1, 1]} : vector<8x1088xf32> to vector<8x32xf32>
    %c0_127 = arith.constant 0 : index
    %c0_128 = arith.constant 0 : index
    %c28_129 = arith.constant 28 : index
    %c0_130 = arith.constant 0 : index
    %146 = vector.load %arg5[%c0_127, %c0_128, %c28_129, %c0_130] : memref<1x8x32x32xf32, #tpu.memory_space<vmem>>, vector<1x8x1x32xf32>
    %147 = vector.shape_cast %146 : vector<1x8x1x32xf32> to vector<8x32xf32>
    %148 = vector.shape_cast %145 : vector<8x32xf32> to vector<1x8x1x32xf32>
    tpu.vector_store %arg5[%c0_127, %c0_128, %c28_129, %c0_130], %148 {strides = array<i32>} : memref<1x8x32x32xf32, #tpu.memory_space<vmem>>, vector<1x8x1x32xf32>,
    %149 = vector.extract_strided_slice %32 {offsets = [0, 986], sizes = [8, 32], strides = [1, 1]} : vector<8x1088xf32> to vector<8x32xf32>
    %c0_131 = arith.constant 0 : index
    %c0_132 = arith.constant 0 : index
    %c29 = arith.constant 29 : index
    %c0_133 = arith.constant 0 : index
    %150 = vector.load %arg5[%c0_131, %c0_132, %c29, %c0_133] : memref<1x8x32x32xf32, #tpu.memory_space<vmem>>, vector<1x8x1x32xf32>
    %151 = vector.shape_cast %150 : vector<1x8x1x32xf32> to vector<8x32xf32>
    %152 = vector.shape_cast %149 : vector<8x32xf32> to vector<1x8x1x32xf32>
    tpu.vector_store %arg5[%c0_131, %c0_132, %c29, %c0_133], %152 {strides = array<i32>} : memref<1x8x32x32xf32, #tpu.memory_space<vmem>>, vector<1x8x1x32xf32>,
    %153 = vector.extract_strided_slice %32 {offsets = [0, 1020], sizes = [8, 32], strides = [1, 1]} : vector<8x1088xf32> to vector<8x32xf32>
    %c0_134 = arith.constant 0 : index
    %c0_135 = arith.constant 0 : index
    %c30 = arith.constant 30 : index
    %c0_136 = arith.constant 0 : index
    %154 = vector.load %arg5[%c0_134, %c0_135, %c30, %c0_136] : memref<1x8x32x32xf32, #tpu.memory_space<vmem>>, vector<1x8x1x32xf32>
    %155 = vector.shape_cast %154 : vector<1x8x1x32xf32> to vector<8x32xf32>
    %156 = vector.shape_cast %153 : vector<8x32xf32> to vector<1x8x1x32xf32>
    tpu.vector_store %arg5[%c0_134, %c0_135, %c30, %c0_136], %156 {strides = array<i32>} : memref<1x8x32x32xf32, #tpu.memory_space<vmem>>, vector<1x8x1x32xf32>,
    %157 = vector.extract_strided_slice %32 {offsets = [0, 1054], sizes = [8, 32], strides = [1, 1]} : vector<8x1088xf32> to vector<8x32xf32>
    %c0_137 = arith.constant 0 : index
    %c0_138 = arith.constant 0 : index
    %c31 = arith.constant 31 : index
    %c0_139 = arith.constant 0 : index
    %158 = vector.load %arg5[%c0_137, %c0_138, %c31, %c0_139] : memref<1x8x32x32xf32, #tpu.memory_space<vmem>>, vector<1x8x1x32xf32>
    %159 = vector.shape_cast %158 : vector<1x8x1x32xf32> to vector<8x32xf32>
    %160 = vector.shape_cast %157 : vector<8x32xf32> to vector<1x8x1x32xf32>
    tpu.vector_store %arg5[%c0_137, %c0_138, %c31, %c0_139], %160 {strides = array<i32>} : memref<1x8x32x32xf32, #tpu.memory_space<vmem>>, vector<1x8x1x32xf32>,
    return
  }
  func.func @transform_0(%arg0: i32, %arg1: i32) -> (i32, i32, i32) {
    %c0_i32 = arith.constant 0 : i32
    %c0_i32_0 = arith.constant 0 : i32
    return %arg0, %c0_i32, %arg1 : i32, i32, i32
  }
  func.func @transform_1(%arg0: i32, %arg1: i32) -> (i32, i32) {
    %c0_i32 = arith.constant 0 : i32
    %c0_i32_0 = arith.constant 0 : i32
    %c0_i32_1 = arith.constant 0 : i32
    return %c0_i32, %c0_i32_0 : i32, i32
  }
  func.func @transform_2(%arg0: i32, %arg1: i32) -> (i32, i32) {
    %c0_i32 = arith.constant 0 : i32
    %c0_i32_0 = arith.constant 0 : i32
    %c0_i32_1 = arith.constant 0 : i32
    return %c0_i32, %c0_i32_0 : i32, i32
  }
  func.func @transform_3(%arg0: i32, %arg1: i32) -> (i32, i32, i32, i32) {
    %c0_i32 = arith.constant 0 : i32
    %c0_i32_0 = arith.constant 0 : i32
    %c0_i32_1 = arith.constant 0 : i32
    return %arg0, %c0_i32, %arg1, %c0_i32_0 : i32, i32, i32, i32
  }
}

</mosaic_0001>

<bundles_post_ra>
// kernel: tpu_custom_call.1
= control target key start
LH: loop header
LB: loop body
LE: loop exit
PB: predicated region body
PF: predicated region fallthrough
CT: control target
= control target key end

     0   :  { %8 = vsyncpa [#allocation4], 0  ;;  %s6557_s0 = inlined_call_operand.hbm [shape: f32[2,4,1280], index: 0, kind: input, shape index: {}]   ;;  %s6558_s1 = inlined_call_operand.vmem [shape: f32[8,36], index: 1, kind: input, shape index: {}]   ;;  %s6559_s2 = inlined_call_operand.vmem [shape: f32[8,1], index: 2, kind: input, shape index: {}]   ;;  %s6560_s3 = inlined_call_operand.hbm [shape: f32[2,8,32,32], index: 3, kind: output, shape index: {}]  }
   0x1   :  { %10 = vsyncpa [#allocation4 + $0x1], 0 }
   0x2   :  { %11 = vsyncpa [#allocation5], 0 }
   0x3   :  { %13 = vsyncpa [#allocation5 + $0x1], 0  ;;  %s4510_s12 = smov 0   ;;  %s4512_s13 = smov 0  }
   0x4   :  { %s4514_s14 = smov 0   ;;  %s4516_s15 = smov 0  }
   0x5   :  { %s4518_s16 = smov 0   ;;  %s4520_s17 = smov 0  }
   0x6 LB: > { %s4122_s18 = sadd.s32 4294967295, %s4442_s17   ;;  %s4123_s19 = sadd.s32 4294967294, %s4442_s17   ;;  %s4442_s17 = sphi %s4520_s17, %s19_s17   ;;  %s4438_s16 = sphi %s4518_s16, %s6575_s16   ;;  %s4434_s15 = sphi %s4516_s15, %s6574_s15   ;;  %s4430_s14 = sphi %s4514_s14, %s6573_s14   ;;  %s4426_s13 = sphi %s4512_s13, %s6572_s13   ;;  %s4422_s12 = sphi %s4510_s12, %s6571_s12  }
   0x7   : > { %s31_s20 = sadd.s32 1, %s4438_s16  ;;  %s40_s21 = sadd.s32 1, %s4430_s14 }
   0x8   : > { %p33_p0 = scmp.ge.s32.totalorder %s31_s20, 2  ;;  %p47_p1 = scmp.ne.s32.totalorder %s4430_s14, %s4426_s13 }
   0x9   : > { %p48_p2 = scmp.eq.s32.totalorder %s4442_s17, 0  ;;  %p53_p3 = scmp.ne.s32.totalorder %s4426_s13, %s4422_s12 }
   0xa   : > { %s6577_s20 = smov (%p33_p0, %s31_s20), 0  ;;  %p54_p5 = scmp.eq.s32.totalorder %s4122_s18, 0 }
   0xb   : > { %p4551_p4 = por %p48_p2, %p47_p1  ;;  %s35_s23 = ssub.s32 %s4438_s16, %s6577_s20 }
   0xc   : > { %p121_p6 = scmp.eq.s32.totalorder %s4122_s18, 1  ;;  %p38_p7 = scmp.eq.s32.totalorder %s35_s23, 0 }
   0xd   : > { %p4557_p8 = por %p54_p5, %p53_p3  ;;  %p127_p10 = scmp.eq.s32.totalorder %s4123_s19, 1 }
   0xe   : > { %p4561_p9 = por %p121_p6, %p47_p1  ;;  %p4221_p13 = scmp.lt.s32.totalorder %s4442_s17, 2 }
   0xf   : > { %s4566_s26 = scalar_select %p38_p7, %s4430_s14, %s40_s21  }
  0x10   : > { %s6564_s25 = scalar_select %p4561_p9, 1, 0 }
  0x11   : > { %p4568_p11 = por %p127_p10, %p53_p3  ;;  %s153_s28 = sand.u32 1, %s4430_s14  }
  0x12   : > { %s4206_s29 = smul.u32 40, %s153_s28  ;;  %p4578_p0 = pnand %p4221_p13, %p4551_p4 }
  0x13   : > { %s6565_s27 = scalar_select %p4568_p11, 1, 0 }
  0x14   : > { %s4207_s30 = smul.u32 640, %s4438_s16  ;;  %s157_s8 = scalar_lea.vmem [#allocation3], %s4206_s29 }
  0x15   : > { %s167_s9 = sshll.u32 %s157_s8, 4  ;;  %s154_s10 = scalar_lea.sflag [#allocation4], %s153_s28  ;;  %s4588_s9 = int_to_ptr.vmem [resolvable:$true] %s167_s9 }
  0x16   : > { %s4586_s7 = scalar_lea.hbm %s6557_s0, %s4207_s30  ;;  %p4332_p3 = pneg %p4578_p0 }
  0x17   : > { %s4330_s11 = scalar_lea.hbm %s4586_s7, 640  ;;  %s4335_s21 = scalar_lea.hbm %s6557_s0, 1280 }
  0x18   : > { %p4331_p2 = scmp.ne.s32.totalorder %s4586_s7, %s4330_s11  ;;  %p4336_p6 = scmp.lt.u32.totalorder %s4586_s7, %s6557_s0 }
  0x19   : > { %p4337_p7 = scmp.lt.u32.totalorder %s4335_s21, %s4330_s11  ;;  %p4339_p13 = scmp.lt.u32.totalorder %s4330_s11, %s4586_s7 }
  0x1a   : > { %p4333_p4 = pnand %p4332_p3, %p4331_p2 }
  0x1b   : > { %p4338_p10 = por %p4337_p7, %p4336_p6 }
  0x1c   : > { %p4334_p5 = pneg %p4333_p4 }
  0x1d   : > { %p4340_p12 = por %p4339_p13, %p4338_p10 }
  0x1f   : > { %p4341_p1 = pnand %p4340_p12, %p4334_p5 }
  0x21   : > { %4344 = shalt.err (!%p4341_p1)
}
  0x22   : > { %s4345_s28 = scalar_lea.vmem %s4588_s9, 640  ;;  %s4444_s29 = smov [#allocation3]  }
  0x23   : > { %p4346_p2 = scmp.ne.s32.totalorder %s4588_s9, %s4345_s28  ;;  %s4350_s30 = sshll.u32 %s4444_s29, 4  ;;  %s4351_s30 = int_to_ptr.vmem [resolvable:$false] %s4350_s30 }
  0x24   : > { %s4352_s5 = scalar_lea.vmem %s4351_s30, 1280  ;;  %p4353_p9 = scmp.lt.s32.totalorder %s4588_s9, %s4351_s30 }
  0x25   : > { %p4348_p4 = pnand %p4346_p2, %p4332_p3  ;;  %p4354_p6 = scmp.lt.s32.totalorder %s4352_s5, %s4345_s28 }
  0x27   : > { %p4349_p11 = pneg %p4348_p4  ;;  %p4355_p7 = por %p4354_p6, %p4353_p9 }
  0x29   : > { %p4356_p10 = pnand %p4355_p7, %p4349_p11 }
  0x2b   : > { %4359 = shalt.err (!%p4356_p10)
}
  0x2c   : > { %4216 = dma.hbm_to_vmem [thread:$0]  (!%p4578_p0), %s4586_s7, 640, %s4588_s9, %s154_s10  }
  0x2d   : > { %p172_p12 = scmp.lt.s32.totalorder %s4442_s17, 3  ;;  %p6567_p1 = scmp.ge.s32.totalorder %s4442_s17, 1 }
  0x2f   : > { %p173_p3 = pnand %p6567_p1, %p172_p12 }
  0x30   : > { %s4619_s6 = sand.u32 (!%p173_p3), 1, %s4426_s13  }
  0x31   : > { %176 = sbr.rel (%p173_p3) target bundleno = 1288 (0x508), region = 32  ;;  %s179_s11 = scalar_lea.sflag (!%p173_p3), [#allocation4], %s4619_s6 }
  0x32   : > { %s4208_s8 = smul.u32 (!%p173_p3), 40, %s4619_s6 }
  0x34   : > { %s4623_s18 = scalar_lea.vmem (!%p173_p3), [#allocation3], %s4208_s8 }
  0x38   : > { %4413 = dma.done.wait (%p4557_p8), %s179_s11, 640  }
  0x39   : > { %4415 = vsyncadd (%p4557_p8), %s179_s11, 4294966656  ;;  %v4630_v0 = vld [vmem:[%s4623_s18 + $0x8] sm:$0xff]  ;;  %v4633_v1 = vld [vmem:[%s4623_s18] sm:$0xff]  ;;  %s4445_s4 = smov 127   ;;  %vm232_vm0 = vcmask 519168   ;;  %s4446_s24 = smov 126  }
  0x3a   : > { %v4636_v2 = vld [vmem:[%s4623_s18 + $0x10] sm:$0xff]  ;;  %255 = vrot.lane.b32.xlu1 %v4630_v0, %s4445_s4  ;;  %251 = vrot.lane.b32.xlu0 %v4633_v1, %s4445_s4  ;;  %v4644_v3 = vcombine.low %v4633_v1, %v4633_v1  ;;  %v4647_v4 = vld [vmem:[%s4623_s18 + $0x18] sm:$0xff]  ;;  %224 = vst [vmem:[#allocation2] sm:$0xf] %v4633_v1  ;;  %226 = vst [vmem:[#allocation2 + $0x10] sm:$0xf] %v4630_v0  ;;  %v4654_v5 = vcombine.high %v4633_v1, %v4633_v1 }
  0x3b   : > { %228 = vst [vmem:[#allocation2 + $0x20] sm:$0xf] %v4636_v2  ;;  %v4658_v6 = vcombine.high %v4630_v0, %v4630_v0  ;;  %v4662_v7 = vcombine.high %v4636_v2, %v4636_v2  ;;  %230 = vst [vmem:[#allocation2 + $0x30] sm:$0xf] %v4647_v4  ;;  %v4667_v8 = vcombine.high %v4647_v4, %v4647_v4  ;;  %v211_v11 = vld [vmem:[%s4623_s18 + $0x20] sm:$0xf] }
  0x3c   : > { %225 = vst [vmem:[#allocation2 + $0x8] sm:$0xf] %v4654_v5  ;;  %v4674_v9 = vcombine.low %v4630_v0, %v4630_v0  ;;  %v4678_v10 = vcombine.low %v4636_v2, %v4636_v2  ;;  %233 = vst.msk [vmem:[#allocation2 + $0x40] sm:$0xf] %vm232_vm0, %v211_v11  ;;  %v4693_v12 = vcombine.low %v4647_v4, %v4647_v4  ;;  %v4322_v13 = vld [vmem:[%s4623_s18 + $0x20] ss:$0 sps:$4 sm:$0xff]  }
  0x3d   : > { %227 = vst [vmem:[#allocation2 + $0x18] sm:$0xf] %v4658_v6  ;;  %229 = vst [vmem:[#allocation2 + $0x28] sm:$0xf] %v4662_v7  ;;  %v299_v14 = vld [vmem:[%s4623_s18 + $0x20] sm:$0xf] }
  0x3e   : > { %259 = vrot.lane.b32.xlu1 %v4636_v2, %s4445_s4  ;;  %249 = vrot.lane.b32.xlu0 %v4644_v3, %s4445_s4  ;;  %231 = vst [vmem:[#allocation2 + $0x38] sm:$0xf] %v4667_v8  ;;  %s4447_s7 = smov 94   ;;  %v4326_v15 = vld [vmem:[%s4623_s18 + $0x20] ss:$0 sps:$4 sm:$0xff]   ;;  %s4448_s9 = smov 93  }
  0x3f   : > { %v418_v16 = vld [vmem:[%s4623_s18 + $0x20] sm:$0xf]  ;;  %s4449_s10 = smov 92   ;;  %s4450_s19 = smov 60   ;;  %vm267_vm1 = vcmask 1039360   ;;  %vm293_vm2 = vcmask 523268  }
  0x40   : > { %v4327_v17 = vld [vmem:[%s4623_s18 + $0x20] ss:$0 sps:$4 sm:$0xff]   ;;  %s4451_s21 = smov 59   ;;  %s4452_s22 = smov 58   ;;  %v4453_v36 = vmov 0.0   ;;  %vm327_vm3 = vcmask 1031168  }
  0x41   : > { %v4761_v18 = vld [vmem:[%s4623_s18 + $0x20] sm:$0xff]  ;;  %870 = vmatprep.mubr.f32.mxu0 %v4453_v36  ;;  %941 = vmatprep.mubr.f32.mxu1 %v4453_v36  ;;  %vm387_vm4 = vcmask 769024   ;;  %v768_v58 = vld [vmem:[%s6559_s2] sm:$0xff]  ;;  %v4454_v60 = vmov 0   ;;  %vm446_vm5 = vcmask 760832   ;;  %vm506_vm6 = vcmask 752640  }
  0x42   : > { %253 = vrot.lane.b32.xlu1 %v4674_v9, %s4445_s4  ;;  %257 = vrot.lane.b32.xlu0 %v4678_v10, %s4445_s4  ;;  %v4765_v19 = vcombine.high %v4761_v18, %v4761_v18  ;;  %v610_v25 = vcombine.low %v4761_v18, %v4761_v18  ;;  %vm568_vm7 = vcmask 490496   ;;  %vm631_vm8 = vcmask 482304   ;;  %s4128_s5 = sshll.u32 %s4619_s6, 8  ;;  %s4458_s11 = smov 112  }
  0x43   : > { %4315 = vset.pattern.permute.xlu1 %v4454_v60  ;;  %4316 = vset.pattern.permute.xlu0 %v4454_v60  ;;  %vm694_vm9 = vcmask 474112   ;;  %vm778_vm10 = vcmask 1043456   ;;  %vm774_vm11 = vcmask 293888   ;;  %vm4456_vm12 = vmmov 0   ;;  %s4952_s8 = scalar_lea.vmem [#allocation6], %s4128_s5  ;;  %s4459_s18 = smov 78  }
  0x44   : > { %vm1218_vm13 = vcmask 253952   ;;  %s4466_s23 = smov 10   ;;  %vm1470_vm14 = vcmask 211968   ;;  %vm1819_vm15 = vcmask 146432   ;;  %s4469_s28 = smov 36  }
  0x45   : > { %s4470_s29 = smov 2   ;;  %s4471_s30 = smov 96  }
  0x46   : > { %263 = vrot.lane.b32.xlu1 %v4647_v4, %s4445_s4  ;;  %261 = vrot.lane.b32.xlu0 %v4693_v12, %s4445_s4  ;;  %s4472_s5 = smov 62   ;;  %p6568_p9 = scmp.ne.s32.totalorder %s6564_s25, 0 }
  0x4a   : > { %309 = vrot.lane.b32.xlu1 %v4633_v1, %s4446_s24  ;;  %265 = vrot.lane.b32.xlu0 %v4322_v13, %s4445_s4  ;;  %s4460_s4 = smov 44  }
  0x4e   : > { %313 = vrot.lane.b32.xlu1 %v4630_v0, %s4446_s24  ;;  %311 = vrot.lane.b32.xlu0 %v4654_v5, %s4446_s24 }
  0x52   : > { %317 = vrot.lane.b32.xlu1 %v4636_v2, %s4446_s24  ;;  %315 = vrot.lane.b32.xlu0 %v4658_v6, %s4446_s24 }
  0x56   : > { %321 = vrot.lane.b32.xlu1 %v4647_v4, %s4446_s24  ;;  %319 = vrot.lane.b32.xlu0 %v4662_v7, %s4446_s24 }
  0x5a   : > { %325 = vrot.lane.b32.xlu1 %v299_v14, %s4446_s24  ;;  %323 = vrot.lane.b32.xlu0 %v4667_v8, %s4446_s24  ;;  %s4461_s24 = smov 120  }
  0x5e   : > { %371 = vrot.lane.b32.xlu1 %v4633_v1, %s4447_s7  ;;  %369 = vrot.lane.b32.xlu0 %v4644_v3, %s4447_s7 }
  0x62   : > { %375 = vrot.lane.b32.xlu1 %v4630_v0, %s4447_s7  ;;  %373 = vrot.lane.b32.xlu0 %v4674_v9, %s4447_s7 }
  0x66   : > { %379 = vrot.lane.b32.xlu1 %v4636_v2, %s4447_s7  ;;  %377 = vrot.lane.b32.xlu0 %v4678_v10, %s4447_s7 }
  0x6a   : > { %383 = vrot.lane.b32.xlu1 %v4647_v4, %s4447_s7  ;;  %381 = vrot.lane.b32.xlu0 %v4693_v12, %s4447_s7 }
  0x6e   : > { %428 = vrot.lane.b32.xlu1 %v4633_v1, %s4448_s9  ;;  %385 = vrot.lane.b32.xlu0 %v4326_v15, %s4447_s7 }
  0x72   : > { %432 = vrot.lane.b32.xlu1 %v4630_v0, %s4448_s9  ;;  %430 = vrot.lane.b32.xlu0 %v4654_v5, %s4448_s9 }
  0x76   : > { %436 = vrot.lane.b32.xlu1 %v4636_v2, %s4448_s9  ;;  %434 = vrot.lane.b32.xlu0 %v4658_v6, %s4448_s9 }
  0x7a   : > { %440 = vrot.lane.b32.xlu1 %v4647_v4, %s4448_s9  ;;  %438 = vrot.lane.b32.xlu0 %v4662_v7, %s4448_s9 }
  0x7e   : > { %444 = vrot.lane.b32.xlu1 %v418_v16, %s4448_s9  ;;  %442 = vrot.lane.b32.xlu0 %v4667_v8, %s4448_s9  ;;  %s4462_s9 = smov 26  }
  0x82   : > { %490 = vrot.lane.b32.xlu1 %v4633_v1, %s4449_s10  ;;  %488 = vrot.lane.b32.xlu0 %v4644_v3, %s4449_s10 }
  0x86   : > { %494 = vrot.lane.b32.xlu1 %v4630_v0, %s4449_s10  ;;  %492 = vrot.lane.b32.xlu0 %v4674_v9, %s4449_s10 }
  0x8a   : > { %498 = vrot.lane.b32.xlu1 %v4636_v2, %s4449_s10  ;;  %496 = vrot.lane.b32.xlu0 %v4678_v10, %s4449_s10 }
  0x8e   : > { %502 = vrot.lane.b32.xlu1 %v4647_v4, %s4449_s10  ;;  %500 = vrot.lane.b32.xlu0 %v4693_v12, %s4449_s10 }
  0x92   : > { %548 = vrot.lane.b32.xlu1 %v4633_v1, %s4450_s19  ;;  %504 = vrot.lane.b32.xlu0 %v4327_v17, %s4449_s10  ;;  %s4463_s10 = smov 86  }
  0x96   : > { %552 = vrot.lane.b32.xlu1 %v4630_v0, %s4450_s19  ;;  %550 = vrot.lane.b32.xlu0 %v4654_v5, %s4450_s19 }
  0x9a   : > { %556 = vrot.lane.b32.xlu1 %v4636_v2, %s4450_s19  ;;  %554 = vrot.lane.b32.xlu0 %v4658_v6, %s4450_s19 }
  0x9e   : > { %560 = vrot.lane.b32.xlu1 %v4647_v4, %s4450_s19  ;;  %558 = vrot.lane.b32.xlu0 %v4662_v7, %s4450_s19 }
  0xa2   : > { %564 = vrot.lane.b32.xlu1 %v4761_v18, %s4450_s19  ;;  %562 = vrot.lane.b32.xlu0 %v4667_v8, %s4450_s19 }
  0xa6   : > { %611 = vrot.lane.b32.xlu1 %v4644_v3, %s4451_s21  ;;  %566 = vrot.lane.b32.xlu0 %v4765_v19, %s4450_s19 }
  0xaa   : > { %615 = vrot.lane.b32.xlu1 %v4674_v9, %s4451_s21  ;;  %613 = vrot.lane.b32.xlu0 %v4633_v1, %s4451_s21 }
  0xac   : > { %v256_v20 = vpop.permute.xlu1 %255  ;;  %v252_v21 = vpop.permute.xlu0 %251 }
  0xae   : > { %619 = vrot.lane.b32.xlu1 %v4678_v10, %s4451_s21  ;;  %617 = vrot.lane.b32.xlu0 %v4630_v0, %s4451_s21 }
  0xb0   : > { %v260_v22 = vpop.permute.xlu1 %259  ;;  %v250_v23 = vpop.permute.xlu0 %249 }
  0xb1   : > { %v268_v24 = vsel %vm267_vm1, %v250_v23, %v252_v21 }
  0xb2   : > { %285 = vst [vmem:[#allocation2] sm:$0xf0] %v268_v24  ;;  %623 = vrot.lane.b32.xlu1 %v4693_v12, %s4451_s21  ;;  %621 = vrot.lane.b32.xlu0 %v4636_v2, %s4451_s21 }
  0xb4   : > { %v254_v26 = vpop.permute.xlu1 %253  ;;  %v258_v27 = vpop.permute.xlu0 %257 }
  0xb5   : > { %v269_v28 = vsel %vm267_vm1, %v252_v21, %v254_v26  ;;  %v270_v29 = vsel %vm267_vm1, %v254_v26, %v256_v20  ;;  %v271_v30 = vsel %vm267_vm1, %v256_v20, %v258_v27  ;;  %v272_v31 = vsel %vm267_vm1, %v258_v27, %v260_v22 }
  0xb6   : > { %286 = vst [vmem:[#allocation2 + $0x8] sm:$0xf0] %v269_v28  ;;  %287 = vst [vmem:[#allocation2 + $0x10] sm:$0xf0] %v270_v29  ;;  %627 = vrot.lane.b32.xlu1 %v610_v25, %s4451_s21  ;;  %625 = vrot.lane.b32.xlu0 %v4647_v4, %s4451_s21 }
  0xb7   : > { %288 = vst [vmem:[#allocation2 + $0x18] sm:$0xf0] %v271_v30  ;;  %289 = vst [vmem:[#allocation2 + $0x20] sm:$0xf0] %v272_v31 }
  0xb8   : > { %v264_v32 = vpop.permute.xlu1 %263  ;;  %v262_v33 = vpop.permute.xlu0 %261 }
  0xb9   : > { %v273_v34 = vsel %vm267_vm1, %v260_v22, %v262_v33  ;;  %v274_v35 = vsel %vm267_vm1, %v262_v33, %v264_v32  ;;  %v723_v13 = vld [vmem:[#allocation2] sm:$0xff] }
  0xba   : > { %290 = vst [vmem:[#allocation2 + $0x28] sm:$0xf0] %v273_v34  ;;  %291 = vst [vmem:[#allocation2 + $0x30] sm:$0xf0] %v274_v35  ;;  %674 = vrot.lane.b32.xlu1 %v4633_v1, %s4452_s22  ;;  %629 = vrot.lane.b32.xlu0 %v4761_v18, %s4451_s21  ;;  %s4464_s21 = smov 52  }
  0xbc   : > { %v310_v37 = vpop.permute.xlu1 %309  ;;  %v266_v38 = vpop.permute.xlu0 %265 }
  0xbd   : > { %v275_v39 = vsel %vm267_vm1, %v264_v32, %v266_v38  ;;  %294 = vst.msk [vmem:[#allocation2 + $0x40] sm:$0xf0] %vm293_vm2, %v266_v38  ;;  %v724_v10 = vld [vmem:[#allocation2 + $0x8] sm:$0xff]  ;;  %v725_v22 = vld [vmem:[#allocation2 + $0x10] sm:$0xff]  ;;  %vm2517_vm1 = vcmask 15360  }
  0xbe   : > { %292 = vst [vmem:[#allocation2 + $0x38] sm:$0xf0] %v275_v39  ;;  %678 = vrot.lane.b32.xlu1 %v4630_v0, %s4452_s22  ;;  %676 = vrot.lane.b32.xlu0 %v4654_v5, %s4452_s22 }
  0xc0   : > { %v314_v40 = vpop.permute.xlu1 %313  ;;  %v312_v41 = vpop.permute.xlu0 %311 }
  0xc1   : > { %v328_v42 = vsel %vm327_vm3, %v310_v37, %v312_v41  ;;  %v329_v43 = vsel %vm327_vm3, %v312_v41, %v314_v40 }
  0xc2   : > { %345 = vst [vmem:[#allocation2 + $0x48] sm:$0xf] %v328_v42  ;;  %346 = vst [vmem:[#allocation2 + $0x50] sm:$0xf] %v329_v43  ;;  %682 = vrot.lane.b32.xlu1 %v4636_v2, %s4452_s22  ;;  %680 = vrot.lane.b32.xlu0 %v4658_v6, %s4452_s22 }
  0xc4   : > { %v318_v44 = vpop.permute.xlu1 %317  ;;  %v316_v45 = vpop.permute.xlu0 %315 }
  0xc5   : > { %v330_v46 = vsel %vm327_vm3, %v314_v40, %v316_v45  ;;  %v331_v47 = vsel %vm327_vm3, %v316_v45, %v318_v44 }
  0xc6   : > { %347 = vst [vmem:[#allocation2 + $0x58] sm:$0xf] %v330_v46  ;;  %348 = vst [vmem:[#allocation2 + $0x60] sm:$0xf] %v331_v47  ;;  %684 = vrot.lane.b32.xlu0 %v4662_v7, %s4452_s22  ;;  %686 = vrot.lane.b32.xlu1 %v4647_v4, %s4452_s22 }
  0xc8   : > { %v322_v48 = vpop.permute.xlu1 %321  ;;  %v320_v49 = vpop.permute.xlu0 %319 }
  0xc9   : > { %v332_v50 = vsel %vm327_vm3, %v318_v44, %v320_v49  ;;  %v333_v51 = vsel %vm327_vm3, %v320_v49, %v322_v48 }
  0xca   : > { %349 = vst [vmem:[#allocation2 + $0x68] sm:$0xf] %v332_v50  ;;  %350 = vst [vmem:[#allocation2 + $0x70] sm:$0xf] %v333_v51  ;;  %690 = vrot.lane.b32.xlu1 %v4761_v18, %s4452_s22  ;;  %688 = vrot.lane.b32.xlu0 %v4667_v8, %s4452_s22 }
  0xcc   : > { %v326_v52 = vpop.permute.xlu1 %325  ;;  %v324_v53 = vpop.permute.xlu0 %323 }
  0xcd   : > { %353 = vst.msk [vmem:[#allocation2 + $0x88] sm:$0xf] %vm232_vm0, %v326_v52  ;;  %v334_v54 = vsel %vm327_vm3, %v322_v48, %v324_v53  ;;  %v335_v55 = vsel %vm327_vm3, %v324_v53, %v326_v52  ;;  %vm3183_vm3 = vcmask 162816  }
  0xce   : > { %351 = vst [vmem:[#allocation2 + $0x78] sm:$0xf] %v334_v54  ;;  %352 = vst [vmem:[#allocation2 + $0x80] sm:$0xf] %v335_v55  ;;  %692 = vrot.lane.b32.xlu0 %v4765_v19, %s4452_s22  ;;  %771 = vperm.xlu1 %4315, %v768_v58   ;;  %v726_v19 = vld [vmem:[#allocation2 + $0x18] sm:$0xff]  ;;  %s4465_s22 = smov 18  }
  0xd0   : > { %v372_v56 = vpop.permute.xlu1 %371  ;;  %v370_v57 = vpop.permute.xlu0 %369 }
  0xd1   : > { %v388_v59 = vsel %vm387_vm4, %v370_v57, %v372_v56 }
  0xd2   : > { %405 = vst [vmem:[#allocation2 + $0x48] sm:$0xf0] %v388_v59 }
  0xd4   : > { %v376_v61 = vpop.permute.xlu1 %375  ;;  %v374_v62 = vpop.permute.xlu0 %373 }
  0xd5   : > { %v389_v63 = vsel %vm387_vm4, %v372_v56, %v374_v62  ;;  %v390_v0 = vsel %vm387_vm4, %v374_v62, %v376_v61 }
  0xd6   : > { %406 = vst [vmem:[#allocation2 + $0x50] sm:$0xf0] %v389_v63  ;;  %407 = vst [vmem:[#allocation2 + $0x58] sm:$0xf0] %v390_v0 }
  0xd8   : > { %v380_v1 = vpop.permute.xlu1 %379  ;;  %v378_v2 = vpop.permute.xlu0 %377 }
  0xd9   : > { %v391_v3 = vsel %vm387_vm4, %v376_v61, %v378_v2  ;;  %v392_v4 = vsel %vm387_vm4, %v378_v2, %v380_v1  ;;  %v732_v7 = vld [vmem:[#allocation2 + $0x48] sm:$0xff] }
  0xda   : > { %408 = vst [vmem:[#allocation2 + $0x60] sm:$0xf0] %v391_v3  ;;  %409 = vst [vmem:[#allocation2 + $0x68] sm:$0xf0] %v392_v4  ;;  %v4170_v14 = vpack.c.bf16 %v732_v7, %v723_v13 }
  0xdc   : > { %v384_v5 = vpop.permute.xlu1 %383  ;;  %v382_v6 = vpop.permute.xlu0 %381 }
  0xdd   : > { %v393_v8 = vsel %vm387_vm4, %v380_v1, %v382_v6  ;;  %v394_v9 = vsel %vm387_vm4, %v382_v6, %v384_v5  ;;  %v733_v11 = vld [vmem:[#allocation2 + $0x50] sm:$0xff]  ;;  %v734_v17 = vld [vmem:[#allocation2 + $0x58] sm:$0xff] }
  0xde   : > { %410 = vst [vmem:[#allocation2 + $0x70] sm:$0xf0] %v393_v8  ;;  %411 = vst [vmem:[#allocation2 + $0x78] sm:$0xf0] %v394_v9  ;;  %v4168_v12 = vpack.c.bf16 %v733_v11, %v724_v10  ;;  %v4178_v23 = vpack.c.bf16 %v734_v17, %v725_v22 }
  0xe0   : > { %v429_v15 = vpop.permute.xlu1 %428  ;;  %v386_v16 = vpop.permute.xlu0 %385  ;;  %4169 = vmatprep.subr.bf16.mxu0 %v4168_v12 }
  0xe1   : > { %v395_v18 = vsel %vm387_vm4, %v384_v5, %v386_v16  ;;  %413 = vst.msk [vmem:[#allocation2 + $0x88] sm:$0xf0] %vm293_vm2, %v386_v16  ;;  %4171 = vmatpush1.bf16.msra.mxu0 %v4170_v14  ;;  %v735_v20 = vld [vmem:[#allocation2 + $0x60] sm:$0xff]  ;;  %vm3532_vm4 = vcmask 97280  }
  0xe2   : > { %412 = vst [vmem:[#allocation2 + $0x80] sm:$0xf0] %v395_v18  ;;  %v4176_v21 = vpack.c.bf16 %v735_v20, %v726_v19 }
  0xe4   : > { %v433_v24 = vpop.permute.xlu1 %432  ;;  %v431_v25 = vpop.permute.xlu0 %430  ;;  %4177 = vmatprep.subr.bf16.mxu1 %v4176_v21 }
  0xe5   : > { %v447_v26 = vsel %vm446_vm5, %v429_v15, %v431_v25  ;;  %v448_v27 = vsel %vm446_vm5, %v431_v25, %v433_v24  ;;  %4179 = vmatpush1.bf16.msra.mxu1 %v4178_v23 }
  0xe6   : > { %464 = vst [vmem:[#allocation2 + $0x90] sm:$0xf] %v447_v26  ;;  %465 = vst [vmem:[#allocation2 + $0x98] sm:$0xf] %v448_v27 }
  0xe8   : > { %v437_v28 = vpop.permute.xlu1 %436  ;;  %v435_v29 = vpop.permute.xlu0 %434 }
  0xe9   : > { %v449_v30 = vsel %vm446_vm5, %v433_v24, %v435_v29  ;;  %v450_v31 = vsel %vm446_vm5, %v435_v29, %v437_v28 }
  0xea   : > { %466 = vst [vmem:[#allocation2 + $0xa0] sm:$0xf] %v449_v30  ;;  %467 = vst [vmem:[#allocation2 + $0xa8] sm:$0xf] %v450_v31 }
  0xec   : > { %v441_v32 = vpop.permute.xlu1 %440  ;;  %v439_v33 = vpop.permute.xlu0 %438 }
  0xed   : > { %v451_v34 = vsel %vm446_vm5, %v437_v28, %v439_v33  ;;  %v452_v35 = vsel %vm446_vm5, %v439_v33, %v441_v32 }
  0xee   : > { %468 = vst [vmem:[#allocation2 + $0xb0] sm:$0xf] %v451_v34  ;;  %469 = vst [vmem:[#allocation2 + $0xb8] sm:$0xf] %v452_v35 }
  0xf0   : > { %v445_v37 = vpop.permute.xlu1 %444  ;;  %v443_v38 = vpop.permute.xlu0 %442 }
  0xf1   : > { %472 = vst.msk [vmem:[#allocation2 + $0xd0] sm:$0xf] %vm232_vm0, %v445_v37  ;;  %v453_v39 = vsel %vm446_vm5, %v441_v32, %v443_v38  ;;  %v454_v40 = vsel %vm446_vm5, %v443_v38, %v445_v37  ;;  %vm3881_vm5 = vcmask 31744  }
  0xf2   : > { %470 = vst [vmem:[#allocation2 + $0xc0] sm:$0xf] %v453_v39  ;;  %471 = vst [vmem:[#allocation2 + $0xc8] sm:$0xf] %v454_v40 }
  0xf4   : > { %v491_v41 = vpop.permute.xlu1 %490  ;;  %v489_v42 = vpop.permute.xlu0 %488 }
  0xf5   : > { %v507_v43 = vsel %vm506_vm6, %v489_v42, %v491_v41 }
  0xf6   : > { %524 = vst [vmem:[#allocation2 + $0x90] sm:$0xf0] %v507_v43 }
  0xf8   : > { %v495_v44 = vpop.permute.xlu1 %494  ;;  %v493_v45 = vpop.permute.xlu0 %492 }
  0xf9   : > { %v508_v46 = vsel %vm506_vm6, %v491_v41, %v493_v45  ;;  %v509_v47 = vsel %vm506_vm6, %v493_v45, %v495_v44 }
  0xfa   : > { %525 = vst [vmem:[#allocation2 + $0x98] sm:$0xf0] %v508_v46  ;;  %526 = vst [vmem:[#allocation2 + $0xa0] sm:$0xf0] %v509_v47 }
  0xfc   : > { %v499_v48 = vpop.permute.xlu1 %498  ;;  %v497_v49 = vpop.permute.xlu0 %496 }
  0xfd   : > { %v510_v50 = vsel %vm506_vm6, %v495_v44, %v497_v49  ;;  %v511_v51 = vsel %vm506_vm6, %v497_v49, %v499_v48  ;;  %v741_v24 = vld [vmem:[#allocation2 + $0x90] sm:$0xff] }
  0xfe   : > { %527 = vst [vmem:[#allocation2 + $0xa8] sm:$0xf0] %v510_v50  ;;  %528 = vst [vmem:[#allocation2 + $0xb0] sm:$0xf0] %v511_v51 }
 0x100   : > { %v503_v52 = vpop.permute.xlu1 %502  ;;  %v501_v53 = vpop.permute.xlu0 %500 }
 0x101   : > { %v512_v54 = vsel %vm506_vm6, %v499_v48, %v501_v53  ;;  %v513_v55 = vsel %vm506_vm6, %v501_v53, %v503_v52  ;;  %v742_v27 = vld [vmem:[#allocation2 + $0x98] sm:$0xff]  ;;  %v743_v34 = vld [vmem:[#allocation2 + $0xa0] sm:$0xff] }
 0x102   : > { %529 = vst [vmem:[#allocation2 + $0xb8] sm:$0xf0] %v512_v54  ;;  %530 = vst [vmem:[#allocation2 + $0xc0] sm:$0xf0] %v513_v55  ;;  %v737_v54 = vld [vmem:[#allocation2 + $0x70] sm:$0xff] }
 0x104   : > { %v549_v56 = vpop.permute.xlu1 %548  ;;  %v505_v57 = vpop.permute.xlu0 %504 }
 0x105   : > { %v514_v58 = vsel %vm506_vm6, %v503_v52, %v505_v57  ;;  %532 = vst.msk [vmem:[#allocation2 + $0xd0] sm:$0xf0] %vm293_vm2, %v505_v57  ;;  %v744_v38 = vld [vmem:[#allocation2 + $0xa8] sm:$0xff]  ;;  %v4891_v57 = vld [vmem:[%s6558_s1] sm:$0xff] }
 0x106   : > { %531 = vst [vmem:[#allocation2 + $0xc8] sm:$0xf0] %v514_v58  ;;  %v728_v58 = vld [vmem:[#allocation2 + $0x28] sm:$0xff] }
 0x108   : > { %v553_v59 = vpop.permute.xlu1 %552  ;;  %v551_v60 = vpop.permute.xlu0 %550 }
 0x109   : > { %v569_v61 = vsel %vm568_vm7, %v549_v56, %v551_v60  ;;  %v570_v62 = vsel %vm568_vm7, %v551_v60, %v553_v59 }
 0x10a   : > { %587 = vst [vmem:[#allocation2 + $0xd8] sm:$0xf] %v569_v61  ;;  %588 = vst [vmem:[#allocation2 + $0xe0] sm:$0xf] %v570_v62 }
 0x10c   : > { %v557_v63 = vpop.permute.xlu1 %556  ;;  %v555_v0 = vpop.permute.xlu0 %554 }
 0x10d   : > { %v571_v1 = vsel %vm568_vm7, %v553_v59, %v555_v0  ;;  %v572_v2 = vsel %vm568_vm7, %v555_v0, %v557_v63  ;;  %v736_v59 = vld [vmem:[#allocation2 + $0x68] sm:$0xff] }
 0x10e   : > { %589 = vst [vmem:[#allocation2 + $0xe8] sm:$0xf] %v571_v1  ;;  %590 = vst [vmem:[#allocation2 + $0xf0] sm:$0xf] %v572_v2  ;;  %v4184_v1 = vpack.c.bf16 %v737_v54, %v728_v58  ;;  %v727_v2 = vld [vmem:[#allocation2 + $0x20] sm:$0xff] }
 0x110   : > { %v561_v3 = vpop.permute.xlu1 %560  ;;  %v559_v4 = vpop.permute.xlu0 %558 }
 0x111   : > { %v573_v5 = vsel %vm568_vm7, %v557_v63, %v559_v4  ;;  %v574_v6 = vsel %vm568_vm7, %v559_v4, %v561_v3  ;;  %v746_v4 = vld [vmem:[#allocation2 + $0xb8] sm:$0xff] }
 0x112   : > { %591 = vst [vmem:[#allocation2 + $0xf8] sm:$0xf] %v573_v5  ;;  %592 = vst [vmem:[#allocation2 + $0x100] sm:$0xf] %v574_v6  ;;  %v739_v5 = vld [vmem:[#allocation2 + $0x80] sm:$0xff] }
 0x114   : > { %v565_v7 = vpop.permute.xlu1 %564  ;;  %v563_v8 = vpop.permute.xlu0 %562 }
 0x115   : > { %v575_v9 = vsel %vm568_vm7, %v561_v3, %v563_v8  ;;  %v576_v10 = vsel %vm568_vm7, %v563_v8, %v565_v7  ;;  %v4186_v3 = vpack.c.bf16 %v736_v59, %v727_v2 }
 0x116   : > { %593 = vst [vmem:[#allocation2 + $0x108] sm:$0xf] %v575_v9  ;;  %594 = vst [vmem:[#allocation2 + $0x110] sm:$0xf] %v576_v10  ;;  %v730_v9 = vld [vmem:[#allocation2 + $0x38] sm:$0xff] }
 0x118   : > { %v612_v11 = vpop.permute.xlu1 %611  ;;  %v567_v12 = vpop.permute.xlu0 %566 }
 0x119   : > { %v577_v13 = vsel %vm568_vm7, %v565_v7, %v567_v12 }
 0x11a   : > { %595 = vst.msk [vmem:[#allocation2 + $0x118] sm:$0xf] %vm232_vm0, %v577_v13 }
 0x11c   : > { %v616_v14 = vpop.permute.xlu1 %615  ;;  %v614_v15 = vpop.permute.xlu0 %613 }
 0x11d   : > { %v632_v16 = vsel %vm631_vm8, %v612_v11, %v614_v15  ;;  %v633_v17 = vsel %vm631_vm8, %v614_v15, %v616_v14  ;;  %v738_v11 = vld [vmem:[#allocation2 + $0x78] sm:$0xff] }
 0x11e   : > { %650 = vst [vmem:[#allocation2 + $0xd8] sm:$0xf0] %v632_v16  ;;  %651 = vst [vmem:[#allocation2 + $0xe0] sm:$0xf0] %v633_v17  ;;  %v4192_v17 = vpack.c.bf16 %v739_v5, %v730_v9 }
 0x120   : > { %v620_v18 = vpop.permute.xlu1 %619  ;;  %v618_v19 = vpop.permute.xlu0 %617 }
 0x121   : > { %v634_v20 = vsel %vm631_vm8, %v616_v14, %v618_v19  ;;  %v635_v21 = vsel %vm631_vm8, %v618_v19, %v620_v18  ;;  %v729_v19 = vld [vmem:[#allocation2 + $0x30] sm:$0xff] }
 0x122   : > { %652 = vst [vmem:[#allocation2 + $0xe8] sm:$0xf0] %v634_v20  ;;  %653 = vst [vmem:[#allocation2 + $0xf0] sm:$0xf0] %v635_v21  ;;  %v4194_v21 = vpack.c.bf16 %v738_v11, %v729_v19 }
 0x124   : > { %v624_v22 = vpop.permute.xlu1 %623  ;;  %v622_v23 = vpop.permute.xlu0 %621 }
 0x125   : > { %v636_v25 = vsel %vm631_vm8, %v620_v18, %v622_v23  ;;  %v637_v26 = vsel %vm631_vm8, %v622_v23, %v624_v22  ;;  %v751_v28 = vld [vmem:[#allocation2 + $0xe0] sm:$0xff]  ;;  %v750_v29 = vld [vmem:[#allocation2 + $0xd8] sm:$0xff]  ;;  %v745_v18 = vld [vmem:[#allocation2 + $0xb0] sm:$0xff] }
 0x126   : > { %654 = vst [vmem:[#allocation2 + $0xf8] sm:$0xf0] %v636_v25  ;;  %655 = vst [vmem:[#allocation2 + $0x100] sm:$0xf0] %v637_v26  ;;  %v4172_v30 = vpack.c.bf16 %v751_v28, %v742_v27  ;;  %v4174_v31 = vpack.c.bf16 %v750_v29, %v741_v24  ;;  %v747_v28 = vld [vmem:[#allocation2 + $0xc0] sm:$0xff]  ;;  %v740_v29 = vld [vmem:[#allocation2 + $0x88] sm:$0xff] }
 0x128   : > { %v628_v32 = vpop.permute.xlu1 %627  ;;  %v626_v33 = vpop.permute.xlu0 %625  ;;  %4173 = vmatprep.subr.bf16.mxu0 %v4172_v30 }
 0x129   : > { %v638_v35 = vsel %vm631_vm8, %v624_v22, %v626_v33  ;;  %v639_v37 = vsel %vm631_vm8, %v626_v33, %v628_v32  ;;  %4175 = vmatpush1.bf16.msra.mxu0 %v4174_v31  ;;  %v753_v39 = vld [vmem:[#allocation2 + $0xf0] sm:$0xff]  ;;  %v752_v40 = vld [vmem:[#allocation2 + $0xe8] sm:$0xff] }
 0x12a   : > { %656 = vst [vmem:[#allocation2 + $0x108] sm:$0xf0] %v638_v35  ;;  %657 = vst [vmem:[#allocation2 + $0x110] sm:$0xf0] %v639_v37  ;;  %v4180_v41 = vpack.c.bf16 %v753_v39, %v744_v38  ;;  %v4182_v42 = vpack.c.bf16 %v752_v40, %v743_v34  ;;  %v748_v22 = vld [vmem:[#allocation2 + $0xc8] sm:$0xff]  ;;  %v4455_v35 = vmov 0.0|0.0  }
 0x12b   : > { %v749_v39 = vld [vmem:[#allocation2 + $0xd0] sm:$0xff] }
 0x12c   : > { %v675_v43 = vpop.permute.xlu1 %674  ;;  %v630_v44 = vpop.permute.xlu0 %629  ;;  %4181 = vmatprep.subr.bf16.mxu1 %v4180_v41 }
 0x12d   : > { %v640_v45 = vsel %vm631_vm8, %v628_v32, %v630_v44  ;;  %4183 = vmatpush1.bf16.msra.mxu1 %v4182_v42  ;;  %v755_v0 = vld [vmem:[#allocation2 + $0x100] sm:$0xff]  ;;  %v754_v10 = vld [vmem:[#allocation2 + $0xf8] sm:$0xff]  ;;  %v4457_v42 = vmov 1966171168   ;;  %v1165_v44 = vlaneseq }
 0x12e   : > { %658 = vst.msk [vmem:[#allocation2 + $0x118] sm:$0xf0] %vm293_vm2, %v640_v45  ;;  %v4188_v8 = vpack.c.bf16 %v755_v0, %v746_v4  ;;  %v4190_v20 = vpack.c.bf16 %v754_v10, %v745_v18  ;;  %v731_v32 = vld [vmem:[#allocation2 + $0x40] sm:$0xff]  ;;  %vm2834_vm2 = vcmask 228352  }
 0x12f   : > { %v4201_v33 = vpack.c.bf16 %v740_v29, %v731_v32 }
 0x130   : > { %v679_v46 = vpop.permute.xlu1 %678  ;;  %v677_v47 = vpop.permute.xlu0 %676 }
 0x131   : > { %v695_v48 = vsel %vm694_vm9, %v675_v43, %v677_v47  ;;  %v696_v49 = vsel %vm694_vm9, %v677_v47, %v679_v46  ;;  %v757_v16 = vld [vmem:[#allocation2 + $0x110] sm:$0xff]  ;;  %v756_v25 = vld [vmem:[#allocation2 + $0x108] sm:$0xff]  ;;  %v1163_v43 = vunpack.c.l.s4 %v4457_v42 }
 0x132   : > { %713 = vst [vmem:[#allocation2 + $0x120] sm:$0xf] %v695_v48  ;;  %714 = vst [vmem:[#allocation2 + $0x128] sm:$0xf] %v696_v49  ;;  %v4196_v23 = vpack.c.bf16 %v757_v16, %v748_v22  ;;  %v4198_v30 = vpack.c.bf16 %v756_v25, %v747_v28 }
 0x133   : > { %v1164_v45 = vunpack.c.0.s8 %v1163_v43 }
 0x134   : > { %v683_v50 = vpop.permute.xlu1 %682  ;;  %v681_v51 = vpop.permute.xlu0 %680 }
 0x135   : > { %v697_v52 = vsel %vm694_vm9, %v679_v46, %v681_v51  ;;  %v698_v53 = vsel %vm694_vm9, %v681_v51, %v683_v50  ;;  %v758_v38 = vld [vmem:[#allocation2 + $0x118] sm:$0xff]  ;;  %v4922_v46 = vshrl.u32 %v1165_v44, 7 }
 0x136   : > { %715 = vst [vmem:[#allocation2 + $0x130] sm:$0xf] %v697_v52  ;;  %716 = vst [vmem:[#allocation2 + $0x138] sm:$0xf] %v698_v53  ;;  %v4204_v40 = vpack.c.bf16 %v758_v38, %v749_v39 }
 0x137   : > { %v4927_v48 = vsub.s32 %v1164_v45, %v4922_v46  ;;  %v4939_v53 = vsub.s32 0, %v4922_v46  ;;  %v5032_v28 = vsub.s32 1, %v4922_v46 }
 0x138   : > { %v685_v55 = vpop.permute.xlu0 %684  ;;  %v687_v56 = vpop.permute.xlu1 %686 }
 0x139   : > { %v699_v60 = vsel %vm694_vm9, %v683_v50, %v685_v55  ;;  %v700_v61 = vsel %vm694_vm9, %v685_v55, %v687_v56  ;;  %v760_v62 = vld [vmem:[#allocation2 + $0x128] sm:$0xf]  ;;  %v759_v63 = vld [vmem:[#allocation2 + $0x120] sm:$0xf] }
 0x13a   : > { %717 = vst [vmem:[#allocation2 + $0x140] sm:$0xf] %v699_v60  ;;  %718 = vst [vmem:[#allocation2 + $0x148] sm:$0xf] %v700_v61  ;;  %4129 = vmatprep.subr.msk.mxu0 %vm778_vm10, %v760_v62 }
 0x13b   : > { %4130 = vmatpush1.msk.msra.mxu0 %vm778_vm10, %v759_v63 }
 0x13c   : > { %4131 = vmatmul.mubr.msk.f32.vlgmr.msra.gmra.mrb[0].mxu0 %vm774_vm11, %v4891_v57  ;;  %4185 = vmatprep.subr.bf16.mxu0 %v4184_v1  ;;  %v691_v6 = vpop.permute.xlu1 %690  ;;  %v689_v7 = vpop.permute.xlu0 %688 }
 0x13d   : > { %4187 = vmatpush1.bf16.msra.mxu0 %v4186_v3  ;;  %v701_v12 = vsel %vm694_vm9, %v687_v56, %v689_v7  ;;  %v702_v13 = vsel %vm694_vm9, %v689_v7, %v691_v6  ;;  %v762_v14 = vld [vmem:[#allocation2 + $0x138] sm:$0xf]  ;;  %v761_v15 = vld [vmem:[#allocation2 + $0x130] sm:$0xf]  ;;  %1012 = vmatprep.mubr.f32.mxu0 %v4453_v36 }
 0x13e   : > { %719 = vst [vmem:[#allocation2 + $0x150] sm:$0xf] %v701_v12  ;;  %720 = vst [vmem:[#allocation2 + $0x158] sm:$0xf] %v702_v13  ;;  %4132 = vmatprep.subr.msk.mxu1 %vm778_vm10, %v762_v14  ;;  %4189 = vmatprep.subr.bf16.mxu0 %v4188_v8 }
 0x13f   : > { %4133 = vmatpush1.msk.msra.mxu1 %vm778_vm10, %v761_v15 }
 0x140   : > { %4134 = vmatmul.mubr.msk.f32.vlgmr.msra.gmra.mrb[0].mxu1 %vm774_vm11, %v4891_v57  ;;  %4193 = vmatprep.subr.bf16.mxu1 %v4192_v17  ;;  %v693_v24 = vpop.permute.xlu0 %692 }
 0x141   : > { %4191 = vmatpush1.bf16.msra.mxu0 %v4190_v20  ;;  %4195 = vmatpush1.bf16.msra.mxu1 %v4194_v21  ;;  %v764_v26 = vld [vmem:[#allocation2 + $0x148] sm:$0xf]  ;;  %v703_v27 = vsel %vm694_vm9, %v691_v6, %v693_v24  ;;  %v763_v31 = vld [vmem:[#allocation2 + $0x140] sm:$0xf] }
 0x142   : > { %4197 = vmatprep.subr.bf16.mxu1 %v4196_v23  ;;  %4135 = vmatprep.subr.msk.mxu0 %vm778_vm10, %v764_v26  ;;  %721 = vst.msk [vmem:[#allocation2 + $0x160] sm:$0xf] %vm232_vm0, %v703_v27  ;;  %vm2168_vm0 = vcmask 80896  }
 0x143   : > { %1083 = vmatprep.mubr.f32.mxu1 %v4453_v36 }
 0x145   : > { %4136 = vmatpush1.msk.msra.mxu0 %vm778_vm10, %v763_v31  ;;  %4199 = vmatpush1.bf16.msra.mxu1 %v4198_v30  ;;  %v766_v34 = vld [vmem:[#allocation2 + $0x158] sm:$0xf]  ;;  %v765_v37 = vld [vmem:[#allocation2 + $0x150] sm:$0xf] }
 0x146   : > { %4137 = vmatmul.mubr.msk.f32.vlgmr.msra.gmra.mrb[2].mxu0 %vm774_vm11, %v4891_v57  ;;  %4200 = vmatprep.subr.bf16.mxu0 %v4455_v35 }
 0x147   : > { %4202 = vmatpush3.bf16.msra.mxu0 %v4201_v33  ;;  %4138 = vmatprep.subr.msk.mxu1 %vm778_vm10, %v766_v34 }
 0x148   : > { %4203 = vmatprep.subr.bf16.mxu0 %v4455_v35  ;;  %4165 = vmatprep.mubr.msk.f32.mxu0 %vm4456_vm12, %v4453_v36 }
 0x149   : > { %4139 = vmatpush1.msk.msra.mxu1 %vm778_vm10, %v765_v37  ;;  %v767_v41 = vld [vmem:[#allocation2 + $0x160] sm:$0xf] }
 0x14a   : > { %4140 = vmatmul.mubr.msk.f32.vlgmr.msra.gmra.mrb[2].mxu1 %vm774_vm11, %v4891_v57 }
 0x14b   : > { %4205 = vmatpush3.bf16.msra.mxu0 %v4204_v40 }
 0x14c   : > { %4163 = vmatprep.subr.mxu0 %v4453_v36 }
 0x14d   : > { %v4924_v47 = vpop.permute.xlu1 %771 }
 0x14f   : > { %4164 = vmatpush3.msk.msra.mxu0 %vm778_vm10, %v767_v41 }
 0x150   : > { %4166 = vmatmul.mubr.msk.f32.vlgmr.msra.gmra.mrb[4].mxu0 %vm774_vm11, %v4891_v57 }
 0x20f   : > { %v872_v49 = vpop.f32.mrb[0].mxu0 }
 0x210   : > { %v4930_v36 = vadd.f32 %v872_v49, %v4924_v47  ;;  %v874_v50 = vpop.f32.mrb[1].mxu0 }
 0x211   : > { %v4934_v51 = vadd.f32 %v874_v50, %v4924_v47 }
 0x212   : > { %v1168_v52 = vrot.slane %v4930_v36, %v4927_v48  ;;  %v1161_v57 = vcombine.high %v4930_v36, %v4930_v36 }
 0x213   : > { %v943_v54 = vpop.f32.mrb[0].mxu1  ;;  %v1324_v55 = vcombine.low %v4930_v36, %v4934_v51  ;;  %v1325_v56 = vcombine.high %v4930_v36, %v4934_v51  ;;  %v1502_v22 = vrot.slane %v4934_v51, %v4927_v48 }
 0x214   : > { %v4948_v58 = vadd.f32 %v943_v54, %v4924_v47  ;;  %v945_v59 = vpop.f32.mrb[1].mxu1  ;;  %v1184_v60 = vrot.slane %v1168_v52, %v4927_v48  ;;  %v1176_v61 = vcombine.high %v1168_v52, %v1168_v52  ;;  %v1175_v3 = vrot.slane %v1161_v57, %v4927_v48 }
 0x215   : > { %v4967_v6 = vadd.f32 %v945_v59, %v4924_v47  ;;  %v5020_v24 = vrot.slane %v1324_v55, %v4927_v48  ;;  %v5024_v26 = vrot.slane %v1502_v22, %v4927_v48  ;;  %v5035_v29 = vrot.slane %v1325_v56, %v4927_v48 }
 0x216   : > { %v1230_v62 = vrot.slane %v1184_v60, %v4939_v53  ;;  %1219 = vst.msk [vmem:[%s4952_s8] sm:$0x1] %vm1218_vm13, %v1184_v60  ;;  %v1198_v63 = vrot.slane %v1176_v61, %v4927_v48  ;;  %v1851_v0 = vrot.slane %v4948_v58, %v4927_v48  ;;  %v1206_v5 = vcombine.high %v1184_v60, %v1184_v60 }
 0x217   : > { %v1191_v10 = vrot.slane %v1175_v3, %v4927_v48  ;;  %v1177_v12 = vcombine.high %v1175_v3, %v1175_v3  ;;  %v1673_v13 = vcombine.low %v4934_v51, %v4948_v58  ;;  %v1674_v14 = vcombine.high %v4934_v51, %v4948_v58 }
 0x218   : > { %1259 = vrot.lane.b32.xlu0 %v1230_v62, %s4447_s7  ;;  %v1234_v1 = vrot.slane %v1198_v63, %v4939_v53  ;;  %1220 = vst.msk [vmem:[%s4952_s8 + $0x20] sm:$0x1] %vm1218_vm13, %v1198_v63  ;;  %v1859_v2 = vcombine.high %v1851_v0, %v1851_v0  ;;  %v4973_v8 = vrot.slane %v1851_v0, %v4927_v48  ;;  %1221 = vst.msk [vmem:[%s4952_s8 + $0x40] sm:$0x1] %vm1218_vm13, %v1206_v5 }
 0x219   : > { %v4964_v4 = vpop.f32.mrb[2].mxu0  ;;  %1223 = vst.msk [vmem:[%s4952_s8 + $0x80] sm:$0x1] %vm1218_vm13, %v1191_v10  ;;  %v2022_v17 = vcombine.low %v4948_v58, %v4967_v6  ;;  %v2023_v18 = vcombine.high %v4948_v58, %v4967_v6  ;;  %v5002_v20 = vcombine.high %v1198_v63, %v1198_v63  ;;  %v5005_v21 = vrot.slane %v1177_v12, %v4927_v48 }
 0x21a   : > { %v4969_v7 = vpop.f32.mrb[3].mxu0  ;;  %1261 = vrot.lane.b32.xlu1 %v1234_v1, %s4447_s7  ;;  %v4979_v9 = vrot.slane %v1859_v2, %v4927_v48  ;;  %v1896_v16 = vrot.slane %v4973_v8, %v4939_v53  ;;  %v5029_v27 = vrot.slane %v5020_v24, %v4927_v48  ;;  %v1547_v30 = vrot.slane %v5024_v26, %v4939_v53 }
 0x21b   : > { %1222 = vst.msk [vmem:[%s4952_s8 + $0x60] sm:$0x1] %vm1218_vm13, %v5002_v20  ;;  %1224 = vst.msk [vmem:[%s4952_s8 + $0xa0] sm:$0x1] %vm1218_vm13, %v5005_v21  ;;  %v5045_v32 = vrot.slane %v5035_v29, %v4927_v48  ;;  %v1510_v33 = vcombine.high %v1502_v22, %v1502_v22  ;;  %v5047_v34 = vcombine.high %v1191_v10, %v1191_v10 }
 0x21c   : > { %1291 = vrot.lane.b32.xlu0 %v1230_v62, %s4450_s19  ;;  %v1900_v19 = vrot.slane %v4979_v9, %v4939_v53  ;;  %v1381_v31 = vrot.slane %v5029_v27, %v5032_v28  ;;  %v5065_v39 = vcombine.high %v5005_v21, %v5005_v21  ;;  %v1238_v40 = vrot.slane %v1206_v5, %v4939_v53 }
 0x21d   : > { %v4982_v11 = vpop.f32.mrb[2].mxu1  ;;  %1225 = vst.msk [vmem:[%s4952_s8 + $0xc0] sm:$0x1] %vm1218_vm13, %v5047_v34  ;;  %v1413_v35 = vrot.slane %v5045_v32, %v5032_v28  ;;  %v5057_v37 = vrot.slane %v1510_v33, %v4927_v48  ;;  %v5074_v41 = vrot.slane %v1673_v13, %v4927_v48  ;;  %v5078_v42 = vadd.f32 %v4964_v4, %v4924_v47 }
 0x21e   : > { %v4988_v15 = vpop.f32.mrb[3].mxu1  ;;  %1293 = vrot.lane.b32.xlu1 %v1234_v1, %s4450_s19  ;;  %1226 = vst.msk [vmem:[%s4952_s8 + $0xe0] sm:$0x1] %vm1218_vm13, %v5065_v39  ;;  %v1246_v43 = vrot.slane %v1191_v10, %v4939_v53  ;;  %v5088_v45 = vrot.slane %v1674_v14, %v4927_v48  ;;  %v1844_v36 = vcombine.high %v4948_v58, %v4948_v58 }
 0x21f   : > { %v1551_v38 = vrot.slane %v5057_v37, %v4939_v53  ;;  %v5085_v44 = vrot.slane %v5074_v41, %v4927_v48  ;;  %v2371_v46 = vcombine.low %v4967_v6, %v5078_v42  ;;  %v2372_v49 = vcombine.high %v4967_v6, %v5078_v42 }
 0x220   : > { %1925 = vrot.lane.b32.xlu0 %v1896_v16, %s4458_s11  ;;  %v5102_v52 = vrot.slane %v5088_v45, %v4927_v48  ;;  %v5105_v54 = vrot.slane %v2022_v17, %v4927_v48  ;;  %v1889_v55 = vcombine.high %v4973_v8, %v4973_v8  ;;  %v1858_v56 = vrot.slane %v1844_v36, %v4927_v48 }
 0x221   : > { %v1730_v50 = vrot.slane %v5085_v44, %v5032_v28  ;;  %v5122_v60 = vrot.slane %v2023_v18, %v4927_v48  ;;  %v5131_v63 = vadd.f32 %v4969_v7, %v4924_v47  ;;  %v1242_v5 = vrot.slane %v5002_v20, %v4939_v53 }
 0x222   : > { %1927 = vrot.lane.b32.xlu1 %v1900_v19, %s4458_s11  ;;  %v1762_v57 = vrot.slane %v5102_v52, %v5032_v28  ;;  %v5116_v59 = vrot.slane %v5105_v54, %v4927_v48  ;;  %v1904_v61 = vrot.slane %v1889_v55, %v4939_v53  ;;  %v5127_v62 = vrot.slane %v1858_v56, %v4927_v48 }
 0x223   : > { %v5016_v23 = vpop.f32.mrb[4].mxu0  ;;  %v5138_v58 = vrot.slane %v5122_v60, %v4927_v48  ;;  %v2688_v3 = vcombine.low %v5078_v42, %v5131_v63  ;;  %v2689_v4 = vcombine.high %v5078_v42, %v5131_v63  ;;  %v5157_v7 = vadd.f32 %v4982_v11, %v4924_v47 }
 0x224   : > { %1957 = vrot.lane.b32.xlu0 %v1896_v16, %s4459_s18  ;;  %v4167_v25 = vpop.f32.mrb[5].mxu0  ;;  %v2079_v0 = vrot.slane %v5116_v59, %v5032_v28  ;;  %v1912_v1 = vrot.slane %v5127_v62, %v4939_v53  ;;  %v1250_v8 = vrot.slane %v5005_v21, %v4939_v53  ;;  %v1891_v11 = vcombine.high %v4979_v9, %v4979_v9 }
 0x225   : > { %v2111_v2 = vrot.slane %v5138_v58, %v5032_v28  ;;  %v3037_v10 = vcombine.low %v5131_v63, %v5157_v7  ;;  %v3038_v12 = vcombine.high %v5131_v63, %v5157_v7  ;;  %v1860_v13 = vcombine.high %v1858_v56, %v1858_v56 }
 0x226   : > { %1959 = vrot.lane.b32.xlu1 %v1900_v19, %s4459_s18  ;;  %v1377_v14 = vrot.slane %v5029_v27, %v4939_v53  ;;  %v1908_v17 = vrot.slane %v1891_v11, %v4939_v53  ;;  %v1540_v9 = vcombine.high %v5024_v26, %v5024_v26  ;;  %v1340_v26 = vcombine.high %v5020_v24, %v5020_v24 }
 0x227   : > { %v5180_v18 = vrot.slane %v1860_v13, %v4927_v48  ;;  %v5218_v24 = vcombine.high %v5029_v27, %v5029_v27  ;;  %v1542_v36 = vcombine.high %v5057_v37, %v5057_v37  ;;  %v1890_v13 = vcombine.high %v5127_v62, %v5127_v62 }
 0x228   : > { %1989 = vrot.lane.b32.xlu0 %v1896_v16, %s4460_s4  ;;  %v1495_v16 = vcombine.high %v4934_v51, %v4934_v51  ;;  %v1555_v21 = vrot.slane %v1540_v9, %v4939_v53 }
 0x229   : > { %v1916_v51 = vrot.slane %v5180_v18, %v4939_v53  ;;  %v1559_v56 = vrot.slane %v1542_v36, %v4939_v53 }
 0x22a   : > { %1991 = vrot.lane.b32.xlu1 %v1900_v19, %s4460_s4  ;;  %v1409_v19 = vrot.slane %v5045_v32, %v4939_v53  ;;  %v1509_v20 = vrot.slane %v1495_v16, %v4927_v48  ;;  %v1920_v16 = vrot.slane %v1890_v13, %v4939_v53 }
 0x22c   : > { %1576 = vrot.lane.b32.xlu0 %v1547_v30, %s4461_s24  ;;  %v5194_v22 = vrot.slane %v1509_v20, %v4927_v48  ;;  %v1511_v55 = vcombine.high %v1509_v20, %v1509_v20 }
 0x22e   : > { %1440 = vrot.lane.b32.xlu1 %v1381_v31, %s4462_s9  ;;  %v1563_v25 = vrot.slane %v5194_v22, %v4939_v53  ;;  %v1341_v31 = vcombine.high %v5035_v29, %v5035_v29  ;;  %v1726_v29 = vrot.slane %v5085_v44, %v4939_v53  ;;  %v5251_v37 = vrot.slane %v1511_v55, %v4927_v48 }
 0x22f   : > { %v2038_v55 = vcombine.high %v5105_v54, %v5105_v54 }
 0x230   : > { %1608 = vrot.lane.b32.xlu0 %v1547_v30, %s4463_s10 }
 0x232   : > { %1456 = vrot.lane.b32.xlu1 %v1413_v35, %s4462_s9  ;;  %v1397_v35 = vrot.slane %v5218_v24, %v5032_v28 }
 0x234   : > { %1640 = vrot.lane.b32.xlu0 %v1547_v30, %s4464_s21  ;;  %v5208_v30 = vrot.slane %v1340_v26, %v4927_v48  ;;  %v1690_v26 = vcombine.high %v5088_v45, %v5088_v45 }
 0x236   : > { %1578 = vrot.lane.b32.xlu1 %v1551_v38, %s4461_s24  ;;  %v1389_v33 = vrot.slane %v5208_v30, %v5032_v28 }
 0x238   : > { %1263 = vrot.lane.b32.xlu0 %v1238_v40, %s4447_s7 }
 0x23a   : > { %1610 = vrot.lane.b32.xlu1 %v1551_v38, %s4463_s10 }
 0x23c   : > { %1267 = vrot.lane.b32.xlu0 %v1246_v43, %s4447_s7 }
 0x23e   : > { %1642 = vrot.lane.b32.xlu1 %v1551_v38, %s4464_s21  ;;  %v5225_v38 = vrot.slane %v1341_v31, %v4927_v48 }
 0x240   : > { %1295 = vrot.lane.b32.xlu0 %v1238_v40, %s4450_s19  ;;  %v1421_v27 = vrot.slane %v5225_v38, %v5032_v28  ;;  %v5235_v40 = vcombine.high %v5045_v32, %v5045_v32  ;;  %v2075_v32 = vrot.slane %v5116_v59, %v4939_v53 }
 0x242   : > { %1789 = vrot.lane.b32.xlu1 %v1730_v50, %s4465_s22  ;;  %v1429_v50 = vrot.slane %v5235_v40, %v5032_v28 }
 0x244   : > { %1299 = vrot.lane.b32.xlu0 %v1246_v43, %s4450_s19  ;;  %v1758_v43 = vrot.slane %v5102_v52, %v4939_v53 }
 0x246   : > { %1805 = vrot.lane.b32.xlu1 %v1762_v57, %s4465_s22 }
 0x248   : > { %1929 = vrot.lane.b32.xlu0 %v1904_v61, %s4458_s11 }
 0x24a   : > { %2138 = vrot.lane.b32.xlu1 %v2079_v0, %s4466_s23 }
 0x24c   : > { %1933 = vrot.lane.b32.xlu0 %v1912_v1, %s4458_s11 }
 0x24e   : > { %2154 = vrot.lane.b32.xlu1 %v2111_v2, %s4466_s23 }
 0x250   : > { %1961 = vrot.lane.b32.xlu0 %v1904_v61, %s4459_s18 }
 0x252   : > { %1265 = vrot.lane.b32.xlu1 %v1242_v5, %s4447_s7 }
 0x254   : > { %1965 = vrot.lane.b32.xlu0 %v1912_v1, %s4459_s18 }
 0x256   : > { %1269 = vrot.lane.b32.xlu1 %v1250_v8, %s4447_s7 }
 0x258   : > { %1993 = vrot.lane.b32.xlu0 %v1904_v61, %s4460_s4  ;;  %v2107_v61 = vrot.slane %v5138_v58, %v4939_v53 }
 0x25a   : > { %1297 = vrot.lane.b32.xlu1 %v1242_v5, %s4450_s19  ;;  %v1254_v5 = vrot.slane %v5047_v34, %v4939_v53 }
 0x25c   : > { %1997 = vrot.lane.b32.xlu0 %v1912_v1, %s4460_s4  ;;  %v1567_v1 = vrot.slane %v5251_v37, %v4939_v53 }
 0x25e   : > { %1301 = vrot.lane.b32.xlu1 %v1250_v8, %s4450_s19 }
 0x260   : > { %1438 = vrot.lane.b32.xlu0 %v1377_v14, %s4462_s9 }
 0x262   : > { %1931 = vrot.lane.b32.xlu1 %v1908_v17, %s4458_s11 }
 0x264   : > { %1454 = vrot.lane.b32.xlu0 %v1409_v19, %s4462_s9 }
 0x266   : > { %1935 = vrot.lane.b32.xlu1 %v1916_v51, %s4458_s11 }
 0x268   : > { %1580 = vrot.lane.b32.xlu0 %v1555_v21, %s4461_s24 }
 0x26a   : > { %1963 = vrot.lane.b32.xlu1 %v1908_v17, %s4459_s18 }
 0x26c   : > { %1584 = vrot.lane.b32.xlu0 %v1563_v25, %s4461_s24 }
 0x26e   : > { %1967 = vrot.lane.b32.xlu1 %v1916_v51, %s4459_s18 }
 0x270   : > { %1612 = vrot.lane.b32.xlu0 %v1555_v21, %s4463_s10 }
 0x272   : > { %1995 = vrot.lane.b32.xlu1 %v1908_v17, %s4460_s4  ;;  %v1689_v17 = vcombine.high %v5074_v41, %v5074_v41 }
 0x274   : > { %1616 = vrot.lane.b32.xlu0 %v1563_v25, %s4463_s10  ;;  %v5293_v20 = vrot.slane %v1689_v17, %v4927_v48 }
 0x276   : > { %1999 = vrot.lane.b32.xlu1 %v1916_v51, %s4460_s4 }
 0x278   : > { %1644 = vrot.lane.b32.xlu0 %v1555_v21, %s4464_s21  ;;  %v1738_v21 = vrot.slane %v5293_v20, %v5032_v28 }
 0x27a   : > { %1444 = vrot.lane.b32.xlu1 %v1389_v33, %s4462_s9  ;;  %v1385_v33 = vrot.slane %v5208_v30, %v4939_v53 }
 0x27c   : > { %1648 = vrot.lane.b32.xlu0 %v1563_v25, %s4464_s21  ;;  %v5307_v25 = vcombine.high %v5085_v44, %v5085_v44 }
 0x27e   : > { %1448 = vrot.lane.b32.xlu1 %v1397_v35, %s4462_s9  ;;  %v1746_v44 = vrot.slane %v5307_v25, %v5032_v28 }
 0x280   : > { %1787 = vrot.lane.b32.xlu0 %v1726_v29, %s4465_s22  ;;  %v5322_v29 = vrot.slane %v1690_v26, %v4927_v48 }
 0x282   : > { %1460 = vrot.lane.b32.xlu1 %v1421_v27, %s4462_s9  ;;  %v1393_v27 = vrot.slane %v5218_v24, %v4939_v53  ;;  %v1770_v36 = vrot.slane %v5322_v29, %v5032_v28 }
 0x284   : > { %1803 = vrot.lane.b32.xlu0 %v1758_v43, %s4465_s22 }
 0x286   : > { %1464 = vrot.lane.b32.xlu1 %v1429_v50, %s4462_s9  ;;  %v5334_v50 = vcombine.high %v5102_v52, %v5102_v52 }
 0x288   : > { %2136 = vrot.lane.b32.xlu0 %v2075_v32, %s4466_s23  ;;  %v1417_v32 = vrot.slane %v5225_v38, %v4939_v53  ;;  %v1778_v52 = vrot.slane %v5334_v50, %v5032_v28 }
 0x28a   : > { %v1260_v57 = vpop.permute.xlu0 %1259  ;;  %1582 = vrot.lane.b32.xlu1 %v1559_v56, %s4461_s24 }
 0x28b   : > { %1283 = vst.msk [vmem:[%s4952_s8 + $0x1] sm:$0x1] %vm1218_vm13, %v1260_v57  ;;  %v5349_v57 = vrot.slane %v2038_v55, %v4927_v48 }
 0x28c   : > { %v1262_v0 = vpop.permute.xlu1 %1261  ;;  %2152 = vrot.lane.b32.xlu0 %v2107_v61, %s4466_s23  ;;  %v1425_v61 = vrot.slane %v5235_v40, %v4939_v53 }
 0x28d   : > { %1284 = vst.msk [vmem:[%s4952_s8 + $0x21] sm:$0x1] %vm1218_vm13, %v1262_v0  ;;  %v1541_v0 = vcombine.high %v5194_v22, %v5194_v22 }
 0x28e   : > { %v1292_v2 = vpop.permute.xlu0 %1291  ;;  %1586 = vrot.lane.b32.xlu1 %v1567_v1, %s4461_s24 }
 0x28f   : > { %1315 = vst.msk [vmem:[%s4952_s8 + $0x2] sm:$0x1] %vm1218_vm13, %v1292_v2  ;;  %v2087_v2 = vrot.slane %v5349_v57, %v5032_v28  ;;  %v1571_v22 = vrot.slane %v1541_v0, %v4939_v53  ;;  %v1373_v0 = vcombine.high %v5225_v38, %v5225_v38 }
 0x290   : > { %v1294_v8 = vpop.permute.xlu1 %1293  ;;  %1271 = vrot.lane.b32.xlu0 %v1254_v5, %s4447_s7 }
 0x291   : > { %1316 = vst.msk [vmem:[%s4952_s8 + $0x22] sm:$0x1] %vm1218_vm13, %v1294_v8  ;;  %v2039_v8 = vcombine.high %v5122_v60, %v5122_v60  ;;  %v1437_v38 = vrot.slane %v1373_v0, %v5032_v28 }
 0x292   : > { %v1926_v11 = vpop.permute.xlu0 %1925  ;;  %1614 = vrot.lane.b32.xlu1 %v1559_v56, %s4463_s10 }
 0x293   : > { %1949 = vst.msk [vmem:[%s4952_s8 + $0x8] sm:$0x1] %vm1218_vm13, %v1926_v11  ;;  %v5381_v13 = vrot.slane %v2039_v8, %v4927_v48  ;;  %v1543_v8 = vcombine.high %v5251_v37, %v5251_v37 }
 0x294   : > { %v1928_v14 = vpop.permute.xlu1 %1927  ;;  %1303 = vrot.lane.b32.xlu0 %v1254_v5, %s4450_s19  ;;  %v5365_v5 = vcombine.high %v5116_v59, %v5116_v59 }
 0x295   : > { %1950 = vst.msk [vmem:[%s4952_s8 + $0x28] sm:$0x1] %vm1218_vm13, %v1928_v14 }
 0x296   : > { %v1958_v34 = vpop.permute.xlu0 %1957  ;;  %1618 = vrot.lane.b32.xlu1 %v1567_v1, %s4463_s10  ;;  %v2095_v59 = vrot.slane %v5365_v5, %v5032_v28 }
 0x297   : > { %1981 = vst.msk [vmem:[%s4952_s8 + $0x9] sm:$0x1] %vm1218_vm13, %v1958_v34  ;;  %v2119_v34 = vrot.slane %v5381_v13, %v5032_v28 }
 0x298   : > { %v1960_v62 = vpop.permute.xlu1 %1959  ;;  %1937 = vrot.lane.b32.xlu0 %v1920_v16, %s4458_s11 }
 0x299   : > { %1982 = vst.msk [vmem:[%s4952_s8 + $0x29] sm:$0x1] %vm1218_vm13, %v1960_v62 }
 0x29a   : > { %v1990_v9 = vpop.permute.xlu0 %1989  ;;  %1646 = vrot.lane.b32.xlu1 %v1559_v56, %s4464_s21 }
 0x29b   : > { %2013 = vst.msk [vmem:[%s4952_s8 + $0xa] sm:$0x1] %vm1218_vm13, %v1990_v9 }
 0x29c   : > { %v1992_v19 = vpop.permute.xlu1 %1991  ;;  %1969 = vrot.lane.b32.xlu0 %v1920_v16, %s4459_s18 }
 0x29d   : > { %2014 = vst.msk [vmem:[%s4952_s8 + $0x2a] sm:$0x1] %vm1218_vm13, %v1992_v19 }
 0x29e   : > { %v1577_v41 = vpop.permute.xlu0 %1576  ;;  %1650 = vrot.lane.b32.xlu1 %v1567_v1, %s4464_s21 }
 0x29f   : > { %1600 = vst.msk [vmem:[%s4952_s8 + $0x4] sm:$0x1] %vm1218_vm13, %v1577_v41 }
 0x2a0   : > { %v5300_v51 = vpop.permute.xlu1 %1440  ;;  %2001 = vrot.lane.b32.xlu0 %v1920_v16, %s4460_s4  ;;  %v5393_v16 = vcombine.high %v5138_v58, %v5138_v58  ;;  %v1734_v58 = vrot.slane %v5293_v20, %v4939_v53 }
 0x2a2   : > { %v1609_v31 = vpop.permute.xlu0 %1608  ;;  %1793 = vrot.lane.b32.xlu1 %v1738_v21, %s4465_s22  ;;  %v2127_v9 = vrot.slane %v5393_v16, %v5032_v28  ;;  %v1258_v21 = vrot.slane %v5065_v39, %v4939_v53 }
 0x2a3   : > { %1632 = vst.msk [vmem:[%s4952_s8 + $0x5] sm:$0x1] %vm1218_vm13, %v1609_v31  ;;  %v1742_v31 = vrot.slane %v5307_v25, %v4939_v53 }
 0x2a4   : > { %v5316_v35 = vpop.permute.xlu1 %1456  ;;  %1442 = vrot.lane.b32.xlu0 %v1385_v33, %s4462_s9 }
 0x2a6   : > { %v1641_v45 = vpop.permute.xlu0 %1640  ;;  %1797 = vrot.lane.b32.xlu1 %v1746_v44, %s4465_s22  ;;  %v1892_v44 = vcombine.high %v5180_v18, %v5180_v18 }
 0x2a7   : > { %1664 = vst.msk [vmem:[%s4952_s8 + $0x6] sm:$0x1] %vm1218_vm13, %v1641_v45  ;;  %v1766_v45 = vrot.slane %v5322_v29, %v4939_v53 }
 0x2a8   : > { %v1579_v43 = vpop.permute.xlu1 %1578  ;;  %1446 = vrot.lane.b32.xlu0 %v1393_v27, %s4462_s9  ;;  %v1924_v27 = vrot.slane %v1892_v44, %v4939_v53 }
 0x2a9   : > { %1601 = vst.msk [vmem:[%s4952_s8 + $0x24] sm:$0x1] %vm1218_vm13, %v1579_v43  ;;  %v1774_v43 = vrot.slane %v5334_v50, %v4939_v53 }
 0x2aa   : > { %v1264_v24 = vpop.permute.xlu0 %1263  ;;  %1809 = vrot.lane.b32.xlu1 %v1770_v36, %s4465_s22 }
 0x2ab   : > { %1285 = vst.msk [vmem:[%s4952_s8 + $0x41] sm:$0x1] %vm1218_vm13, %v1264_v24  ;;  %v2083_v24 = vrot.slane %v5349_v57, %v4939_v53 }
 0x2ac   : > { %v1611_v56 = vpop.permute.xlu1 %1610  ;;  %1458 = vrot.lane.b32.xlu0 %v1417_v32, %s4462_s9  ;;  %v1372_v32 = vcombine.high %v5208_v30, %v5208_v30 }
 0x2ad   : > { %1633 = vst.msk [vmem:[%s4952_s8 + $0x25] sm:$0x1] %vm1218_vm13, %v1611_v56 }
 0x2ae   : > { %v1268_v54 = vpop.permute.xlu0 %1267  ;;  %1813 = vrot.lane.b32.xlu1 %v1778_v52, %s4465_s22  ;;  %v2091_v52 = vrot.slane %v5365_v5, %v4939_v53  ;;  %v1405_v30 = vrot.slane %v1372_v32, %v5032_v28 }
 0x2af   : > { %1287 = vst.msk [vmem:[%s4952_s8 + $0x81] sm:$0x1] %vm1218_vm13, %v1268_v54 }
 0x2b0   : > { %v1643_v1 = vpop.permute.xlu1 %1642  ;;  %1462 = vrot.lane.b32.xlu0 %v1425_v61, %s4462_s9 }
 0x2b1   : > { %1665 = vst.msk [vmem:[%s4952_s8 + $0x26] sm:$0x1] %vm1218_vm13, %v1643_v1 }
 0x2b2   : > { %v1296_v40 = vpop.permute.xlu0 %1295  ;;  %2142 = vrot.lane.b32.xlu1 %v2087_v2, %s4466_s23 }
 0x2b3   : > { %1317 = vst.msk [vmem:[%s4952_s8 + $0x42] sm:$0x1] %vm1218_vm13, %v1296_v40 }
 0x2b4   : > { %v5375_v11 = vpop.permute.xlu1 %1789  ;;  %1588 = vrot.lane.b32.xlu0 %v1571_v22, %s4461_s24 }
 0x2b6   : > { %v1300_v60 = vpop.permute.xlu0 %1299  ;;  %2146 = vrot.lane.b32.xlu1 %v2095_v59, %s4466_s23  ;;  %v1575_v59 = vrot.slane %v1543_v8, %v4939_v53 }
 0x2b7   : > { %1319 = vst.msk [vmem:[%s4952_s8 + $0x82] sm:$0x1] %vm1218_vm13, %v1300_v60  ;;  %v1401_v60 = vrot.slane %v1372_v32, %v4939_v53 }
 0x2b8   : > { %v5386_v14 = vpop.permute.xlu1 %1805  ;;  %1620 = vrot.lane.b32.xlu0 %v1571_v22, %s4463_s10 }
 0x2ba   : > { %v1930_v17 = vpop.permute.xlu0 %1929  ;;  %2158 = vrot.lane.b32.xlu1 %v2119_v34, %s4466_s23 }
 0x2bb   : > { %1951 = vst.msk [vmem:[%s4952_s8 + $0x48] sm:$0x1] %vm1218_vm13, %v1930_v17  ;;  %v1433_v17 = vrot.slane %v1373_v0, %v4939_v53 }
 0x2bc   : > { %v5398_v62 = vpop.permute.xlu1 %2138  ;;  %1652 = vrot.lane.b32.xlu0 %v1571_v22, %s4464_s21 }
 0x2be   : > { %v1934_v19 = vpop.permute.xlu0 %1933  ;;  %2162 = vrot.lane.b32.xlu1 %v2127_v9, %s4466_s23  ;;  %v1721_v9 = vcombine.high %v5293_v20, %v5293_v20 }
 0x2bf   : > { %1953 = vst.msk [vmem:[%s4952_s8 + $0x88] sm:$0x1] %vm1218_vm13, %v1934_v19 }
 0x2c0   : > { %v5408_v41 = vpop.permute.xlu1 %2154  ;;  %1791 = vrot.lane.b32.xlu0 %v1734_v58, %s4465_s22 }
 0x2c2   : > { %v1962_v26 = vpop.permute.xlu0 %1961  ;;  %1273 = vrot.lane.b32.xlu1 %v1258_v21, %s4447_s7  ;;  %s4467_s7 = smov 104  }
 0x2c3   : > { %1983 = vst.msk [vmem:[%s4952_s8 + $0x49] sm:$0x1] %vm1218_vm13, %v1962_v26  ;;  %v1722_v26 = vcombine.high %v5322_v29, %v5322_v29 }
 0x2c4   : > { %v1266_v33 = vpop.permute.xlu1 %1265  ;;  %1795 = vrot.lane.b32.xlu0 %v1742_v31, %s4465_s22  ;;  %v1754_v31 = vrot.slane %v1721_v9, %v5032_v28 }
 0x2c5   : > { %1286 = vst.msk [vmem:[%s4952_s8 + $0x61] sm:$0x1] %vm1218_vm13, %v1266_v33  ;;  %v1782_v44 = vrot.slane %v1722_v26, %v4939_v53 }
 0x2c6   : > { %v1966_v39 = vpop.permute.xlu0 %1965  ;;  %1305 = vrot.lane.b32.xlu1 %v1258_v21, %s4450_s19  ;;  %v1750_v21 = vrot.slane %v1721_v9, %v4939_v53  ;;  %s4468_s19 = smov 70  }
 0x2c7   : > { %1985 = vst.msk [vmem:[%s4952_s8 + $0x89] sm:$0x1] %vm1218_vm13, %v1966_v39  ;;  %v2070_v39 = vcombine.high %v5349_v57, %v5349_v57  ;;  %v2071_v57 = vcombine.high %v5381_v13, %v5381_v13 }
 0x2c8   : > { %1807 = vrot.lane.b32.xlu0 %v1766_v45, %s4465_s22  ;;  %v1270_v25 = vpop.permute.xlu1 %1269  ;;  %v1786_v45 = vrot.slane %v1722_v26, %v5032_v28 }
 0x2c9   : > { %1288 = vst.msk [vmem:[%s4952_s8 + $0xa1] sm:$0x1] %vm1218_vm13, %v1270_v25  ;;  %v2200_v25 = vrot.slane %v4967_v6, %v4927_v48  ;;  %v2131_v32 = vrot.slane %v2071_v57, %v4939_v53 }
 0x2ca   : > { %v1994_v18 = vpop.permute.xlu0 %1993  ;;  %1939 = vrot.lane.b32.xlu1 %v1924_v27, %s4458_s11  ;;  %s4473_s11 = smov 28  }
 0x2cb   : > { %2015 = vst.msk [vmem:[%s4952_s8 + $0x4a] sm:$0x1] %vm1218_vm13, %v1994_v18  ;;  %v2099_v18 = vrot.slane %v2070_v39, %v4939_v53 }
 0x2cc   : > { %1811 = vrot.lane.b32.xlu0 %v1774_v43, %s4465_s22  ;;  %v1298_v36 = vpop.permute.xlu1 %1297 }
 0x2cd   : > { %1318 = vst.msk [vmem:[%s4952_s8 + $0x62] sm:$0x1] %vm1218_vm13, %v1298_v36  ;;  %v2103_v36 = vrot.slane %v2070_v39, %v5032_v28 }
 0x2ce   : > { %v1998_v55 = vpop.permute.xlu0 %1997  ;;  %1971 = vrot.lane.b32.xlu1 %v1924_v27, %s4459_s18  ;;  %s4474_s18 = smov 122  }
 0x2cf   : > { %2017 = vst.msk [vmem:[%s4952_s8 + $0x8a] sm:$0x1] %vm1218_vm13, %v1998_v55  ;;  %v2208_v55 = vcombine.high %v2200_v25, %v2200_v25 }
 0x2d0   : > { %2140 = vrot.lane.b32.xlu0 %v2083_v24, %s4466_s23  ;;  %v1302_v50 = vpop.permute.xlu1 %1301  ;;  %v2193_v24 = vcombine.high %v4967_v6, %v4967_v6 }
 0x2d1   : > { %1320 = vst.msk [vmem:[%s4952_s8 + $0xa2] sm:$0x1] %vm1218_vm13, %v1302_v50 }
 0x2d2   : > { %v1439_v56 = vpop.permute.xlu0 %1438  ;;  %2003 = vrot.lane.b32.xlu1 %v1924_v27, %s4460_s4  ;;  %s4475_s4 = smov 88  }
 0x2d3   : > { %v1471_v54 = vsel %vm1470_vm14, %v1439_v56, %v5300_v51  ;;  %v2115_v51 = vrot.slane %v5381_v13, %v4939_v53  ;;  %v2216_v13 = vrot.slane %v2200_v25, %v4927_v48 }
 0x2d4   : > { %1487 = vst.msk [vmem:[%s4952_s8 + $0x3] sm:$0x1] %vm1218_vm13, %v1471_v54  ;;  %2144 = vrot.lane.b32.xlu0 %v2091_v52, %s4466_s23  ;;  %v1932_v61 = vpop.permute.xlu1 %1931  ;;  %v2135_v54 = vrot.slane %v2071_v57, %v5032_v28 }
 0x2d5   : > { %1952 = vst.msk [vmem:[%s4952_s8 + $0x68] sm:$0x1] %vm1218_vm13, %v1932_v61  ;;  %v2230_v61 = vrot.slane %v2208_v55, %v4927_v48 }
 0x2d6   : > { %v1455_v1 = vpop.permute.xlu0 %1454  ;;  %1452 = vrot.lane.b32.xlu1 %v1405_v30, %s4462_s9  ;;  %v2207_v30 = vrot.slane %v2193_v24, %v4927_v48 }
 0x2d7   : > { %v1475_v2 = vsel %vm1470_vm14, %v1455_v1, %v5316_v35  ;;  %v2123_v35 = vrot.slane %v5393_v16, %v4939_v53  ;;  %v5550_v1 = vrot.slane %v2216_v13, %v4939_v53 }
 0x2d8   : > { %1491 = vst.msk [vmem:[%s4952_s8 + $0x83] sm:$0x1] %vm1218_vm13, %v1475_v2  ;;  %2156 = vrot.lane.b32.xlu0 %v2115_v51, %s4466_s23  ;;  %v1936_v5 = vpop.permute.xlu1 %1935  ;;  %v2209_v8 = vcombine.high %v2207_v30, %v2207_v30 }
 0x2d9   : > { %1954 = vst.msk [vmem:[%s4952_s8 + $0xa8] sm:$0x1] %vm1218_vm13, %v1936_v5  ;;  %v5561_v5 = vrot.slane %v2230_v61, %v4939_v53 }
 0x2da   : > { %v1581_v40 = vpop.permute.xlu0 %1580  ;;  %1468 = vrot.lane.b32.xlu1 %v1437_v38, %s4462_s9  ;;  %v2240_v38 = vcombine.high %v2230_v61, %v2230_v61 }
 0x2db   : > { %1602 = vst.msk [vmem:[%s4952_s8 + $0x44] sm:$0x1] %vm1218_vm13, %v1581_v40 }
 0x2dc   : > { %2160 = vrot.lane.b32.xlu0 %v2123_v35, %s4466_s23  ;;  %v1964_v22 = vpop.permute.xlu1 %1963  ;;  %v2223_v35 = vrot.slane %v2207_v30, %v4927_v48 }
 0x2dd   : > { %1984 = vst.msk [vmem:[%s4952_s8 + $0x69] sm:$0x1] %vm1218_vm13, %v1964_v22 }
 0x2de   : > { %v1585_v37 = vpop.permute.xlu0 %1584  ;;  %1590 = vrot.lane.b32.xlu1 %v1575_v59, %s4461_s24  ;;  %s4476_s24 = smov 54  }
 0x2df   : > { %1604 = vst.msk [vmem:[%s4952_s8 + $0x84] sm:$0x1] %vm1218_vm13, %v1585_v37  ;;  %v2257_v37 = vrot.slane %v2240_v38, %v4939_v53 }
 0x2e0   : > { %1450 = vrot.lane.b32.xlu0 %v1401_v60, %s4462_s9  ;;  %v1968_v34 = vpop.permute.xlu1 %1967  ;;  %v2237_v60 = vrot.slane %v2209_v8, %v4927_v48 }
 0x2e1   : > { %1986 = vst.msk [vmem:[%s4952_s8 + $0xa9] sm:$0x1] %vm1218_vm13, %v1968_v34 }
 0x2e2   : > { %v1613_v16 = vpop.permute.xlu0 %1612  ;;  %1622 = vrot.lane.b32.xlu1 %v1575_v59, %s4463_s10  ;;  %s4478_s10 = smov 114  }
 0x2e3   : > { %1634 = vst.msk [vmem:[%s4952_s8 + $0x45] sm:$0x1] %vm1218_vm13, %v1613_v16  ;;  %v2261_v16 = vrot.slane %v2223_v35, %v4939_v53 }
 0x2e4   : > { %1466 = vrot.lane.b32.xlu0 %v1433_v17, %s4462_s9  ;;  %v1996_v19 = vpop.permute.xlu1 %1995  ;;  %s4477_s9 = smov 20  }
 0x2e5   : > { %2016 = vst.msk [vmem:[%s4952_s8 + $0x6a] sm:$0x1] %vm1218_vm13, %v1996_v19  ;;  %v2265_v19 = vrot.slane %v2237_v60, %v4939_v53 }
 0x2e6   : > { %v1617_v58 = vpop.permute.xlu0 %1616  ;;  %1654 = vrot.lane.b32.xlu1 %v1575_v59, %s4464_s21  ;;  %s4479_s21 = smov 80  }
 0x2e7   : > { %1636 = vst.msk [vmem:[%s4952_s8 + $0x85] sm:$0x1] %vm1218_vm13, %v1617_v58  ;;  %v2241_v58 = vcombine.high %v2237_v60, %v2237_v60 }
 0x2e8   : > { %1799 = vrot.lane.b32.xlu0 %v1750_v21, %s4465_s22  ;;  %v2000_v20 = vpop.permute.xlu1 %1999 }
 0x2e9   : > { %2018 = vst.msk [vmem:[%s4952_s8 + $0xaa] sm:$0x1] %vm1218_vm13, %v2000_v20  ;;  %v2273_v20 = vrot.slane %v2241_v58, %v4939_v53 }
 0x2ea   : > { %v1645_v33 = vpop.permute.xlu0 %1644  ;;  %1801 = vrot.lane.b32.xlu1 %v1754_v31, %s4465_s22 }
 0x2eb   : > { %1666 = vst.msk [vmem:[%s4952_s8 + $0x46] sm:$0x1] %vm1218_vm13, %v1645_v33 }
 0x2ec   : > { %1815 = vrot.lane.b32.xlu0 %v1782_v44, %s4465_s22  ;;  %v5518_v29 = vpop.permute.xlu1 %1444 }
 0x2ee   : > { %v1649_v27 = vpop.permute.xlu0 %1648  ;;  %1817 = vrot.lane.b32.xlu1 %v1786_v45, %s4465_s22  ;;  %s4480_s22 = smov 46  }
 0x2ef   : > { %1668 = vst.msk [vmem:[%s4952_s8 + $0x86] sm:$0x1] %vm1218_vm13, %v1649_v27 }
 0x2f0   : > { %2148 = vrot.lane.b32.xlu0 %v2099_v18, %s4466_s23  ;;  %v5530_v43 = vpop.permute.xlu1 %1448 }
 0x2f2   : > { %v1788_v50 = vpop.permute.xlu0 %1787  ;;  %2150 = vrot.lane.b32.xlu1 %v2103_v36, %s4466_s23 }
 0x2f3   : > { %v1820_v56 = vsel %vm1819_vm15, %v1788_v50, %v5375_v11  ;;  %v2238_v11 = vcombine.high %v2216_v13, %v2216_v13  ;;  %v2379_v13 = vrot.slane %v2371_v46, %v4927_v48 }
 0x2f4   : > { %1836 = vst.msk [vmem:[%s4952_s8 + $0x7] sm:$0x1] %vm1218_vm13, %v1820_v56  ;;  %2164 = vrot.lane.b32.xlu0 %v2131_v32, %s4466_s23  ;;  %v5543_v52 = vpop.permute.xlu1 %1460 }
 0x2f5   : > { %v2395_v61 = vrot.slane %v2379_v13, %v4927_v48  ;;  %v2387_v30 = vcombine.high %v2379_v13, %v2379_v13  ;;  %v2542_v13 = vcombine.high %v5078_v42, %v5078_v42 }
 0x2f6   : > { %v1804_v0 = vpop.permute.xlu0 %1803  ;;  %2166 = vrot.lane.b32.xlu1 %v2135_v54, %s4466_s23  ;;  %s4481_s23 = smov 12  }
 0x2f7   : > { %v1824_v51 = vsel %vm1819_vm15, %v1804_v0, %v5386_v14  ;;  %v5566_v14 = vrot.slane %v2238_v11, %v4939_v53  ;;  %v2409_v11 = vrot.slane %v2387_v30, %v4927_v48  ;;  %v2417_v8 = vcombine.high %v2395_v61, %v2395_v61 }
 0x2f8   : > { %1840 = vst.msk [vmem:[%s4952_s8 + $0x87] sm:$0x1] %vm1218_vm13, %v1824_v51  ;;  %2274 = vrot.lane.b32.xlu0 %v5550_v1, %s4467_s7  ;;  %v5558_v2 = vpop.permute.xlu1 %1464 }
 0x2f9   : > { %v2432_v38 = vrot.slane %v2409_v11, %v4939_v53 }
 0x2fa   : > { %v2137_v40 = vpop.permute.xlu0 %2136  ;;  %2276 = vrot.lane.b32.xlu1 %v5561_v5, %s4467_s7 }
 0x2fb   : > { %v2169_v22 = vsel %vm2168_vm0, %v2137_v40, %v5398_v62  ;;  %v2239_v62 = vcombine.high %v2223_v35, %v2223_v35 }
 0x2fc   : > { %2185 = vst.msk [vmem:[%s4952_s8 + $0xb] sm:$0x1] %vm1218_vm13, %v2169_v22  ;;  %2278 = vrot.lane.b32.xlu0 %v5566_v14, %s4467_s7  ;;  %v1583_v59 = vpop.permute.xlu1 %1582  ;;  %v2440_v22 = vrot.slane %v2417_v8, %v4939_v53 }
 0x2fd   : > { %1603 = vst.msk [vmem:[%s4952_s8 + $0x64] sm:$0x1] %vm1218_vm13, %v1583_v59  ;;  %v2269_v26 = vrot.slane %v2239_v62, %v4939_v53  ;;  %v2419_v59 = vcombine.high %v2409_v11, %v2409_v11 }
 0x2fe   : > { %v2153_v34 = vpop.permute.xlu0 %2152  ;;  %2280 = vrot.lane.b32.xlu1 %v2257_v37, %s4467_s7 }
 0x2ff   : > { %v2173_v17 = vsel %vm2168_vm0, %v2153_v34, %v5408_v41  ;;  %v2444_v34 = vrot.slane %v2417_v8, %v5032_v28  ;;  %v2448_v62 = vrot.slane %v2419_v59, %v4939_v53 }
 0x300   : > { %2189 = vst.msk [vmem:[%s4952_s8 + $0x8b] sm:$0x1] %vm1218_vm13, %v2173_v17  ;;  %2282 = vrot.lane.b32.xlu0 %v2261_v16, %s4467_s7  ;;  %v1587_v9 = vpop.permute.xlu1 %1586 }
 0x301   : > { %1605 = vst.msk [vmem:[%s4952_s8 + $0xa4] sm:$0x1] %vm1218_vm13, %v1587_v9 }
 0x302   : > { %v1272_v21 = vpop.permute.xlu0 %1271  ;;  %2284 = vrot.lane.b32.xlu1 %v2265_v19, %s4467_s7 }
 0x303   : > { %1289 = vst.msk [vmem:[%s4952_s8 + $0xc1] sm:$0x1] %vm1218_vm13, %v1272_v21 }
 0x304   : > { %2286 = vrot.lane.b32.xlu0 %v2269_v26, %s4467_s7  ;;  %v1615_v41 = vpop.permute.xlu1 %1614 }
 0x305   : > { %1635 = vst.msk [vmem:[%s4952_s8 + $0x65] sm:$0x1] %vm1218_vm13, %v1615_v41 }
 0x306   : > { %v1304_v31 = vpop.permute.xlu0 %1303  ;;  %2288 = vrot.lane.b32.xlu1 %v2273_v20, %s4467_s7  ;;  %s4482_s7 = smov 106  }
 0x307   : > { %1321 = vst.msk [vmem:[%s4952_s8 + $0xc2] sm:$0x1] %vm1218_vm13, %v1304_v31 }
 0x308   : > { %2306 = vrot.lane.b32.xlu0 %v5550_v1, %s4468_s19  ;;  %v1619_v33 = vpop.permute.xlu1 %1618 }
 0x309   : > { %1637 = vst.msk [vmem:[%s4952_s8 + $0xa5] sm:$0x1] %vm1218_vm13, %v1619_v33 }
 0x30a   : > { %v1938_v44 = vpop.permute.xlu0 %1937  ;;  %2308 = vrot.lane.b32.xlu1 %v5561_v5, %s4468_s19 }
 0x30b   : > { %1955 = vst.msk [vmem:[%s4952_s8 + $0xc8] sm:$0x1] %vm1218_vm13, %v1938_v44 }
 0x30c   : > { %2310 = vrot.lane.b32.xlu0 %v5566_v14, %s4468_s19  ;;  %v1647_v39 = vpop.permute.xlu1 %1646 }
 0x30d   : > { %1667 = vst.msk [vmem:[%s4952_s8 + $0x66] sm:$0x1] %vm1218_vm13, %v1647_v39 }
 0x30e   : > { %v1970_v45 = vpop.permute.xlu0 %1969  ;;  %2312 = vrot.lane.b32.xlu1 %v2257_v37, %s4468_s19 }
 0x30f   : > { %1987 = vst.msk [vmem:[%s4952_s8 + $0xc9] sm:$0x1] %vm1218_vm13, %v1970_v45 }
 0x310   : > { %2314 = vrot.lane.b32.xlu0 %v2261_v16, %s4468_s19  ;;  %v1651_v25 = vpop.permute.xlu1 %1650 }
 0x311   : > { %1669 = vst.msk [vmem:[%s4952_s8 + $0xa6] sm:$0x1] %vm1218_vm13, %v1651_v25 }
 0x312   : > { %v2002_v27 = vpop.permute.xlu0 %2001  ;;  %2316 = vrot.lane.b32.xlu1 %v2265_v19, %s4468_s19 }
 0x313   : > { %2019 = vst.msk [vmem:[%s4952_s8 + $0xca] sm:$0x1] %vm1218_vm13, %v2002_v27 }
 0x314   : > { %2318 = vrot.lane.b32.xlu0 %v2269_v26, %s4468_s19  ;;  %v1794_v18 = vpop.permute.xlu1 %1793 }
 0x316   : > { %v1443_v57 = vpop.permute.xlu0 %1442  ;;  %2320 = vrot.lane.b32.xlu1 %v2273_v20, %s4468_s19  ;;  %s4483_s19 = smov 72  }
 0x317   : > { %v1472_v36 = vsel %vm1470_vm14, %v1443_v57, %v5518_v29 }
 0x318   : > { %1488 = vst.msk [vmem:[%s4952_s8 + $0x23] sm:$0x1] %vm1218_vm13, %v1472_v36  ;;  %2338 = vrot.lane.b32.xlu0 %v5550_v1, %s4469_s28  ;;  %v5620_v55 = vpop.permute.xlu1 %1797  ;;  %v2424_v1 = vrot.slane %v2395_v61, %v4939_v53 }
 0x31a   : > { %v1447_v24 = vpop.permute.xlu0 %1446  ;;  %2340 = vrot.lane.b32.xlu1 %v5561_v5, %s4469_s28 }
 0x31b   : > { %v1473_v50 = vsel %vm1470_vm14, %v1447_v24, %v5530_v43 }
 0x31c   : > { %1489 = vst.msk [vmem:[%s4952_s8 + $0x43] sm:$0x1] %vm1218_vm13, %v1473_v50  ;;  %2342 = vrot.lane.b32.xlu0 %v5566_v14, %s4469_s28  ;;  %v5628_v32 = vpop.permute.xlu1 %1809  ;;  %v2436_v14 = vrot.slane %v2409_v11, %v5032_v28 }
 0x31e   : > { %v1459_v29 = vpop.permute.xlu0 %1458  ;;  %2344 = vrot.lane.b32.xlu1 %v2257_v37, %s4469_s28  ;;  %v2386_v37 = vrot.slane %v2372_v49, %v4927_v48 }
 0x31f   : > { %v1476_v56 = vsel %vm1470_vm14, %v1459_v29, %v5543_v52 }
 0x320   : > { %1492 = vst.msk [vmem:[%s4952_s8 + $0xa3] sm:$0x1] %vm1218_vm13, %v1476_v56  ;;  %2346 = vrot.lane.b32.xlu0 %v2261_v16, %s4469_s28  ;;  %v5638_v43 = vpop.permute.xlu1 %1813  ;;  %v2402_v17 = vrot.slane %v2386_v37, %v4927_v48  ;;  %v2388_v9 = vcombine.high %v2386_v37, %v2386_v37 }
 0x322   : > { %v1463_v54 = vpop.permute.xlu0 %1462  ;;  %2348 = vrot.lane.b32.xlu1 %v2265_v19, %s4469_s28  ;;  %v2452_v19 = vrot.slane %v2419_v59, %v5032_v28  ;;  %v2456_v21 = vrot.slane %v2402_v17, %v4939_v53  ;;  %v2460_v31 = vrot.slane %v2402_v17, %v5032_v28  ;;  %v2418_v39 = vcombine.high %v2402_v17, %v2402_v17 }
 0x323   : > { %v1477_v0 = vsel %vm1470_vm14, %v1463_v54, %v5558_v2  ;;  %v2428_v2 = vrot.slane %v2395_v61, %v5032_v28 }
 0x324   : > { %1493 = vst.msk [vmem:[%s4952_s8 + $0xc3] sm:$0x1] %vm1218_vm13, %v1477_v0  ;;  %2350 = vrot.lane.b32.xlu0 %v2269_v26, %s4469_s28  ;;  %v5645_v46 = vpop.permute.xlu1 %2142  ;;  %v2416_v26 = vrot.slane %v2388_v9, %v4927_v48  ;;  %v2472_v36 = vrot.slane %v2418_v39, %v4939_v53 }
 0x326   : > { %v1589_v52 = vpop.permute.xlu0 %1588  ;;  %2352 = vrot.lane.b32.xlu1 %v2273_v20, %s4469_s28  ;;  %v2464_v44 = vrot.slane %v2416_v26, %v4939_v53  ;;  %v2468_v27 = vrot.slane %v2416_v26, %v5032_v28  ;;  %s4484_s28 = smov 38  }
 0x327   : > { %1606 = vst.msk [vmem:[%s4952_s8 + $0xc4] sm:$0x1] %vm1218_vm13, %v1589_v52 }
 0x328   : > { %2485 = vrot.lane.b32.xlu0 %v2424_v1, %s4470_s29  ;;  %v5652_v51 = vpop.permute.xlu1 %2146  ;;  %v2556_v1 = vrot.slane %v2542_v13, %v4927_v48 }
 0x32a   : > { %v1621_v5 = vpop.permute.xlu0 %1620  ;;  %2487 = vrot.lane.b32.xlu1 %v2428_v2, %s4470_s29  ;;  %v2572_v37 = vrot.slane %v2556_v1, %v4927_v48 }
 0x32b   : > { %1638 = vst.msk [vmem:[%s4952_s8 + $0xc5] sm:$0x1] %vm1218_vm13, %v1621_v5 }
 0x32c   : > { %2489 = vrot.lane.b32.xlu0 %v2432_v38, %s4470_s29  ;;  %v5660_v40 = vpop.permute.xlu1 %2158  ;;  %v2610_v9 = vrot.slane %v2572_v37, %v4939_v53 }
 0x32e   : > { %v1653_v35 = vpop.permute.xlu0 %1652  ;;  %2491 = vrot.lane.b32.xlu1 %v2436_v14, %s4470_s29 }
 0x32f   : > { %1670 = vst.msk [vmem:[%s4952_s8 + $0xc6] sm:$0x1] %vm1218_vm13, %v1653_v35  ;;  %v2558_v35 = vcombine.high %v2556_v1, %v2556_v1 }
 0x330   : > { %2493 = vrot.lane.b32.xlu0 %v2440_v22, %s4470_s29  ;;  %v5672_v60 = vpop.permute.xlu1 %2162 }
 0x332   : > { %v1792_v16 = vpop.permute.xlu0 %1791  ;;  %2495 = vrot.lane.b32.xlu1 %v2444_v34, %s4470_s29 }
 0x333   : > { %v1821_v6 = vsel %vm1819_vm15, %v1792_v16, %v1794_v18  ;;  %v2549_v18 = vrot.slane %v5078_v42, %v4927_v48 }
 0x334   : > { %1837 = vst.msk [vmem:[%s4952_s8 + $0x27] sm:$0x1] %vm1218_vm13, %v1821_v6  ;;  %2497 = vrot.lane.b32.xlu0 %v2448_v62, %s4470_s29  ;;  %v1274_v49 = vpop.permute.xlu1 %1273  ;;  %v2586_v62 = vrot.slane %v2558_v35, %v4927_v48  ;;  %v2588_v6 = vcombine.high %v2572_v37, %v2572_v37 }
 0x335   : > { %1290 = vst.msk [vmem:[%s4952_s8 + $0xe1] sm:$0x1] %vm1218_vm13, %v1274_v49  ;;  %v2557_v29 = vcombine.high %v2549_v18, %v2549_v18  ;;  %v2565_v54 = vrot.slane %v2549_v18, %v4927_v48  ;;  %v2696_v18 = vrot.slane %v2688_v3, %v4927_v48 }
 0x336   : > { %v1796_v58 = vpop.permute.xlu0 %1795  ;;  %2499 = vrot.lane.b32.xlu1 %v2452_v19, %s4470_s29  ;;  %v2614_v19 = vrot.slane %v2586_v62, %v4939_v53 }
 0x337   : > { %v1822_v41 = vsel %vm1819_vm15, %v1796_v58, %v5620_v55  ;;  %v2420_v55 = vcombine.high %v2416_v26, %v2416_v26  ;;  %v2579_v52 = vrot.slane %v2557_v29, %v4927_v48  ;;  %v2594_v2 = vrot.slane %v2565_v54, %v4939_v53 }
 0x338   : > { %1838 = vst.msk [vmem:[%s4952_s8 + $0x47] sm:$0x1] %vm1218_vm13, %v1822_v41  ;;  %2501 = vrot.lane.b32.xlu0 %v2456_v21, %s4470_s29  ;;  %v1306_v20 = vpop.permute.xlu1 %1305  ;;  %v2590_v58 = vcombine.high %v2586_v62, %v2586_v62  ;;  %v2618_v26 = vrot.slane %v2588_v6, %v4939_v53 }
 0x339   : > { %1322 = vst.msk [vmem:[%s4952_s8 + $0xe2] sm:$0x1] %vm1218_vm13, %v1306_v20  ;;  %v2484_v0 = vrot.slane %v2420_v55, %v5032_v28  ;;  %v2598_v8 = vrot.slane %v2579_v52, %v4939_v53  ;;  %v2589_v14 = vcombine.high %v2579_v52, %v2579_v52 }
 0x33a   : > { %v1808_v33 = vpop.permute.xlu0 %1807  ;;  %2503 = vrot.lane.b32.xlu1 %v2460_v31, %s4470_s29  ;;  %v2622_v20 = vrot.slane %v2590_v58, %v4939_v53  ;;  %v2866_v58 = vrot.slane %v5131_v63, %v4927_v48 }
 0x33b   : > { %v1825_v45 = vsel %vm1819_vm15, %v1808_v33, %v5628_v32  ;;  %v2476_v32 = vrot.slane %v2418_v39, %v5032_v28  ;;  %v2606_v16 = vrot.slane %v2589_v14, %v4939_v53 }
 0x33c   : > { %1841 = vst.msk [vmem:[%s4952_s8 + $0xa7] sm:$0x1] %vm1218_vm13, %v1825_v45  ;;  %2505 = vrot.lane.b32.xlu0 %v2464_v44, %s4470_s29  ;;  %v1940_v25 = vpop.permute.xlu1 %1939 }
 0x33d   : > { %1956 = vst.msk [vmem:[%s4952_s8 + $0xe8] sm:$0x1] %vm1218_vm13, %v1940_v25 }
 0x33e   : > { %v1812_v57 = vpop.permute.xlu0 %1811  ;;  %2507 = vrot.lane.b32.xlu1 %v2468_v27, %s4470_s29 }
 0x33f   : > { %v1826_v24 = vsel %vm1819_vm15, %v1812_v57, %v5638_v43  ;;  %v2480_v43 = vrot.slane %v2420_v55, %v4939_v53 }
 0x340   : > { %1842 = vst.msk [vmem:[%s4952_s8 + $0xc7] sm:$0x1] %vm1218_vm13, %v1826_v24  ;;  %2509 = vrot.lane.b32.xlu0 %v2472_v36, %s4470_s29  ;;  %v1972_v50 = vpop.permute.xlu1 %1971  ;;  %v2712_v24 = vrot.slane %v2696_v18, %v4927_v48 }
 0x341   : > { %1988 = vst.msk [vmem:[%s4952_s8 + $0xe9] sm:$0x1] %vm1218_vm13, %v1972_v50  ;;  %v2704_v50 = vcombine.high %v2696_v18, %v2696_v18 }
 0x342   : > { %v2141_v56 = vpop.permute.xlu0 %2140  ;;  %2511 = vrot.lane.b32.xlu1 %v2476_v32, %s4470_s29  ;;  %v2741_v13 = vrot.slane %v2712_v24, %v4939_v53  ;;  %v2734_v52 = vcombine.high %v2712_v24, %v2712_v24 }
 0x343   : > { %v2170_v61 = vsel %vm2168_vm0, %v2141_v56, %v5645_v46  ;;  %v2587_v46 = vcombine.high %v2565_v54, %v2565_v54  ;;  %v2726_v56 = vrot.slane %v2704_v50, %v4927_v48  ;;  %v2745_v54 = vrot.slane %v2712_v24, %v5032_v28 }
 0x344   : > { %2186 = vst.msk [vmem:[%s4952_s8 + $0x2b] sm:$0x1] %vm1218_vm13, %v2170_v61  ;;  %2513 = vrot.lane.b32.xlu0 %v2480_v43, %s4470_s29  ;;  %v2004_v30 = vpop.permute.xlu1 %2003  ;;  %v2761_v14 = vrot.slane %v2734_v52, %v5032_v28 }
 0x345   : > { %2020 = vst.msk [vmem:[%s4952_s8 + $0xea] sm:$0x1] %vm1218_vm13, %v2004_v30  ;;  %v2602_v59 = vrot.slane %v2587_v46, %v4939_v53  ;;  %v2757_v46 = vrot.slane %v2734_v52, %v4939_v53 }
 0x346   : > { %v2145_v11 = vpop.permute.xlu0 %2144  ;;  %2515 = vrot.lane.b32.xlu1 %v2484_v0, %s4470_s29  ;;  %v2749_v0 = vrot.slane %v2726_v56, %v4939_v53  ;;  %s4485_s29 = smov 4  }
 0x347   : > { %v2171_v5 = vsel %vm2168_vm0, %v2145_v11, %v5652_v51  ;;  %v2753_v11 = vrot.slane %v2726_v56, %v5032_v28 }
 0x348   : > { %2187 = vst.msk [vmem:[%s4952_s8 + $0x4b] sm:$0x1] %vm1218_vm13, %v2171_v5  ;;  %2623 = vrot.lane.b32.xlu0 %v2594_v2, %s4471_s30  ;;  %v1453_v38 = vpop.permute.xlu1 %1452  ;;  %v2736_v5 = vcombine.high %v2726_v56, %v2726_v56 }
 0x34a   : > { %v2157_v22 = vpop.permute.xlu0 %2156  ;;  %2625 = vrot.lane.b32.xlu1 %v2598_v8, %s4471_s30  ;;  %v2769_v37 = vrot.slane %v2736_v5, %v5032_v28 }
 0x34b   : > { %v2174_v51 = vsel %vm2168_vm0, %v2157_v22, %v5660_v40  ;;  %v2765_v22 = vrot.slane %v2736_v5, %v4939_v53 }
 0x34c   : > { %2190 = vst.msk [vmem:[%s4952_s8 + $0xab] sm:$0x1] %vm1218_vm13, %v2174_v51  ;;  %2627 = vrot.lane.b32.xlu0 %v2602_v59, %s4471_s30  ;;  %v1469_v34 = vpop.permute.xlu1 %1468 }
 0x34e   : > { %v2161_v17 = vpop.permute.xlu0 %2160  ;;  %2629 = vrot.lane.b32.xlu1 %v2606_v16, %s4471_s30 }
 0x34f   : > { %v2175_v40 = vsel %vm2168_vm0, %v2161_v17, %v5672_v60 }
 0x350   : > { %2191 = vst.msk [vmem:[%s4952_s8 + $0xcb] sm:$0x1] %vm1218_vm13, %v2175_v40  ;;  %2631 = vrot.lane.b32.xlu0 %v2610_v9, %s4471_s30  ;;  %v1591_v49 = vpop.permute.xlu1 %1590 }
 0x351   : > { %1607 = vst.msk [vmem:[%s4952_s8 + $0xe4] sm:$0x1] %vm1218_vm13, %v1591_v49 }
 0x352   : > { %v1451_v21 = vpop.permute.xlu0 %1450  ;;  %2633 = vrot.lane.b32.xlu1 %v2614_v19, %s4471_s30 }
 0x353   : > { %v1474_v41 = vsel %vm1470_vm14, %v1451_v21, %v1453_v38  ;;  %v2703_v38 = vrot.slane %v2689_v4, %v4927_v48 }
 0x354   : > { %1490 = vst.msk [vmem:[%s4952_s8 + $0x63] sm:$0x1] %vm1218_vm13, %v1474_v41  ;;  %2635 = vrot.lane.b32.xlu0 %v2618_v26, %s4471_s30  ;;  %v1623_v60 = vpop.permute.xlu1 %1622 }
 0x355   : > { %1639 = vst.msk [vmem:[%s4952_s8 + $0xe5] sm:$0x1] %vm1218_vm13, %v1623_v60  ;;  %v2719_v42 = vrot.slane %v2703_v38, %v4927_v48 }
 0x356   : > { %v1467_v31 = vpop.permute.xlu0 %1466  ;;  %2637 = vrot.lane.b32.xlu1 %v2622_v20, %s4471_s30  ;;  %s4486_s30 = smov 98  }
 0x357   : > { %v1478_v33 = vsel %vm1470_vm14, %v1467_v31, %v1469_v34  ;;  %v2773_v34 = vrot.slane %v2719_v42, %v4939_v53  ;;  %v2777_v17 = vrot.slane %v2719_v42, %v5032_v28  ;;  %v2735_v40 = vcombine.high %v2719_v42, %v2719_v42 }
 0x358   : > { %1494 = vst.msk [vmem:[%s4952_s8 + $0xe3] sm:$0x1] %vm1218_vm13, %v1478_v33  ;;  %2655 = vrot.lane.b32.xlu0 %v2594_v2, %s4472_s5  ;;  %v1655_v44 = vpop.permute.xlu1 %1654  ;;  %v2874_v31 = vcombine.high %v2866_v58, %v2866_v58  ;;  %v2859_v33 = vcombine.high %v5131_v63, %v5131_v63 }
 0x359   : > { %1671 = vst.msk [vmem:[%s4952_s8 + $0xe6] sm:$0x1] %vm1218_vm13, %v1655_v44 }
 0x35a   : > { %v1800_v39 = vpop.permute.xlu0 %1799  ;;  %2657 = vrot.lane.b32.xlu1 %v2598_v8, %s4472_s5  ;;  %v2896_v18 = vrot.slane %v2874_v31, %v4927_v48 }
 0x35c   : > { %2659 = vrot.lane.b32.xlu0 %v2602_v59, %s4472_s5  ;;  %v1802_v45 = vpop.permute.xlu1 %1801  ;;  %v2705_v59 = vcombine.high %v2703_v38, %v2703_v38 }
 0x35d   : > { %v1823_v25 = vsel %vm1819_vm15, %v1800_v39, %v1802_v45  ;;  %v2882_v45 = vrot.slane %v2866_v58, %v4927_v48 }
 0x35e   : > { %1839 = vst.msk [vmem:[%s4952_s8 + $0x67] sm:$0x1] %vm1218_vm13, %v1823_v25  ;;  %v1816_v27 = vpop.permute.xlu0 %1815  ;;  %2661 = vrot.lane.b32.xlu1 %v2606_v16, %s4472_s5  ;;  %v2733_v16 = vrot.slane %v2705_v59, %v4927_v48 }
 0x35f   : > { %v2904_v24 = vcombine.high %v2882_v45, %v2882_v45 }
 0x360   : > { %2663 = vrot.lane.b32.xlu0 %v2610_v9, %s4472_s5  ;;  %v1818_v57 = vpop.permute.xlu1 %1817  ;;  %v2781_v6 = vrot.slane %v2733_v16, %v4939_v53  ;;  %v2737_v41 = vcombine.high %v2733_v16, %v2733_v16 }
 0x361   : > { %v1827_v36 = vsel %vm1819_vm15, %v1816_v27, %v1818_v57  ;;  %v2873_v57 = vrot.slane %v2859_v33, %v4927_v48  ;;  %v2919_v56 = vrot.slane %v2904_v24, %v4939_v53 }
 0x362   : > { %1843 = vst.msk [vmem:[%s4952_s8 + $0xe7] sm:$0x1] %vm1218_vm13, %v1827_v36  ;;  %v2149_v55 = vpop.permute.xlu0 %2148  ;;  %2665 = vrot.lane.b32.xlu1 %v2614_v19, %s4472_s5  ;;  %v2785_v19 = vrot.slane %v2733_v16, %v5032_v28  ;;  %v2797_v39 = vrot.slane %v2737_v41, %v4939_v53  ;;  %v2801_v27 = vrot.slane %v2737_v41, %v5032_v28 }
 0x364   : > { %2667 = vrot.lane.b32.xlu0 %v2618_v26, %s4472_s5  ;;  %v2151_v32 = vpop.permute.xlu1 %2150  ;;  %v2789_v26 = vrot.slane %v2735_v40, %v4939_v53 }
 0x365   : > { %v2172_v29 = vsel %vm2168_vm0, %v2149_v55, %v2151_v32  ;;  %v5868_v55 = vrot.slane %v2882_v45, %v4939_v53  ;;  %v5875_v32 = vrot.slane %v2896_v18, %v4939_v53 }
 0x366   : > { %2188 = vst.msk [vmem:[%s4952_s8 + $0x6b] sm:$0x1] %vm1218_vm13, %v2172_v29  ;;  %v2165_v3 = vpop.permute.xlu0 %2164  ;;  %2669 = vrot.lane.b32.xlu1 %v2622_v20, %s4472_s5  ;;  %v2793_v20 = vrot.slane %v2735_v40, %v5032_v28  ;;  %v2906_v29 = vcombine.high %v2896_v18, %v2896_v18  ;;  %s4148_s5 = sshll.u32 %s4434_s15, 12  ;;  %s4020_s15 = scalar_lea.sflag [#allocation5], %s4619_s6 }
 0x368   : > { %2802 = vrot.lane.b32.xlu0 %v2741_v13, %s4473_s11  ;;  %v2167_v43 = vpop.permute.xlu1 %2166 }
 0x369   : > { %v2176_v61 = vsel %vm2168_vm0, %v2165_v3, %v2167_v43  ;;  %v2875_v3 = vcombine.high %v2873_v57, %v2873_v57  ;;  %v2889_v43 = vrot.slane %v2873_v57, %v4927_v48 }
 0x36a   : > { %2192 = vst.msk [vmem:[%s4952_s8 + $0xeb] sm:$0x1] %vm1218_vm13, %v2176_v61  ;;  %v2275_v30 = vpop.permute.xlu0 %2274  ;;  %2804 = vrot.lane.b32.xlu1 %v2745_v54, %s4473_s11  ;;  %v2923_v61 = vrot.slane %v2906_v29, %v4939_v53 }
 0x36b   : > { %2298 = vst.msk [vmem:[%s4952_s8 + $0xc] sm:$0x1] %vm1218_vm13, %v2275_v30  ;;  %v2903_v30 = vrot.slane %v2875_v3, %v4927_v48  ;;  %v2927_v52 = vrot.slane %v2889_v43, %v4939_v53 }
 0x36c   : > { %2806 = vrot.lane.b32.xlu0 %v2749_v0, %s4473_s11  ;;  %v2277_v1 = vpop.permute.xlu1 %2276 }
 0x36d   : > { %2299 = vst.msk [vmem:[%s4952_s8 + $0x2c] sm:$0x1] %vm1218_vm13, %v2277_v1  ;;  %v2905_v1 = vcombine.high %v2889_v43, %v2889_v43 }
 0x36e   : > { %v2279_v2 = vpop.permute.xlu0 %2278  ;;  %2808 = vrot.lane.b32.xlu1 %v2753_v11, %s4473_s11 }
 0x36f   : > { %2300 = vst.msk [vmem:[%s4952_s8 + $0x4c] sm:$0x1] %vm1218_vm13, %v2279_v2  ;;  %v2931_v2 = vrot.slane %v2903_v30, %v4939_v53  ;;  %v2935_v38 = vrot.slane %v2905_v1, %v4939_v53 }
 0x370   : > { %2810 = vrot.lane.b32.xlu0 %v2757_v46, %s4473_s11  ;;  %v2281_v8 = vpop.permute.xlu1 %2280  ;;  %v2907_v46 = vcombine.high %v2903_v30, %v2903_v30 }
 0x371   : > { %2301 = vst.msk [vmem:[%s4952_s8 + $0x6c] sm:$0x1] %vm1218_vm13, %v2281_v8 }
 0x372   : > { %v2283_v35 = vpop.permute.xlu0 %2282  ;;  %2812 = vrot.lane.b32.xlu1 %v2761_v14, %s4473_s11  ;;  %v2939_v14 = vrot.slane %v2907_v46, %v4939_v53 }
 0x373   : > { %2302 = vst.msk [vmem:[%s4952_s8 + $0x8c] sm:$0x1] %vm1218_vm13, %v2283_v35 }
 0x374   : > { %2814 = vrot.lane.b32.xlu0 %v2765_v22, %s4473_s11  ;;  %v2285_v4 = vpop.permute.xlu1 %2284 }
 0x375   : > { %2303 = vst.msk [vmem:[%s4952_s8 + $0xac] sm:$0x1] %vm1218_vm13, %v2285_v4 }
 0x376   : > { %v2287_v51 = vpop.permute.xlu0 %2286  ;;  %2816 = vrot.lane.b32.xlu1 %v2769_v37, %s4473_s11 }
 0x377   : > { %2304 = vst.msk [vmem:[%s4952_s8 + $0xcc] sm:$0x1] %vm1218_vm13, %v2287_v51 }
 0x378   : > { %2818 = vrot.lane.b32.xlu0 %v2773_v34, %s4473_s11  ;;  %v2289_v62 = vpop.permute.xlu1 %2288 }
 0x379   : > { %2305 = vst.msk [vmem:[%s4952_s8 + $0xec] sm:$0x1] %vm1218_vm13, %v2289_v62 }
 0x37a   : > { %v2307_v9 = vpop.permute.xlu0 %2306  ;;  %2820 = vrot.lane.b32.xlu1 %v2777_v17, %s4473_s11 }
 0x37b   : > { %2330 = vst.msk [vmem:[%s4952_s8 + $0xd] sm:$0x1] %vm1218_vm13, %v2307_v9 }
 0x37c   : > { %2822 = vrot.lane.b32.xlu0 %v2781_v6, %s4473_s11  ;;  %v2309_v49 = vpop.permute.xlu1 %2308 }
 0x37d   : > { %2331 = vst.msk [vmem:[%s4952_s8 + $0x2d] sm:$0x1] %vm1218_vm13, %v2309_v49 }
 0x37e   : > { %v2311_v21 = vpop.permute.xlu0 %2310  ;;  %2824 = vrot.lane.b32.xlu1 %v2785_v19, %s4473_s11 }
 0x37f   : > { %2332 = vst.msk [vmem:[%s4952_s8 + $0x4d] sm:$0x1] %vm1218_vm13, %v2311_v21 }
 0x380   : > { %2826 = vrot.lane.b32.xlu0 %v2789_v26, %s4473_s11  ;;  %v2313_v60 = vpop.permute.xlu1 %2312  ;;  %v3045_v26 = vrot.slane %v3037_v10, %v4927_v48 }
 0x381   : > { %2333 = vst.msk [vmem:[%s4952_s8 + $0x6d] sm:$0x1] %vm1218_vm13, %v2313_v60 }
 0x382   : > { %v2315_v44 = vpop.permute.xlu0 %2314  ;;  %2828 = vrot.lane.b32.xlu1 %v2793_v20, %s4473_s11  ;;  %v3061_v31 = vrot.slane %v3045_v26, %v4927_v48  ;;  %v3053_v33 = vcombine.high %v3045_v26, %v3045_v26 }
 0x383   : > { %2334 = vst.msk [vmem:[%s4952_s8 + $0x8d] sm:$0x1] %vm1218_vm13, %v2315_v44 }
 0x384   : > { %2830 = vrot.lane.b32.xlu0 %v2797_v39, %s4473_s11  ;;  %v2317_v25 = vpop.permute.xlu1 %2316  ;;  %v3090_v45 = vrot.slane %v3061_v31, %v4939_v53  ;;  %v3094_v18 = vrot.slane %v3061_v31, %v5032_v28  ;;  %v3083_v24 = vcombine.high %v3061_v31, %v3061_v31 }
 0x385   : > { %2335 = vst.msk [vmem:[%s4952_s8 + $0xad] sm:$0x1] %vm1218_vm13, %v2317_v25  ;;  %v3075_v25 = vrot.slane %v3053_v33, %v4927_v48 }
 0x386   : > { %v2319_v36 = vpop.permute.xlu0 %2318  ;;  %2832 = vrot.lane.b32.xlu1 %v2801_v27, %s4473_s11  ;;  %v3106_v3 = vrot.slane %v3083_v24, %v4939_v53  ;;  %s4035_s11 = sshll.u32 %s4952_s8, 4  ;;  %s6504_s11 = int_to_ptr.vmem [resolvable:$true] %s4035_s11 }
 0x387   : > { %2336 = vst.msk [vmem:[%s4952_s8 + $0xcd] sm:$0x1] %vm1218_vm13, %v2319_v36 }
 0x388   : > { %2940 = vrot.lane.b32.xlu0 %v5868_v55, %s4474_s18  ;;  %v2321_v50 = vpop.permute.xlu1 %2320 }
 0x389   : > { %2337 = vst.msk [vmem:[%s4952_s8 + $0xed] sm:$0x1] %vm1218_vm13, %v2321_v50 }
 0x38a   : > { %v2339_v13 = vpop.permute.xlu0 %2338  ;;  %2942 = vrot.lane.b32.xlu1 %v5875_v32, %s4474_s18 }
 0x38b   : > { %2362 = vst.msk [vmem:[%s4952_s8 + $0xe] sm:$0x1] %vm1218_vm13, %v2339_v13  ;;  %v3085_v13 = vcombine.high %v3075_v25, %v3075_v25 }
 0x38c   : > { %2944 = vrot.lane.b32.xlu0 %v2919_v56, %s4474_s18  ;;  %v2341_v54 = vpop.permute.xlu1 %2340 }
 0x38d   : > { %2363 = vst.msk [vmem:[%s4952_s8 + $0x2e] sm:$0x1] %vm1218_vm13, %v2341_v54  ;;  %v3110_v54 = vrot.slane %v3083_v24, %v5032_v28  ;;  %v3114_v30 = vrot.slane %v3085_v13, %v4939_v53 }
 0x38e   : > { %v2343_v0 = vpop.permute.xlu0 %2342  ;;  %2946 = vrot.lane.b32.xlu1 %v2923_v61, %s4474_s18 }
 0x38f   : > { %2364 = vst.msk [vmem:[%s4952_s8 + $0x4e] sm:$0x1] %vm1218_vm13, %v2343_v0 }
 0x390   : > { %2948 = vrot.lane.b32.xlu0 %v2927_v52, %s4474_s18  ;;  %v2345_v11 = vpop.permute.xlu1 %2344 }
 0x391   : > { %2365 = vst.msk [vmem:[%s4952_s8 + $0x6e] sm:$0x1] %vm1218_vm13, %v2345_v11 }
 0x392   : > { %v2347_v5 = vpop.permute.xlu0 %2346  ;;  %2950 = vrot.lane.b32.xlu1 %v2931_v2, %s4474_s18 }
 0x393   : > { %2366 = vst.msk [vmem:[%s4952_s8 + $0x8e] sm:$0x1] %vm1218_vm13, %v2347_v5 }
 0x394   : > { %2952 = vrot.lane.b32.xlu0 %v2935_v38, %s4474_s18  ;;  %v2349_v8 = vpop.permute.xlu1 %2348 }
 0x395   : > { %2367 = vst.msk [vmem:[%s4952_s8 + $0xae] sm:$0x1] %vm1218_vm13, %v2349_v8 }
 0x396   : > { %v2351_v35 = vpop.permute.xlu0 %2350  ;;  %2954 = vrot.lane.b32.xlu1 %v2939_v14, %s4474_s18 }
 0x397   : > { %2368 = vst.msk [vmem:[%s4952_s8 + $0xce] sm:$0x1] %vm1218_vm13, %v2351_v35 }
 0x398   : > { %2972 = vrot.lane.b32.xlu0 %v5868_v55, %s4475_s4  ;;  %v2353_v22 = vpop.permute.xlu1 %2352 }
 0x399   : > { %2369 = vst.msk [vmem:[%s4952_s8 + $0xee] sm:$0x1] %vm1218_vm13, %v2353_v22 }
 0x39a   : > { %v2486_v42 = vpop.permute.xlu0 %2485  ;;  %2974 = vrot.lane.b32.xlu1 %v5875_v32, %s4475_s4 }
 0x39c   : > { %2976 = vrot.lane.b32.xlu0 %v2919_v56, %s4475_s4  ;;  %v2488_v59 = vpop.permute.xlu1 %2487 }
 0x39d   : > { %v2518_v4 = vsel %vm2517_vm1, %v2486_v42, %v2488_v59  ;;  %v3215_v42 = vrot.slane %v5157_v7, %v4927_v48 }
 0x39e   : > { %2534 = vst.msk [vmem:[%s4952_s8 + $0xf] sm:$0x1] %vm1218_vm13, %v2518_v4  ;;  %v2490_v37 = vpop.permute.xlu0 %2489  ;;  %2978 = vrot.lane.b32.xlu1 %v2923_v61, %s4475_s4 }
 0x3a0   : > { %2980 = vrot.lane.b32.xlu0 %v2927_v52, %s4475_s4  ;;  %v2492_v51 = vpop.permute.xlu1 %2491 }
 0x3a1   : > { %v2519_v34 = vsel %vm2517_vm1, %v2490_v37, %v2492_v51 }
 0x3a2   : > { %2535 = vst.msk [vmem:[%s4952_s8 + $0x2f] sm:$0x1] %vm1218_vm13, %v2519_v34  ;;  %v2494_v16 = vpop.permute.xlu0 %2493  ;;  %2982 = vrot.lane.b32.xlu1 %v2931_v2, %s4475_s4 }
 0x3a4   : > { %2984 = vrot.lane.b32.xlu0 %v2935_v38, %s4475_s4  ;;  %v2496_v62 = vpop.permute.xlu1 %2495 }
 0x3a5   : > { %v2520_v17 = vsel %vm2517_vm1, %v2494_v16, %v2496_v62  ;;  %v3223_v16 = vcombine.high %v3215_v42, %v3215_v42  ;;  %v3208_v62 = vcombine.high %v5157_v7, %v5157_v7 }
 0x3a6   : > { %2536 = vst.msk [vmem:[%s4952_s8 + $0x4f] sm:$0x1] %vm1218_vm13, %v2520_v17  ;;  %v2498_v9 = vpop.permute.xlu0 %2497  ;;  %2986 = vrot.lane.b32.xlu1 %v2939_v14, %s4475_s4 }
 0x3a8   : > { %3004 = vrot.lane.b32.xlu0 %v5868_v55, %s4476_s24  ;;  %v2500_v6 = vpop.permute.xlu1 %2499  ;;  %v3098_v55 = vrot.slane %v3075_v25, %v4939_v53 }
 0x3a9   : > { %v2521_v40 = vsel %vm2517_vm1, %v2498_v9, %v2500_v6  ;;  %v3231_v6 = vrot.slane %v3215_v42, %v4927_v48 }
 0x3aa   : > { %2537 = vst.msk [vmem:[%s4952_s8 + $0x6f] sm:$0x1] %vm1218_vm13, %v2521_v40  ;;  %v2502_v49 = vpop.permute.xlu0 %2501  ;;  %3006 = vrot.lane.b32.xlu1 %v5875_v32, %s4476_s24  ;;  %v3102_v32 = vrot.slane %v3075_v25, %v5032_v28 }
 0x3ab   : > { %v6019_v26 = vrot.slane %v3231_v6, %v4939_v53 }
 0x3ac   : > { %3008 = vrot.lane.b32.xlu0 %v2919_v56, %s4476_s24  ;;  %v2504_v19 = vpop.permute.xlu1 %2503  ;;  %v3052_v56 = vrot.slane %v3038_v12, %v4927_v48 }
 0x3ad   : > { %v2522_v58 = vsel %vm2517_vm1, %v2502_v49, %v2504_v19  ;;  %v3245_v19 = vrot.slane %v3223_v16, %v4927_v48 }
 0x3ae   : > { %2538 = vst.msk [vmem:[%s4952_s8 + $0x8f] sm:$0x1] %vm1218_vm13, %v2522_v58  ;;  %v2506_v21 = vpop.permute.xlu0 %2505  ;;  %3010 = vrot.lane.b32.xlu1 %v2923_v61, %s4476_s24  ;;  %v3068_v63 = vrot.slane %v3052_v56, %v4927_v48  ;;  %v3054_v0 = vcombine.high %v3052_v56, %v3052_v56  ;;  %v3222_v58 = vrot.slane %v3208_v62, %v4927_v48 }
 0x3af   : > { %v3255_v31 = vcombine.high %v3245_v19, %v3245_v19 }
 0x3b0   : > { %3012 = vrot.lane.b32.xlu0 %v2927_v52, %s4476_s24  ;;  %v2508_v41 = vpop.permute.xlu1 %2507  ;;  %v3118_v52 = vrot.slane %v3085_v13, %v5032_v28  ;;  %v3122_v11 = vrot.slane %v3068_v63, %v4939_v53  ;;  %v3126_v5 = vrot.slane %v3068_v63, %v5032_v28  ;;  %v3224_v33 = vcombine.high %v3222_v58, %v3222_v58 }
 0x3b1   : > { %v2523_v60 = vsel %vm2517_vm1, %v2506_v21, %v2508_v41  ;;  %v3253_v41 = vcombine.high %v3231_v6, %v3231_v6  ;;  %v3272_v25 = vrot.slane %v3255_v31, %v4939_v53 }
 0x3b2   : > { %2539 = vst.msk [vmem:[%s4952_s8 + $0xaf] sm:$0x1] %vm1218_vm13, %v2523_v60  ;;  %v2510_v20 = vpop.permute.xlu0 %2509  ;;  %3014 = vrot.lane.b32.xlu1 %v2931_v2, %s4476_s24  ;;  %v3082_v2 = vrot.slane %v3054_v0, %v4927_v48 }
 0x3b4   : > { %3016 = vrot.lane.b32.xlu0 %v2935_v38, %s4476_s24  ;;  %v2512_v44 = vpop.permute.xlu1 %2511  ;;  %v3130_v8 = vrot.slane %v3082_v2, %v4939_v53  ;;  %v3134_v22 = vrot.slane %v3082_v2, %v5032_v28  ;;  %v3086_v37 = vcombine.high %v3082_v2, %v3082_v2 }
 0x3b5   : > { %v2524_v39 = vsel %vm2517_vm1, %v2510_v20, %v2512_v44  ;;  %v6026_v20 = vrot.slane %v3245_v19, %v4939_v53 }
 0x3b6   : > { %2540 = vst.msk [vmem:[%s4952_s8 + $0xcf] sm:$0x1] %vm1218_vm13, %v2524_v39  ;;  %v2514_v10 = vpop.permute.xlu0 %2513  ;;  %3018 = vrot.lane.b32.xlu1 %v2939_v14, %s4476_s24  ;;  %v3084_v14 = vcombine.high %v3068_v63, %v3068_v63  ;;  %v3146_v9 = vrot.slane %v3086_v37, %v4939_v53  ;;  %v3150_v49 = vrot.slane %v3086_v37, %v5032_v28  ;;  %s6502_s24 = scalar_lea.hbm %s6560_s3, %s4148_s5 }
 0x3b7   : > { %v6033_v39 = vrot.slane %v3253_v41, %v4939_v53 }
 0x3b8   : > { %3151 = vrot.lane.b32.xlu0 %v3090_v45, %s4477_s9  ;;  %v2516_v27 = vpop.permute.xlu1 %2515  ;;  %v3138_v4 = vrot.slane %v3084_v14, %v4939_v53  ;;  %v3142_v34 = vrot.slane %v3084_v14, %v5032_v28 }
 0x3b9   : > { %v2525_v57 = vsel %vm2517_vm1, %v2514_v10, %v2516_v27  ;;  %v3238_v10 = vrot.slane %v3222_v58, %v4927_v48  ;;  %v3252_v27 = vrot.slane %v3224_v33, %v4927_v48 }
 0x3ba   : > { %2541 = vst.msk [vmem:[%s4952_s8 + $0xef] sm:$0x1] %vm1218_vm13, %v2525_v57  ;;  %v2624_v36 = vpop.permute.xlu0 %2623  ;;  %3153 = vrot.lane.b32.xlu1 %v3094_v18, %s4477_s9 }
 0x3bb   : > { %2647 = vst.msk [vmem:[%s4952_s8 + $0x10] sm:$0x1] %vm1218_vm13, %v2624_v36  ;;  %v3276_v36 = vrot.slane %v3238_v10, %v4939_v53 }
 0x3bc   : > { %3155 = vrot.lane.b32.xlu0 %v3098_v55, %s4477_s9  ;;  %v2626_v50 = vpop.permute.xlu1 %2625  ;;  %v3254_v55 = vcombine.high %v3238_v10, %v3238_v10 }
 0x3bd   : > { %2648 = vst.msk [vmem:[%s4952_s8 + $0x30] sm:$0x1] %vm1218_vm13, %v2626_v50  ;;  %v3280_v50 = vrot.slane %v3252_v27, %v4939_v53 }
 0x3be   : > { %v2628_v29 = vpop.permute.xlu0 %2627  ;;  %3157 = vrot.lane.b32.xlu1 %v3102_v32, %s4477_s9  ;;  %v3256_v32 = vcombine.high %v3252_v27, %v3252_v27  ;;  %v3284_v13 = vrot.slane %v3254_v55, %v4939_v53 }
 0x3bf   : > { %2649 = vst.msk [vmem:[%s4952_s8 + $0x50] sm:$0x1] %vm1218_vm13, %v2628_v29 }
 0x3c0   : > { %3159 = vrot.lane.b32.xlu0 %v3106_v3, %s4477_s9  ;;  %v2630_v43 = vpop.permute.xlu1 %2629 }
 0x3c1   : > { %2650 = vst.msk [vmem:[%s4952_s8 + $0x70] sm:$0x1] %vm1218_vm13, %v2630_v43  ;;  %v3288_v43 = vrot.slane %v3256_v32, %v4939_v53 }
 0x3c2   : > { %v2632_v61 = vpop.permute.xlu0 %2631  ;;  %3161 = vrot.lane.b32.xlu1 %v3110_v54, %s4477_s9 }
 0x3c3   : > { %2651 = vst.msk [vmem:[%s4952_s8 + $0x90] sm:$0x1] %vm1218_vm13, %v2632_v61 }
 0x3c4   : > { %3163 = vrot.lane.b32.xlu0 %v3114_v30, %s4477_s9  ;;  %v2634_v12 = vpop.permute.xlu1 %2633 }
 0x3c5   : > { %2652 = vst.msk [vmem:[%s4952_s8 + $0xb0] sm:$0x1] %vm1218_vm13, %v2634_v12 }
 0x3c6   : > { %v2636_v1 = vpop.permute.xlu0 %2635  ;;  %3165 = vrot.lane.b32.xlu1 %v3118_v52, %s4477_s9 }
 0x3c7   : > { %2653 = vst.msk [vmem:[%s4952_s8 + $0xd0] sm:$0x1] %vm1218_vm13, %v2636_v1 }
 0x3c8   : > { %3167 = vrot.lane.b32.xlu0 %v3122_v11, %s4477_s9  ;;  %v2638_v46 = vpop.permute.xlu1 %2637 }
 0x3c9   : > { %2654 = vst.msk [vmem:[%s4952_s8 + $0xf0] sm:$0x1] %vm1218_vm13, %v2638_v46 }
 0x3ca   : > { %v2656_v38 = vpop.permute.xlu0 %2655  ;;  %3169 = vrot.lane.b32.xlu1 %v3126_v5, %s4477_s9 }
 0x3cb   : > { %2679 = vst.msk [vmem:[%s4952_s8 + $0x11] sm:$0x1] %vm1218_vm13, %v2656_v38 }
 0x3cc   : > { %3171 = vrot.lane.b32.xlu0 %v3130_v8, %s4477_s9  ;;  %v2658_v35 = vpop.permute.xlu1 %2657  ;;  %v6073_v8 = vadd.f32 %v4988_v15, %v4924_v47 }
 0x3cd   : > { %2680 = vst.msk [vmem:[%s4952_s8 + $0x31] sm:$0x1] %vm1218_vm13, %v2658_v35 }
 0x3ce   : > { %v2660_v59 = vpop.permute.xlu0 %2659  ;;  %3173 = vrot.lane.b32.xlu1 %v3134_v22, %s4477_s9  ;;  %v3386_v15 = vcombine.low %v5157_v7, %v6073_v8  ;;  %v3387_v41 = vcombine.high %v5157_v7, %v6073_v8 }
 0x3cf   : > { %2681 = vst.msk [vmem:[%s4952_s8 + $0x51] sm:$0x1] %vm1218_vm13, %v2660_v59 }
 0x3d0   : > { %3175 = vrot.lane.b32.xlu0 %v3138_v4, %s4477_s9  ;;  %v2662_v51 = vpop.permute.xlu1 %2661  ;;  %v3394_v37 = vrot.slane %v3386_v15, %v4927_v48 }
 0x3d1   : > { %2682 = vst.msk [vmem:[%s4952_s8 + $0x71] sm:$0x1] %vm1218_vm13, %v2662_v51 }
 0x3d2   : > { %v2664_v17 = vpop.permute.xlu0 %2663  ;;  %3177 = vrot.lane.b32.xlu1 %v3142_v34, %s4477_s9  ;;  %v3410_v16 = vrot.slane %v3394_v37, %v4927_v48  ;;  %v3402_v62 = vcombine.high %v3394_v37, %v3394_v37 }
 0x3d3   : > { %2683 = vst.msk [vmem:[%s4952_s8 + $0x91] sm:$0x1] %vm1218_vm13, %v2664_v17 }
 0x3d4   : > { %3179 = vrot.lane.b32.xlu0 %v3146_v9, %s4477_s9  ;;  %v2666_v40 = vpop.permute.xlu1 %2665  ;;  %v3439_v6 = vrot.slane %v3410_v16, %v4939_v53  ;;  %v3443_v19 = vrot.slane %v3410_v16, %v5032_v28 }
 0x3d5   : > { %2684 = vst.msk [vmem:[%s4952_s8 + $0xb1] sm:$0x1] %vm1218_vm13, %v2666_v40  ;;  %v3424_v40 = vrot.slane %v3402_v62, %v4927_v48 }
 0x3d6   : > { %v2668_v21 = vpop.permute.xlu0 %2667  ;;  %3181 = vrot.lane.b32.xlu1 %v3150_v49, %s4477_s9  ;;  %s4360_s9 = scalar_lea.vmem %s6504_s11, 4096 }
 0x3d7   : > { %2685 = vst.msk [vmem:[%s4952_s8 + $0xd1] sm:$0x1] %vm1218_vm13, %v2668_v21  ;;  %v3447_v21 = vrot.slane %v3424_v40, %v4939_v53  ;;  %p4361_p8 = scmp.ne.s32.totalorder %s6504_s11, %s4360_s9 }
 0x3d8   : > { %3289 = vrot.lane.b32.xlu0 %v6019_v26, %s4478_s10  ;;  %v2670_v60 = vpop.permute.xlu1 %2669 }
 0x3d9   : > { %2686 = vst.msk [vmem:[%s4952_s8 + $0xf1] sm:$0x1] %vm1218_vm13, %v2670_v60  ;;  %p4362_p11 = pnand %p4361_p8, %p6568_p9 }
 0x3da   : > { %v2803_v44 = vpop.permute.xlu0 %2802  ;;  %3291 = vrot.lane.b32.xlu1 %v6026_v20, %s4478_s10 }
 0x3db   : > { %p4363_p0 = pneg %p4362_p11 }
 0x3dc   : > { %3293 = vrot.lane.b32.xlu0 %v6033_v39, %s4478_s10  ;;  %v2805_v45 = vpop.permute.xlu1 %2804 }
 0x3dd   : > { %v2835_v18 = vsel %vm2834_vm2, %v2803_v44, %v2805_v45  ;;  %v3434_v44 = vcombine.high %v3424_v40, %v3424_v40 }
 0x3de   : > { %2851 = vst.msk [vmem:[%s4952_s8 + $0x12] sm:$0x1] %vm1218_vm13, %v2835_v18  ;;  %v2807_v57 = vpop.permute.xlu0 %2806  ;;  %3295 = vrot.lane.b32.xlu1 %v3272_v25, %s4478_s10 }
 0x3e0   : > { %3297 = vrot.lane.b32.xlu0 %v3276_v36, %s4478_s10  ;;  %v2809_v24 = vpop.permute.xlu1 %2808 }
 0x3e1   : > { %v2836_v29 = vsel %vm2834_vm2, %v2807_v57, %v2809_v24 }
 0x3e2   : > { %2852 = vst.msk [vmem:[%s4952_s8 + $0x32] sm:$0x1] %vm1218_vm13, %v2836_v29  ;;  %v2811_v3 = vpop.permute.xlu0 %2810  ;;  %3299 = vrot.lane.b32.xlu1 %v3280_v50, %s4478_s10 }
 0x3e4   : > { %3301 = vrot.lane.b32.xlu0 %v3284_v13, %s4478_s10  ;;  %v2813_v56 = vpop.permute.xlu1 %2812 }
 0x3e5   : > { %v2837_v54 = vsel %vm2834_vm2, %v2811_v3, %v2813_v56 }
 0x3e6   : > { %2853 = vst.msk [vmem:[%s4952_s8 + $0x52] sm:$0x1] %vm1218_vm13, %v2837_v54  ;;  %v2815_v61 = vpop.permute.xlu0 %2814  ;;  %3303 = vrot.lane.b32.xlu1 %v3288_v43, %s4478_s10  ;;  %s4487_s10 = smov [#allocation6]  }
 0x3e8   : > { %3321 = vrot.lane.b32.xlu0 %v6019_v26, %s4479_s21  ;;  %v2817_v30 = vpop.permute.xlu1 %2816 }
 0x3e9   : > { %v2838_v63 = vsel %vm2834_vm2, %v2815_v61, %v2817_v30  ;;  %v3564_v61 = vrot.slane %v6073_v8, %v4927_v48 }
 0x3ea   : > { %2854 = vst.msk [vmem:[%s4952_s8 + $0x72] sm:$0x1] %vm1218_vm13, %v2838_v63  ;;  %v2819_v0 = vpop.permute.xlu0 %2818  ;;  %3323 = vrot.lane.b32.xlu1 %v6026_v20, %s4479_s21 }
 0x3ec   : > { %3325 = vrot.lane.b32.xlu0 %v6033_v39, %s4479_s21  ;;  %v2821_v12 = vpop.permute.xlu1 %2820 }
 0x3ed   : > { %v2839_v52 = vsel %vm2834_vm2, %v2819_v0, %v2821_v12 }
 0x3ee   : > { %2855 = vst.msk [vmem:[%s4952_s8 + $0x92] sm:$0x1] %vm1218_vm13, %v2839_v52  ;;  %v2823_v1 = vpop.permute.xlu0 %2822  ;;  %3327 = vrot.lane.b32.xlu1 %v3272_v25, %s4479_s21 }
 0x3f0   : > { %3329 = vrot.lane.b32.xlu0 %v3276_v36, %s4479_s21  ;;  %v2825_v11 = vpop.permute.xlu1 %2824 }
 0x3f1   : > { %v2840_v2 = vsel %vm2834_vm2, %v2823_v1, %v2825_v11  ;;  %v3572_v1 = vcombine.high %v3564_v61, %v3564_v61  ;;  %v3557_v11 = vcombine.high %v6073_v8, %v6073_v8 }
 0x3f2   : > { %2856 = vst.msk [vmem:[%s4952_s8 + $0xb2] sm:$0x1] %vm1218_vm13, %v2840_v2  ;;  %v2827_v46 = vpop.permute.xlu0 %2826  ;;  %3331 = vrot.lane.b32.xlu1 %v3280_v50, %s4479_s21 }
 0x3f4   : > { %3333 = vrot.lane.b32.xlu0 %v3284_v13, %s4479_s21  ;;  %v2829_v5 = vpop.permute.xlu1 %2828 }
 0x3f5   : > { %v2841_v38 = vsel %vm2834_vm2, %v2827_v46, %v2829_v5  ;;  %v3580_v5 = vrot.slane %v3564_v61, %v4927_v48 }
 0x3f6   : > { %2857 = vst.msk [vmem:[%s4952_s8 + $0xd2] sm:$0x1] %vm1218_vm13, %v2841_v38  ;;  %v2831_v14 = vpop.permute.xlu0 %2830  ;;  %3335 = vrot.lane.b32.xlu1 %v3288_v43, %s4479_s21  ;;  %s4364_s21 = sshll.u32 %s4487_s10, 4  ;;  %s4365_s21 = int_to_ptr.vmem [resolvable:$false] %s4364_s21 }
 0x3f7   : > { %v6177_v15 = vrot.slane %v3580_v5, %v4939_v53  ;;  %p4367_p5 = scmp.lt.s32.totalorder %s6504_s11, %s4365_s21 }
 0x3f8   : > { %3353 = vrot.lane.b32.xlu0 %v6019_v26, %s4480_s22  ;;  %v2833_v35 = vpop.permute.xlu1 %2832  ;;  %v3432_v26 = vcombine.high %v3410_v16, %v3410_v16 }
 0x3f9   : > { %v2842_v22 = vsel %vm2834_vm2, %v2831_v14, %v2833_v35  ;;  %v3594_v35 = vrot.slane %v3572_v1, %v4927_v48 }
 0x3fa   : > { %2858 = vst.msk [vmem:[%s4952_s8 + $0xf2] sm:$0x1] %vm1218_vm13, %v2842_v22  ;;  %v2941_v42 = vpop.permute.xlu0 %2940  ;;  %3355 = vrot.lane.b32.xlu1 %v6026_v20, %s4480_s22  ;;  %v3451_v20 = vrot.slane %v3424_v40, %v5032_v28  ;;  %v3455_v33 = vrot.slane %v3432_v26, %v4939_v53  ;;  %v3459_v10 = vrot.slane %v3432_v26, %v5032_v28 }
 0x3fb   : > { %2964 = vst.msk [vmem:[%s4952_s8 + $0x13] sm:$0x1] %vm1218_vm13, %v2941_v42  ;;  %v3571_v22 = vrot.slane %v3557_v11, %v4927_v48  ;;  %v6184_v37 = vrot.slane %v3594_v35, %v4939_v53 }
 0x3fc   : > { %3357 = vrot.lane.b32.xlu0 %v6033_v39, %s4480_s22  ;;  %v2943_v59 = vpop.permute.xlu1 %2942  ;;  %v3401_v39 = vrot.slane %v3387_v41, %v4927_v48 }
 0x3fd   : > { %2965 = vst.msk [vmem:[%s4952_s8 + $0x33] sm:$0x1] %vm1218_vm13, %v2943_v59  ;;  %v3602_v59 = vcombine.high %v3580_v5, %v3580_v5 }
 0x3fe   : > { %v2945_v4 = vpop.permute.xlu0 %2944  ;;  %3359 = vrot.lane.b32.xlu1 %v3272_v25, %s4480_s22  ;;  %v3463_v25 = vrot.slane %v3434_v44, %v4939_v53  ;;  %v3417_v27 = vrot.slane %v3401_v39, %v4927_v48  ;;  %v3403_v18 = vcombine.high %v3401_v39, %v3401_v39 }
 0x3ff   : > { %2966 = vst.msk [vmem:[%s4952_s8 + $0x53] sm:$0x1] %vm1218_vm13, %v2945_v4  ;;  %v6191_v62 = vrot.slane %v3602_v59, %v4939_v53 }
 0x400   : > { %3361 = vrot.lane.b32.xlu0 %v3276_v36, %s4480_s22  ;;  %v2947_v51 = vpop.permute.xlu1 %2946  ;;  %v3467_v36 = vrot.slane %v3434_v44, %v5032_v28  ;;  %v3471_v24 = vrot.slane %v3417_v27, %v4939_v53  ;;  %v3475_v29 = vrot.slane %v3417_v27, %v5032_v28  ;;  %v3433_v56 = vcombine.high %v3417_v27, %v3417_v27 }
 0x401   : > { %2967 = vst.msk [vmem:[%s4952_s8 + $0x73] sm:$0x1] %vm1218_vm13, %v2947_v51  ;;  %v3604_v51 = vcombine.high %v3594_v35, %v3594_v35  ;;  %v6235_v27 = vadd.f32 %v5016_v23, %v4924_v47 }
 0x402   : > { %v2949_v34 = vpop.permute.xlu0 %2948  ;;  %3363 = vrot.lane.b32.xlu1 %v3280_v50, %s4480_s22  ;;  %v3431_v50 = vrot.slane %v3403_v18, %v4927_v48  ;;  %v3487_v63 = vrot.slane %v3433_v56, %v4939_v53  ;;  %v3491_v52 = vrot.slane %v3433_v56, %v5032_v28 }
 0x403   : > { %2968 = vst.msk [vmem:[%s4952_s8 + $0x93] sm:$0x1] %vm1218_vm13, %v2949_v34  ;;  %v3573_v34 = vcombine.high %v3571_v22, %v3571_v22  ;;  %v3736_v1 = vcombine.high %v6073_v8, %v6235_v27 }
 0x404   : > { %3365 = vrot.lane.b32.xlu0 %v3284_v13, %s4480_s22  ;;  %v2951_v17 = vpop.permute.xlu1 %2950  ;;  %v3479_v13 = vrot.slane %v3431_v50, %v4939_v53  ;;  %v3483_v54 = vrot.slane %v3431_v50, %v5032_v28  ;;  %v3435_v0 = vcombine.high %v3431_v50, %v3431_v50 }
 0x405   : > { %2969 = vst.msk [vmem:[%s4952_s8 + $0xb3] sm:$0x1] %vm1218_vm13, %v2951_v17  ;;  %v3587_v17 = vrot.slane %v3571_v22, %v4927_v48  ;;  %v3601_v40 = vrot.slane %v3573_v34, %v4927_v48 }
 0x406   : > { %v2953_v9 = vpop.permute.xlu0 %2952  ;;  %3367 = vrot.lane.b32.xlu1 %v3288_v43, %s4480_s22  ;;  %v3495_v46 = vrot.slane %v3435_v0, %v4939_v53  ;;  %v3499_v14 = vrot.slane %v3435_v0, %v5032_v28  ;;  %s4366_s22 = scalar_lea.vmem %s4365_s21, 8192 }
 0x407   : > { %2970 = vst.msk [vmem:[%s4952_s8 + $0xd3] sm:$0x1] %vm1218_vm13, %v2953_v9  ;;  %v6211_v41 = vrot.slane %v3601_v40, %v4939_v53  ;;  %p4368_p13 = scmp.lt.s32.totalorder %s4366_s22, %s4360_s9 }
 0x408   : > { %3500 = vrot.lane.b32.xlu0 %v3439_v6, %s4481_s23  ;;  %v2955_v49 = vpop.permute.xlu1 %2954  ;;  %v6197_v6 = vrot.slane %v3604_v51, %v4939_v53 }
 0x409   : > { %2971 = vst.msk [vmem:[%s4952_s8 + $0xf3] sm:$0x1] %vm1218_vm13, %v2955_v49  ;;  %p4369_p2 = por %p4368_p13, %p4367_p5 }
 0x40a   : > { %v2973_v58 = vpop.permute.xlu0 %2972  ;;  %3502 = vrot.lane.b32.xlu1 %v3443_v19, %s4481_s23 }
 0x40b   : > { %2996 = vst.msk [vmem:[%s4952_s8 + $0x14] sm:$0x1] %vm1218_vm13, %v2973_v58  ;;  %v6206_v58 = vrot.slane %v3587_v17, %v4939_v53  ;;  %p4370_p4 = pnand %p4369_p2, %p4363_p0 }
 0x40c   : > { %3504 = vrot.lane.b32.xlu0 %v3447_v21, %s4481_s23  ;;  %v2975_v60 = vpop.permute.xlu1 %2974  ;;  %v3603_v21 = vcombine.high %v3587_v17, %v3587_v17 }
 0x40d   : > { %2997 = vst.msk [vmem:[%s4952_s8 + $0x34] sm:$0x1] %vm1218_vm13, %v2975_v60  ;;  %v3605_v60 = vcombine.high %v3601_v40, %v3601_v40 }
 0x40e   : > { %v2977_v31 = vpop.permute.xlu0 %2976  ;;  %3506 = vrot.lane.b32.xlu1 %v3451_v20, %s4481_s23 }
 0x40f   : > { %2998 = vst.msk [vmem:[%s4952_s8 + $0x54] sm:$0x1] %vm1218_vm13, %v2977_v31  ;;  %v6224_v39 = vrot.slane %v3605_v60, %v4939_v53 }
 0x410   : > { %3508 = vrot.lane.b32.xlu0 %v3455_v33, %s4481_s23  ;;  %v2979_v7 = vpop.permute.xlu1 %2978  ;;  %v6219_v33 = vrot.slane %v3603_v21, %v4939_v53 }
 0x411   : > { %2999 = vst.msk [vmem:[%s4952_s8 + $0x74] sm:$0x1] %vm1218_vm13, %v2979_v7 }
 0x412   : > { %v2981_v45 = vpop.permute.xlu0 %2980  ;;  %3510 = vrot.lane.b32.xlu1 %v3459_v10, %s4481_s23 }
 0x413   : > { %3000 = vst.msk [vmem:[%s4952_s8 + $0x94] sm:$0x1] %vm1218_vm13, %v2981_v45 }
 0x414   : > { %3512 = vrot.lane.b32.xlu0 %v3463_v25, %s4481_s23  ;;  %v2983_v57 = vpop.permute.xlu1 %2982 }
 0x415   : > { %3001 = vst.msk [vmem:[%s4952_s8 + $0xb4] sm:$0x1] %vm1218_vm13, %v2983_v57 }
 0x416   : > { %v2985_v55 = vpop.permute.xlu0 %2984  ;;  %3514 = vrot.lane.b32.xlu1 %v3467_v36, %s4481_s23 }
 0x417   : > { %3002 = vst.msk [vmem:[%s4952_s8 + $0xd4] sm:$0x1] %vm1218_vm13, %v2985_v55  ;;  %v3735_v55 = vcombine.low %v6073_v8, %v6235_v27 }
 0x418   : > { %3516 = vrot.lane.b32.xlu0 %v3471_v24, %s4481_s23  ;;  %v2987_v32 = vpop.permute.xlu1 %2986 }
 0x419   : > { %3003 = vst.msk [vmem:[%s4952_s8 + $0xf4] sm:$0x1] %vm1218_vm13, %v2987_v32  ;;  %v3743_v50 = vrot.slane %v3735_v55, %v4927_v48 }
 0x41a   : > { %v3005_v3 = vpop.permute.xlu0 %3004  ;;  %3518 = vrot.lane.b32.xlu1 %v3475_v29, %s4481_s23 }
 0x41b   : > { %3028 = vst.msk [vmem:[%s4952_s8 + $0x15] sm:$0x1] %vm1218_vm13, %v3005_v3 }
 0x41c   : > { %3520 = vrot.lane.b32.xlu0 %v3479_v13, %s4481_s23  ;;  %v3007_v43 = vpop.permute.xlu1 %3006  ;;  %v3751_v13 = vcombine.high %v3743_v50, %v3743_v50 }
 0x41d   : > { %3029 = vst.msk [vmem:[%s4952_s8 + $0x35] sm:$0x1] %vm1218_vm13, %v3007_v43  ;;  %v3759_v43 = vrot.slane %v3743_v50, %v4927_v48 }
 0x41e   : > { %v3009_v30 = vpop.permute.xlu0 %3008  ;;  %3522 = vrot.lane.b32.xlu1 %v3483_v54, %s4481_s23  ;;  %v3773_v0 = vrot.slane %v3751_v13, %v4927_v48 }
 0x41f   : > { %3030 = vst.msk [vmem:[%s4952_s8 + $0x55] sm:$0x1] %vm1218_vm13, %v3009_v30 }
 0x420   : > { %3524 = vrot.lane.b32.xlu0 %v3487_v63, %s4481_s23  ;;  %v3011_v12 = vpop.permute.xlu1 %3010  ;;  %v3788_v63 = vrot.slane %v3759_v43, %v4939_v53  ;;  %v3783_v22 = vcombine.high %v3773_v0, %v3773_v0 }
 0x421   : > { %3031 = vst.msk [vmem:[%s4952_s8 + $0x75] sm:$0x1] %vm1218_vm13, %v3011_v12 }
 0x422   : > { %v3013_v2 = vpop.permute.xlu0 %3012  ;;  %3526 = vrot.lane.b32.xlu1 %v3491_v52, %s4481_s23  ;;  %v3792_v52 = vrot.slane %v3759_v43, %v5032_v28 }
 0x423   : > { %3032 = vst.msk [vmem:[%s4952_s8 + $0x95] sm:$0x1] %vm1218_vm13, %v3013_v2  ;;  %v3796_v2 = vrot.slane %v3773_v0, %v4939_v53 }
 0x424   : > { %3528 = vrot.lane.b32.xlu0 %v3495_v46, %s4481_s23  ;;  %v3015_v38 = vpop.permute.xlu1 %3014  ;;  %v3781_v46 = vcombine.high %v3759_v43, %v3759_v43 }
 0x425   : > { %3033 = vst.msk [vmem:[%s4952_s8 + $0xb5] sm:$0x1] %vm1218_vm13, %v3015_v38  ;;  %v3800_v38 = vrot.slane %v3773_v0, %v5032_v28 }
 0x426   : > { %v3017_v42 = vpop.permute.xlu0 %3016  ;;  %3530 = vrot.lane.b32.xlu1 %v3499_v14, %s4481_s23  ;;  %v3750_v14 = vrot.slane %v3736_v1, %v4927_v48  ;;  %v3804_v35 = vrot.slane %v3781_v46, %v4939_v53 }
 0x427   : > { %3034 = vst.msk [vmem:[%s4952_s8 + $0xd5] sm:$0x1] %vm1218_vm13, %v3017_v42 }
 0x428   : > { %3638 = vrot.lane.b32.xlu0 %v6177_v15, %s4482_s7  ;;  %v3019_v4 = vpop.permute.xlu1 %3018  ;;  %v3752_v59 = vcombine.high %v3750_v14, %v3750_v14  ;;  %v3766_v51 = vrot.slane %v3750_v14, %v4927_v48 }
 0x429   : > { %3035 = vst.msk [vmem:[%s4952_s8 + $0xf5] sm:$0x1] %vm1218_vm13, %v3019_v4 }
 0x42a   : > { %v3152_v16 = vpop.permute.xlu0 %3151  ;;  %3640 = vrot.lane.b32.xlu1 %v6184_v37, %s4482_s7  ;;  %v3780_v40 = vrot.slane %v3752_v59, %v4927_v48  ;;  %v3782_v60 = vcombine.high %v3766_v51, %v3766_v51 }
 0x42c   : > { %3642 = vrot.lane.b32.xlu0 %v6191_v62, %s4482_s7  ;;  %v3154_v9 = vpop.permute.xlu1 %3153 }
 0x42d   : > { %v3184_v49 = vsel %vm3183_vm3, %v3152_v16, %v3154_v9  ;;  %v3816_v16 = vrot.slane %v3783_v22, %v5032_v28  ;;  %v3820_v9 = vrot.slane %v3766_v51, %v4939_v53 }
 0x42e   : > { %3200 = vst.msk [vmem:[%s4952_s8 + $0x16] sm:$0x1] %vm1218_vm13, %v3184_v49  ;;  %v3156_v19 = vpop.permute.xlu0 %3155  ;;  %3644 = vrot.lane.b32.xlu1 %v6197_v6, %s4482_s7 }
 0x430   : > { %3646 = vrot.lane.b32.xlu0 %v6206_v58, %s4482_s7  ;;  %v3158_v26 = vpop.permute.xlu1 %3157 }
 0x431   : > { %v3185_v20 = vsel %vm3183_vm3, %v3156_v19, %v3158_v26  ;;  %v3824_v19 = vrot.slane %v3766_v51, %v5032_v28  ;;  %v3828_v26 = vrot.slane %v3780_v40, %v4939_v53 }
 0x432   : > { %3201 = vst.msk [vmem:[%s4952_s8 + $0x36] sm:$0x1] %vm1218_vm13, %v3185_v20  ;;  %v3160_v31 = vpop.permute.xlu0 %3159  ;;  %3648 = vrot.lane.b32.xlu1 %v6211_v41, %s4482_s7 }
 0x434   : > { %3650 = vrot.lane.b32.xlu0 %v6219_v33, %s4482_s7  ;;  %v3162_v44 = vpop.permute.xlu1 %3161 }
 0x435   : > { %v3186_v7 = vsel %vm3183_vm3, %v3160_v31, %v3162_v44  ;;  %v3832_v31 = vrot.slane %v3780_v40, %v5032_v28 }
 0x436   : > { %3202 = vst.msk [vmem:[%s4952_s8 + $0x56] sm:$0x1] %vm1218_vm13, %v3186_v7  ;;  %v3164_v10 = vpop.permute.xlu0 %3163  ;;  %3652 = vrot.lane.b32.xlu1 %v6224_v39, %s4482_s7  ;;  %v3836_v7 = vrot.slane %v3782_v60, %v4939_v53 }
 0x438   : > { %3670 = vrot.lane.b32.xlu0 %v6177_v15, %s4483_s19  ;;  %v3166_v45 = vpop.permute.xlu1 %3165 }
 0x439   : > { %v3187_v25 = vsel %vm3183_vm3, %v3164_v10, %v3166_v45  ;;  %v3784_v10 = vcombine.high %v3780_v40, %v3780_v40 }
 0x43a   : > { %3203 = vst.msk [vmem:[%s4952_s8 + $0x76] sm:$0x1] %vm1218_vm13, %v3187_v25  ;;  %v3168_v18 = vpop.permute.xlu0 %3167  ;;  %3672 = vrot.lane.b32.xlu1 %v6184_v37, %s4483_s19  ;;  %v3840_v25 = vrot.slane %v3782_v60, %v5032_v28 }
 0x43b   : > { %v3848_v55 = vrot.slane %v3784_v10, %v5032_v28 }
 0x43c   : > { %3674 = vrot.lane.b32.xlu0 %v6191_v62, %s4483_s19  ;;  %v3170_v57 = vpop.permute.xlu1 %3169 }
 0x43d   : > { %v3188_v36 = vsel %vm3183_vm3, %v3168_v18, %v3170_v57  ;;  %v3844_v57 = vrot.slane %v3784_v10, %v4939_v53 }
 0x43e   : > { %3204 = vst.msk [vmem:[%s4952_s8 + $0x96] sm:$0x1] %vm1218_vm13, %v3188_v36  ;;  %v3172_v24 = vpop.permute.xlu0 %3171  ;;  %3676 = vrot.lane.b32.xlu1 %v6197_v6, %s4483_s19 }
 0x440   : > { %3678 = vrot.lane.b32.xlu0 %v6206_v58, %s4483_s19  ;;  %v3174_v47 = vpop.permute.xlu1 %3173 }
 0x441   : > { %v3189_v23 = vsel %vm3183_vm3, %v3172_v24, %v3174_v47  ;;  %v3913_v47 = vrot.slane %v6235_v27, %v4927_v48 }
 0x442   : > { %3205 = vst.msk [vmem:[%s4952_s8 + $0xb6] sm:$0x1] %vm1218_vm13, %v3189_v23  ;;  %v3176_v32 = vpop.permute.xlu0 %3175  ;;  %3680 = vrot.lane.b32.xlu1 %v6211_v41, %s4483_s19 }
 0x444   : > { %3682 = vrot.lane.b32.xlu0 %v6219_v33, %s4483_s19  ;;  %v3178_v29 = vpop.permute.xlu1 %3177 }
 0x445   : > { %v3190_v3 = vsel %vm3183_vm3, %v3176_v32, %v3178_v29  ;;  %v3921_v32 = vcombine.high %v3913_v47, %v3913_v47 }
 0x446   : > { %3206 = vst.msk [vmem:[%s4952_s8 + $0xd6] sm:$0x1] %vm1218_vm13, %v3190_v3  ;;  %v3180_v56 = vpop.permute.xlu0 %3179  ;;  %3684 = vrot.lane.b32.xlu1 %v6224_v39, %s4483_s19  ;;  %v3929_v3 = vrot.slane %v3913_v47, %v4927_v48 }
 0x448   : > { %3702 = vrot.lane.b32.xlu0 %v6177_v15, %s4484_s28  ;;  %v3182_v54 = vpop.permute.xlu1 %3181  ;;  %v3808_v15 = vrot.slane %v3781_v46, %v5032_v28  ;;  %v3906_v28 = vcombine.high %v6235_v27, %v6235_v27 }
 0x449   : > { %v3191_v61 = vsel %vm3183_vm3, %v3180_v56, %v3182_v54  ;;  %v3951_v56 = vcombine.high %v3929_v3, %v3929_v3 }
 0x44a   : > { %3207 = vst.msk [vmem:[%s4952_s8 + $0xf6] sm:$0x1] %vm1218_vm13, %v3191_v61  ;;  %v3290_v30 = vpop.permute.xlu0 %3289  ;;  %3704 = vrot.lane.b32.xlu1 %v6184_v37, %s4484_s28  ;;  %v3812_v37 = vrot.slane %v3783_v22, %v4939_v53 }
 0x44b   : > { %3313 = vst.msk [vmem:[%s4952_s8 + $0x17] sm:$0x1] %vm1218_vm13, %v3290_v30 }
 0x44c   : > { %3849 = vrot.lane.b32.xlu0 %v3788_v63, %s4485_s29  ;;  %v3292_v12 = vpop.permute.xlu1 %3291 }
 0x44d   : > { %3314 = vst.msk [vmem:[%s4952_s8 + $0x37] sm:$0x1] %vm1218_vm13, %v3292_v12 }
 0x44e   : > { %v3294_v11 = vpop.permute.xlu0 %3293  ;;  %3851 = vrot.lane.b32.xlu1 %v3792_v52, %s4485_s29 }
 0x44f   : > { %3315 = vst.msk [vmem:[%s4952_s8 + $0x57] sm:$0x1] %vm1218_vm13, %v3294_v11 }
 0x450   : > { %3853 = vrot.lane.b32.xlu0 %v3796_v2, %s4485_s29  ;;  %v3296_v5 = vpop.permute.xlu1 %3295 }
 0x451   : > { %3316 = vst.msk [vmem:[%s4952_s8 + $0x77] sm:$0x1] %vm1218_vm13, %v3296_v5 }
 0x452   : > { %v3298_v8 = vpop.permute.xlu0 %3297  ;;  %3855 = vrot.lane.b32.xlu1 %v3800_v38, %s4485_s29 }
 0x453   : > { %3317 = vst.msk [vmem:[%s4952_s8 + $0x97] sm:$0x1] %vm1218_vm13, %v3298_v8 }
 0x454   : > { %3857 = vrot.lane.b32.xlu0 %v3804_v35, %s4485_s29  ;;  %v3300_v42 = vpop.permute.xlu1 %3299 }
 0x455   : > { %3318 = vst.msk [vmem:[%s4952_s8 + $0xb7] sm:$0x1] %vm1218_vm13, %v3300_v42 }
 0x456   : > { %v3302_v4 = vpop.permute.xlu0 %3301  ;;  %3859 = vrot.lane.b32.xlu1 %v3808_v15, %s4485_s29 }
 0x457   : > { %3319 = vst.msk [vmem:[%s4952_s8 + $0xd7] sm:$0x1] %vm1218_vm13, %v3302_v4 }
 0x458   : > { %3861 = vrot.lane.b32.xlu0 %v3812_v37, %s4485_s29  ;;  %v3304_v34 = vpop.permute.xlu1 %3303 }
 0x459   : > { %3320 = vst.msk [vmem:[%s4952_s8 + $0xf7] sm:$0x1] %vm1218_vm13, %v3304_v34 }
 0x45a   : > { %v3322_v17 = vpop.permute.xlu0 %3321  ;;  %3863 = vrot.lane.b32.xlu1 %v3816_v16, %s4485_s29 }
 0x45b   : > { %3345 = vst.msk [vmem:[%s4952_s8 + $0x18] sm:$0x1] %vm1218_vm13, %v3322_v17 }
 0x45c   : > { %3865 = vrot.lane.b32.xlu0 %v3820_v9, %s4485_s29  ;;  %v3324_v49 = vpop.permute.xlu1 %3323 }
 0x45d   : > { %3346 = vst.msk [vmem:[%s4952_s8 + $0x38] sm:$0x1] %vm1218_vm13, %v3324_v49 }
 0x45e   : > { %v3326_v21 = vpop.permute.xlu0 %3325  ;;  %3867 = vrot.lane.b32.xlu1 %v3824_v19, %s4485_s29 }
 0x45f   : > { %3347 = vst.msk [vmem:[%s4952_s8 + $0x58] sm:$0x1] %vm1218_vm13, %v3326_v21 }
 0x460   : > { %3869 = vrot.lane.b32.xlu0 %v3828_v26, %s4485_s29  ;;  %v3328_v20 = vpop.permute.xlu1 %3327 }
 0x461   : > { %3348 = vst.msk [vmem:[%s4952_s8 + $0x78] sm:$0x1] %vm1218_vm13, %v3328_v20 }
 0x462   : > { %v3330_v44 = vpop.permute.xlu0 %3329  ;;  %3871 = vrot.lane.b32.xlu1 %v3832_v31, %s4485_s29 }
 0x463   : > { %3349 = vst.msk [vmem:[%s4952_s8 + $0x98] sm:$0x1] %vm1218_vm13, %v3330_v44 }
 0x464   : > { %3873 = vrot.lane.b32.xlu0 %v3836_v7, %s4485_s29  ;;  %v3332_v45 = vpop.permute.xlu1 %3331 }
 0x465   : > { %3350 = vst.msk [vmem:[%s4952_s8 + $0xb8] sm:$0x1] %vm1218_vm13, %v3332_v45 }
 0x466   : > { %v3334_v18 = vpop.permute.xlu0 %3333  ;;  %3875 = vrot.lane.b32.xlu1 %v3840_v25, %s4485_s29 }
 0x467   : > { %3351 = vst.msk [vmem:[%s4952_s8 + $0xd8] sm:$0x1] %vm1218_vm13, %v3334_v18 }
 0x468   : > { %3877 = vrot.lane.b32.xlu0 %v3844_v57, %s4485_s29  ;;  %v3336_v36 = vpop.permute.xlu1 %3335 }
 0x469   : > { %3352 = vst.msk [vmem:[%s4952_s8 + $0xf8] sm:$0x1] %vm1218_vm13, %v3336_v36 }
 0x46a   : > { %v3354_v24 = vpop.permute.xlu0 %3353  ;;  %3879 = vrot.lane.b32.xlu1 %v3848_v55, %s4485_s29 }
 0x46b   : > { %3377 = vst.msk [vmem:[%s4952_s8 + $0x19] sm:$0x1] %vm1218_vm13, %v3354_v24 }
 0x46c   : > { %3706 = vrot.lane.b32.xlu0 %v6191_v62, %s4484_s28  ;;  %v3356_v23 = vpop.permute.xlu1 %3355 }
 0x46d   : > { %3378 = vst.msk [vmem:[%s4952_s8 + $0x39] sm:$0x1] %vm1218_vm13, %v3356_v23 }
 0x46e   : > { %v3358_v50 = vpop.permute.xlu0 %3357  ;;  %3708 = vrot.lane.b32.xlu1 %v6197_v6, %s4484_s28  ;;  %v3920_v6 = vrot.slane %v3906_v28, %v4927_v48 }
 0x46f   : > { %3379 = vst.msk [vmem:[%s4952_s8 + $0x59] sm:$0x1] %vm1218_vm13, %v3358_v50 }
 0x470   : > { %3710 = vrot.lane.b32.xlu0 %v6206_v58, %s4484_s28  ;;  %v3360_v29 = vpop.permute.xlu1 %3359  ;;  %v3943_v58 = vrot.slane %v3921_v32, %v4927_v48  ;;  %v3922_v61 = vcombine.high %v3920_v6, %v3920_v6  ;;  %v3936_v63 = vrot.slane %v3920_v6, %v4927_v48 }
 0x471   : > { %3380 = vst.msk [vmem:[%s4952_s8 + $0x79] sm:$0x1] %vm1218_vm13, %v3360_v29 }
 0x472   : > { %v3362_v62 = vpop.permute.xlu0 %3361  ;;  %3712 = vrot.lane.b32.xlu1 %v6211_v41, %s4484_s28  ;;  %v3958_v41 = vrot.slane %v3929_v3, %v4939_v53  ;;  %v3953_v54 = vcombine.high %v3943_v58, %v3943_v58  ;;  %v3950_v52 = vrot.slane %v3922_v61, %v4927_v48  ;;  %v3974_v2 = vrot.slane %v3936_v63, %v4939_v53 }
 0x473   : > { %3381 = vst.msk [vmem:[%s4952_s8 + $0x99] sm:$0x1] %vm1218_vm13, %v3362_v62  ;;  %v3952_v46 = vcombine.high %v3936_v63, %v3936_v63 }
 0x474   : > { %3714 = vrot.lane.b32.xlu0 %v6219_v33, %s4484_s28  ;;  %v3364_v27 = vpop.permute.xlu1 %3363  ;;  %v3962_v33 = vrot.slane %v3943_v58, %v4939_v53  ;;  %v3970_v12 = vrot.slane %v3953_v54, %v4939_v53  ;;  %v3978_v38 = vrot.slane %v3950_v52, %v4939_v53  ;;  %v3954_v14 = vcombine.high %v3950_v52, %v3950_v52 }
 0x475   : > { %3382 = vst.msk [vmem:[%s4952_s8 + $0xb9] sm:$0x1] %vm1218_vm13, %v3364_v27  ;;  %v3982_v35 = vrot.slane %v3952_v46, %v4939_v53 }
 0x476   : > { %v3366_v13 = vpop.permute.xlu0 %3365  ;;  %3716 = vrot.lane.b32.xlu1 %v6224_v39, %s4484_s28  ;;  %v3966_v39 = vrot.slane %v3951_v56, %v4939_v53  ;;  %v3986_v42 = vrot.slane %v3954_v14, %v4939_v53 }
 0x477   : > { %3383 = vst.msk [vmem:[%s4952_s8 + $0xd9] sm:$0x1] %vm1218_vm13, %v3366_v13 }
 0x478   : > { %3987 = vrot.lane.b32.xlu0 %v3958_v41, %s4486_s30  ;;  %v3368_v43 = vpop.permute.xlu1 %3367 }
 0x479   : > { %3384 = vst.msk [vmem:[%s4952_s8 + $0xf9] sm:$0x1] %vm1218_vm13, %v3368_v43 }
 0x47a   : > { %v3501_v30 = vpop.permute.xlu0 %3500  ;;  %3989 = vrot.lane.b32.xlu1 %v3962_v33, %s4486_s30 }
 0x47c   : > { %3991 = vrot.lane.b32.xlu0 %v3966_v39, %s4486_s30  ;;  %v3503_v0 = vpop.permute.xlu1 %3502 }
 0x47d   : > { %v3533_v1 = vsel %vm3532_vm4, %v3501_v30, %v3503_v0 }
 0x47e   : > { %3549 = vst.msk [vmem:[%s4952_s8 + $0x1a] sm:$0x1] %vm1218_vm13, %v3533_v1  ;;  %v3505_v11 = vpop.permute.xlu0 %3504  ;;  %3993 = vrot.lane.b32.xlu1 %v3970_v12, %s4486_s30 }
 0x480   : > { %3995 = vrot.lane.b32.xlu0 %v3974_v2, %s4486_s30  ;;  %v3507_v5 = vpop.permute.xlu1 %3506 }
 0x481   : > { %v3534_v48 = vsel %vm3532_vm4, %v3505_v11, %v3507_v5 }
 0x482   : > { %3550 = vst.msk [vmem:[%s4952_s8 + $0x3a] sm:$0x1] %vm1218_vm13, %v3534_v48  ;;  %v3509_v8 = vpop.permute.xlu0 %3508  ;;  %3997 = vrot.lane.b32.xlu1 %v3978_v38, %s4486_s30 }
 0x484   : > { %3999 = vrot.lane.b32.xlu0 %v3982_v35, %s4486_s30  ;;  %v3511_v22 = vpop.permute.xlu1 %3510 }
 0x485   : > { %v3535_v15 = vsel %vm3532_vm4, %v3509_v8, %v3511_v22 }
 0x486   : > { %3551 = vst.msk [vmem:[%s4952_s8 + $0x5a] sm:$0x1] %vm1218_vm13, %v3535_v15  ;;  %v3513_v59 = vpop.permute.xlu0 %3512  ;;  %4001 = vrot.lane.b32.xlu1 %v3986_v42, %s4486_s30 }
 0x488   : > { %v3515_v4 = vpop.permute.xlu1 %3514 }
 0x489   : > { %v3536_v37 = vsel %vm3532_vm4, %v3513_v59, %v3515_v4 }
 0x48a   : > { %3552 = vst.msk [vmem:[%s4952_s8 + $0x7a] sm:$0x1] %vm1218_vm13, %v3536_v37  ;;  %v3517_v51 = vpop.permute.xlu0 %3516 }
 0x48c   : > { %v3519_v34 = vpop.permute.xlu1 %3518 }
 0x48d   : > { %v3537_v16 = vsel %vm3532_vm4, %v3517_v51, %v3519_v34 }
 0x48e   : > { %3553 = vst.msk [vmem:[%s4952_s8 + $0x9a] sm:$0x1] %vm1218_vm13, %v3537_v16  ;;  %v3521_v53 = vpop.permute.xlu0 %3520 }
 0x490   : > { %v3523_v17 = vpop.permute.xlu1 %3522 }
 0x491   : > { %v3538_v9 = vsel %vm3532_vm4, %v3521_v53, %v3523_v17 }
 0x492   : > { %3554 = vst.msk [vmem:[%s4952_s8 + $0xba] sm:$0x1] %vm1218_vm13, %v3538_v9  ;;  %v3525_v40 = vpop.permute.xlu0 %3524 }
 0x494   : > { %v3527_v49 = vpop.permute.xlu1 %3526 }
 0x495   : > { %v3539_v19 = vsel %vm3532_vm4, %v3525_v40, %v3527_v49 }
 0x496   : > { %3555 = vst.msk [vmem:[%s4952_s8 + $0xda] sm:$0x1] %vm1218_vm13, %v3539_v19  ;;  %v3529_v21 = vpop.permute.xlu0 %3528 }
 0x498   : > { %v3531_v26 = vpop.permute.xlu1 %3530 }
 0x499   : > { %v3540_v60 = vsel %vm3532_vm4, %v3529_v21, %v3531_v26 }
 0x49a   : > { %3556 = vst.msk [vmem:[%s4952_s8 + $0xfa] sm:$0x1] %vm1218_vm13, %v3540_v60  ;;  %v3639_v20 = vpop.permute.xlu0 %3638 }
 0x49b   : > { %3662 = vst.msk [vmem:[%s4952_s8 + $0x1b] sm:$0x1] %vm1218_vm13, %v3639_v20 }
 0x49c   : > { %v3641_v31 = vpop.permute.xlu1 %3640 }
 0x49d   : > { %3663 = vst.msk [vmem:[%s4952_s8 + $0x3b] sm:$0x1] %vm1218_vm13, %v3641_v31 }
 0x49e   : > { %v3643_v44 = vpop.permute.xlu0 %3642 }
 0x49f   : > { %3664 = vst.msk [vmem:[%s4952_s8 + $0x5b] sm:$0x1] %vm1218_vm13, %v3643_v44 }
 0x4a0   : > { %v3645_v7 = vpop.permute.xlu1 %3644 }
 0x4a1   : > { %3665 = vst.msk [vmem:[%s4952_s8 + $0x7b] sm:$0x1] %vm1218_vm13, %v3645_v7 }
 0x4a2   : > { %v3647_v10 = vpop.permute.xlu0 %3646 }
 0x4a3   : > { %3666 = vst.msk [vmem:[%s4952_s8 + $0x9b] sm:$0x1] %vm1218_vm13, %v3647_v10 }
 0x4a4   : > { %v3649_v45 = vpop.permute.xlu1 %3648 }
 0x4a5   : > { %3667 = vst.msk [vmem:[%s4952_s8 + $0xbb] sm:$0x1] %vm1218_vm13, %v3649_v45 }
 0x4a6   : > { %v3651_v25 = vpop.permute.xlu0 %3650 }
 0x4a7   : > { %3668 = vst.msk [vmem:[%s4952_s8 + $0xdb] sm:$0x1] %vm1218_vm13, %v3651_v25 }
 0x4a8   : > { %v3653_v18 = vpop.permute.xlu1 %3652 }
 0x4a9   : > { %3669 = vst.msk [vmem:[%s4952_s8 + $0xfb] sm:$0x1] %vm1218_vm13, %v3653_v18 }
 0x4aa   : > { %v3671_v57 = vpop.permute.xlu0 %3670 }
 0x4ab   : > { %3694 = vst.msk [vmem:[%s4952_s8 + $0x1c] sm:$0x1] %vm1218_vm13, %v3671_v57 }
 0x4ac   : > { %v3673_v36 = vpop.permute.xlu1 %3672 }
 0x4ad   : > { %3695 = vst.msk [vmem:[%s4952_s8 + $0x3c] sm:$0x1] %vm1218_vm13, %v3673_v36 }
 0x4ae   : > { %v3675_v55 = vpop.permute.xlu0 %3674 }
 0x4af   : > { %3696 = vst.msk [vmem:[%s4952_s8 + $0x5c] sm:$0x1] %vm1218_vm13, %v3675_v55 }
 0x4b0   : > { %v3677_v24 = vpop.permute.xlu1 %3676 }
 0x4b1   : > { %3697 = vst.msk [vmem:[%s4952_s8 + $0x7c] sm:$0x1] %vm1218_vm13, %v3677_v24 }
 0x4b2   : > { %v3679_v47 = vpop.permute.xlu0 %3678 }
 0x4b3   : > { %3698 = vst.msk [vmem:[%s4952_s8 + $0x9c] sm:$0x1] %vm1218_vm13, %v3679_v47 }
 0x4b4   : > { %v3681_v23 = vpop.permute.xlu1 %3680 }
 0x4b5   : > { %3699 = vst.msk [vmem:[%s4952_s8 + $0xbc] sm:$0x1] %vm1218_vm13, %v3681_v23 }
 0x4b6   : > { %v3683_v50 = vpop.permute.xlu0 %3682 }
 0x4b7   : > { %3700 = vst.msk [vmem:[%s4952_s8 + $0xdc] sm:$0x1] %vm1218_vm13, %v3683_v50 }
 0x4b8   : > { %v3685_v28 = vpop.permute.xlu1 %3684 }
 0x4b9   : > { %3701 = vst.msk [vmem:[%s4952_s8 + $0xfc] sm:$0x1] %vm1218_vm13, %v3685_v28 }
 0x4ba   : > { %v3703_v32 = vpop.permute.xlu0 %3702 }
 0x4bb   : > { %3726 = vst.msk [vmem:[%s4952_s8 + $0x1d] sm:$0x1] %vm1218_vm13, %v3703_v32 }
 0x4bc   : > { %v3705_v29 = vpop.permute.xlu1 %3704 }
 0x4bd   : > { %3727 = vst.msk [vmem:[%s4952_s8 + $0x3d] sm:$0x1] %vm1218_vm13, %v3705_v29 }
 0x4be   : > { %v3850_v62 = vpop.permute.xlu0 %3849 }
 0x4c0   : > { %v3852_v3 = vpop.permute.xlu1 %3851 }
 0x4c1   : > { %v3882_v6 = vsel %vm3881_vm5, %v3850_v62, %v3852_v3 }
 0x4c2   : > { %3898 = vst.msk [vmem:[%s4952_s8 + $0x1e] sm:$0x1] %vm1218_vm13, %v3882_v6  ;;  %v3854_v27 = vpop.permute.xlu0 %3853 }
 0x4c4   : > { %v3856_v58 = vpop.permute.xlu1 %3855 }
 0x4c5   : > { %v3883_v13 = vsel %vm3881_vm5, %v3854_v27, %v3856_v58 }
 0x4c6   : > { %3899 = vst.msk [vmem:[%s4952_s8 + $0x3e] sm:$0x1] %vm1218_vm13, %v3883_v13  ;;  %v3858_v41 = vpop.permute.xlu0 %3857 }
 0x4c8   : > { %v3860_v56 = vpop.permute.xlu1 %3859 }
 0x4c9   : > { %v3884_v43 = vsel %vm3881_vm5, %v3858_v41, %v3860_v56 }
 0x4ca   : > { %3900 = vst.msk [vmem:[%s4952_s8 + $0x5e] sm:$0x1] %vm1218_vm13, %v3884_v43  ;;  %v3862_v33 = vpop.permute.xlu0 %3861 }
 0x4cc   : > { %v3864_v54 = vpop.permute.xlu1 %3863 }
 0x4cd   : > { %v3885_v61 = vsel %vm3881_vm5, %v3862_v33, %v3864_v54 }
 0x4ce   : > { %3901 = vst.msk [vmem:[%s4952_s8 + $0x7e] sm:$0x1] %vm1218_vm13, %v3885_v61  ;;  %v3866_v30 = vpop.permute.xlu0 %3865 }
 0x4d0   : > { %v3868_v39 = vpop.permute.xlu1 %3867 }
 0x4d1   : > { %v3886_v63 = vsel %vm3881_vm5, %v3866_v30, %v3868_v39 }
 0x4d2   : > { %3902 = vst.msk [vmem:[%s4952_s8 + $0x9e] sm:$0x1] %vm1218_vm13, %v3886_v63  ;;  %v3870_v0 = vpop.permute.xlu0 %3869 }
 0x4d4   : > { %v3872_v12 = vpop.permute.xlu1 %3871 }
 0x4d5   : > { %v3887_v52 = vsel %vm3881_vm5, %v3870_v0, %v3872_v12 }
 0x4d6   : > { %3903 = vst.msk [vmem:[%s4952_s8 + $0xbe] sm:$0x1] %vm1218_vm13, %v3887_v52  ;;  %v3874_v1 = vpop.permute.xlu0 %3873 }
 0x4d8   : > { %v3876_v11 = vpop.permute.xlu1 %3875 }
 0x4d9   : > { %v3888_v2 = vsel %vm3881_vm5, %v3874_v1, %v3876_v11 }
 0x4da   : > { %3904 = vst.msk [vmem:[%s4952_s8 + $0xde] sm:$0x1] %vm1218_vm13, %v3888_v2  ;;  %v3878_v46 = vpop.permute.xlu0 %3877 }
 0x4dc   : > { %v3880_v5 = vpop.permute.xlu1 %3879 }
 0x4dd   : > { %v3889_v38 = vsel %vm3881_vm5, %v3878_v46, %v3880_v5 }
 0x4de   : > { %3905 = vst.msk [vmem:[%s4952_s8 + $0xfe] sm:$0x1] %vm1218_vm13, %v3889_v38  ;;  %v3707_v14 = vpop.permute.xlu0 %3706 }
 0x4df   : > { %3728 = vst.msk [vmem:[%s4952_s8 + $0x5d] sm:$0x1] %vm1218_vm13, %v3707_v14 }
 0x4e0   : > { %v3709_v48 = vpop.permute.xlu1 %3708 }
 0x4e1   : > { %3729 = vst.msk [vmem:[%s4952_s8 + $0x7d] sm:$0x1] %vm1218_vm13, %v3709_v48 }
 0x4e2   : > { %v3711_v8 = vpop.permute.xlu0 %3710 }
 0x4e3   : > { %3730 = vst.msk [vmem:[%s4952_s8 + $0x9d] sm:$0x1] %vm1218_vm13, %v3711_v8 }
 0x4e4   : > { %v3713_v35 = vpop.permute.xlu1 %3712 }
 0x4e5   : > { %3731 = vst.msk [vmem:[%s4952_s8 + $0xbd] sm:$0x1] %vm1218_vm13, %v3713_v35 }
 0x4e6   : > { %v3715_v22 = vpop.permute.xlu0 %3714 }
 0x4e7   : > { %3732 = vst.msk [vmem:[%s4952_s8 + $0xdd] sm:$0x1] %vm1218_vm13, %v3715_v22 }
 0x4e8   : > { %v3717_v42 = vpop.permute.xlu1 %3716 }
 0x4e9   : > { %3733 = vst.msk [vmem:[%s4952_s8 + $0xfd] sm:$0x1] %vm1218_vm13, %v3717_v42 }
 0x4ea   : > { %v3988_v15 = vpop.permute.xlu0 %3987 }
 0x4eb   : > { %4011 = vst.msk [vmem:[%s4952_s8 + $0x1f] sm:$0x1] %vm1218_vm13, %v3988_v15 }
 0x4ec   : > { %v3990_v59 = vpop.permute.xlu1 %3989 }
 0x4ed   : > { %4012 = vst.msk [vmem:[%s4952_s8 + $0x3f] sm:$0x1] %vm1218_vm13, %v3990_v59 }
 0x4ee   : > { %v3992_v4 = vpop.permute.xlu0 %3991 }
 0x4ef   : > { %4013 = vst.msk [vmem:[%s4952_s8 + $0x5f] sm:$0x1] %vm1218_vm13, %v3992_v4 }
 0x4f0   : > { %v3994_v37 = vpop.permute.xlu1 %3993 }
 0x4f1   : > { %4014 = vst.msk [vmem:[%s4952_s8 + $0x7f] sm:$0x1] %vm1218_vm13, %v3994_v37 }
 0x4f2   : > { %v3996_v51 = vpop.permute.xlu0 %3995 }
 0x4f3   : > { %4015 = vst.msk [vmem:[%s4952_s8 + $0x9f] sm:$0x1] %vm1218_vm13, %v3996_v51 }
 0x4f4   : > { %v3998_v34 = vpop.permute.xlu1 %3997 }
 0x4f5   : > { %4016 = vst.msk [vmem:[%s4952_s8 + $0xbf] sm:$0x1] %vm1218_vm13, %v3998_v34 }
 0x4f6   : > { %v4000_v16 = vpop.permute.xlu0 %3999 }
 0x4f7   : > { %4017 = vst.msk [vmem:[%s4952_s8 + $0xdf] sm:$0x1] %vm1218_vm13, %v4000_v16 }
 0x4f8   : > { %v4002_v53 = vpop.permute.xlu1 %4001 }
 0x4f9   : > { %4018 = vst.msk [vmem:[%s4952_s8 + $0xff] sm:$0x1] %vm1218_vm13, %v4002_v53 }
 0x4fa   : > { %4373 = shalt.err (!%p4370_p4)
}
 0x4fb   : > { %s4374_s8 = scalar_lea.hbm %s6502_s24, 4096  ;;  %s4378_s19 = scalar_lea.hbm %s6560_s3, 8192 }
 0x4fc   : > { %p4375_p6 = scmp.ne.s32.totalorder %s6502_s24, %s4374_s8  ;;  %p4379_p12 = scmp.lt.u32.totalorder %s6502_s24, %s6560_s3 }
 0x4fd   : > { %p4380_p1 = scmp.lt.u32.totalorder %s4378_s19, %s4374_s8  ;;  %p4382_p8 = scmp.lt.u32.totalorder %s4374_s8, %s6502_s24 }
 0x4fe   : > { %p4376_p7 = pnand %p4375_p6, %p6568_p9 }
 0x4ff   : > { %p4381_p3 = por %p4380_p1, %p4379_p12 }
 0x500   : > { %p4377_p10 = pneg %p4376_p7 }
 0x501   : > { %p4383_p11 = por %p4382_p8, %p4381_p3 }
 0x503   : > { %p4384_p0 = pnand %p4383_p11, %p4377_p10 }
 0x505   : > { %4387 = shalt.err (!%p4384_p0)
}
 0x506   : > { %s4488_s30 = smov 128   ;;  %s4489_s5 = smov 8  }
 0x507   : > { %4211 = dma.vmem_to_hbm [thread:$0]  (%p6568_p9), %s6504_s11, 4096, %s6502_s24, %s4020_s15, %s4488_s30, %s4488_s30, %s4489_s5  }
 0x508 PF: > { %s4050_s18 = sand.u32 1, %s4422_s12   ;;  %p6569_p5 = scmp.ne.s32.totalorder %s6565_s27, 0 }
 0x509   : > { %p6570_p13 = scmp.ge.s32.totalorder %s4442_s17, 2  ;;  %s4051_s4 = scalar_lea.sflag [#allocation5], %s4050_s18 }
 0x50b   : > { %p4218_p2 = pnand %p6570_p13, %p6569_p5 }
 0x50d   : > { %4417 = dma.done.wait (!%p4218_p2), %s4051_s4, 4096  }
 0x50e   : > { %4419 = vsyncadd (!%p4218_p2), %s4051_s4, 4294963200  ;;  %s19_s17 = sadd.s32 1, %s4442_s17   ;;  %s6571_s12 = smov %s4426_s13 }
 0x50f   : > { %p16_p4 = scmp.ge.s32.totalorder %s19_s17, 4   ;;  %s6572_s13 = smov %s4430_s14 }
 0x510   : > { %s6573_s14 = smov %s4566_s26  ;;  %s6574_s15 = smov %s4438_s16 }
 0x511   : > { %s6575_s16 = smov %s6577_s20  ;;  %18 = sbr.rel (!%p16_p4) target bundleno = 6 (0x6), region = 77 }
 0x518   :  { %4056 = vsyncpa [#allocation4], 1 }
 0x519   :  { %4058 = vsyncpa [#allocation4 + $0x1], 1 }
 0x51a   :  { %4059 = vsyncpa [#allocation5], 1 }
 0x51b   :  { %4061 = vsyncpa [#allocation5 + $0x1], 1 }

</bundles_post_ra>
